<compile_context>
chip_gen: v7x
topology: tpu7x:2x2x1
jax: 0.10.0
libtpu: 0.0.40
codegen_flags: <defaults>
</compile_context>

<pallas_src>
import jax
import jax.numpy as jnp
from jax import lax
from jax.experimental import pallas as pl
from jax.experimental.pallas import tpu as pltpu

# ---------------- small synthetic HiAGM-TP configuration ----------------
VOCAB = 64            # vocab size
EMB_DIM = 32          # config.embedding.token.dimension
RNN_HIDDEN = 32       # per-direction GRU hidden size
KERNEL_SIZES = (2, 3, 4)   # text_encoder.CNN.kernel_size
NUM_KERNEL = 16       # text_encoder.CNN.num_kernel
TOP_K = 1             # text_encoder.topK_max_pooling
NUM_LABELS = 8        # len(vocab.v2i['label'])
NODE_DIM = 32         # structure_encoder.node.dimension
BATCH = 2
SEQ_LEN = 16

PAD_MAX = max(k // 2 for k in KERNEL_SIZES)          # = 2, shared zero-padded time buffer
KMAX = max(KERNEL_SIZES)                             # = 4, fused conv window width
LOUT = SEQ_LEN + 2 * (KMAX // 2) - KMAX + 1          # = 17 fused conv windows
NUM_BRANCH = len(KERNEL_SIZES)
FEAT = NUM_BRANCH * NUM_KERNEL * TOP_K               # = 48 text-feature width
ND = NUM_LABELS * NODE_DIM                           # = 256 flattened label-node width
BIGW = 3 * ND + 3 * NUM_LABELS                       # = 792 folded trans+GCN output width


# ============================ fused Pallas kernel ============================

def _hiagm_fused_kernel(
    tok_ref, table_ref, bih_ref, whh_ref, bhh_ref,
    convw_ref, convb_ref,
    bigw_hbm_ref, bigb_ref, eexp_ref, cw_ref, cb_ref,
    o_ref,
    ih_ref, hpad_ref, bigw_vmem, dma_sem,
):
    B, L, H, C, N = BATCH, SEQ_LEN, RNN_HIDDEN, NUM_KERNEL, NUM_LABELS
    H2 = 2 * H

    # ---- start the DMA of the late-used folded trans+GCN weight now; it overlaps the
    #      serial GRU recurrence and is waited on just before the GCN section.
    bigw_copy = pltpu.make_async_copy(bigw_hbm_ref, bigw_vmem, dma_sem)
    bigw_copy.start()

    # ---- token embedding + BiGRU input projection + fwd/bwd gate mixing, all as ONE
    #      one-hot matmul.  gru_table rows 0:V drive the forward gate columns and rows
    #      V:2V the backward columns; row (t, b) of the one-hot carries token[b, t] in
    #      the first half and token[b, L-1-t] (offset by V) in the second half.
    tok = tok_ref[...]                                                     # [L*B, 2] int32
    iota_v = lax.broadcasted_iota(jnp.int32, (L * B, 2 * VOCAB), 1)
    onehot = jnp.logical_or(iota_v == tok[:, 0:1],
                            iota_v == tok[:, 1:2]).astype(jnp.float32)     # [L*B, 2V]
    ih_ref[...] = (jnp.dot(onehot, table_ref[...],
                           preferred_element_type=jnp.float32)
                   + bih_ref[...])                                         # [L*B, 6H]

    # ---- fused fwd+bwd GRU recurrence (fully unrolled; h = [h_fwd | h_bwd]).
    #      packed gate-column layout everywhere: [r_f, r_b, z_f, z_b, n_f, n_b]
    whh = whh_ref[...]                                                     # [2H, 6H] blk-diag
    bhh = bhh_ref[...]                                                     # [1, 6H]
    hpad_ref[...] = jnp.zeros_like(hpad_ref)        # zero-padded (PAD_MAX each side) outputs
    h = jnp.zeros((B, H2), jnp.float32)
    for t in range(L):                              # serial critical path, fully unrolled
        ih = ih_ref[t * B:(t + 1) * B, :]                                  # [B, 6H]
        hh = jnp.dot(h, whh, preferred_element_type=jnp.float32) + bhh     # [B, 6H]
        rz = jax.nn.sigmoid(ih[:, :2 * H2] + hh[:, :2 * H2])   # one EUP push over 128 lanes
        r, z = rz[:, :H2], rz[:, H2:]
        n = jnp.tanh(ih[:, 2 * H2:] + r * hh[:, 2 * H2:])      # b_hn stays inside r*(...)
        h = n + z * (h - n)
        fr = (PAD_MAX + t) * B                                  # fwd hidden @ time t
        br = (PAD_MAX + L - 1 - t) * B                          # bwd hidden @ time L-1-t
        hpad_ref[fr:fr + B, 0:H] = h[:, :H]
        hpad_ref[br:br + B, H:H2] = h[:, H:]

    # ---- all Conv1d(padding=k//2) branches fused into ONE im2col matmul + ReLU ----
    pieces = [hpad_ref[j * B:(j + LOUT) * B, :] for j in range(KMAX)]      # 4 x [LOUT*B, 2H]
    cols = jnp.concatenate(pieces, axis=-1)                                # [LOUT*B, 4*2H]
    y = (jnp.dot(cols, convw_ref[...], preferred_element_type=jnp.float32)
         + convb_ref[...])                                                 # [LOUT*B, 3*C]
    y = jnp.maximum(y, 0.0)                                                # ReLU -> y >= 0
    # the k=3 branch has only L (=16) valid output positions: zero its channel block in
    # the spurious 17th fused window before pooling.
    row_i = lax.broadcasted_iota(jnp.int32, (LOUT * B, NUM_BRANCH * C), 0)
    ch_i = lax.broadcasted_iota(jnp.int32, (LOUT * B, NUM_BRANCH * C), 1)
    spurious = (row_i >= L * B) & (ch_i >= C) & (ch_i < 2 * C)
    y = jnp.where(spurious, 0.0, y)
    # top-1 max pooling per example (rows are (window, batch), batch minor); zero-fill
    # masking is exact because y >= 0 after ReLU and TOP_K == 1.
    bid = lax.broadcasted_iota(jnp.int32, (LOUT * B, 1), 0) % B
    text_feature = jnp.concatenate(
        [jnp.max(jnp.where(bid == bb, y, 0.0), axis=0, keepdims=True) for bb in range(B)],
        axis=0)                                                            # [B, 3*C]

    # ---- HiAGM-TP transformation Linear + HierarchyGCN, folded to ONE matmul ----
    bigw_copy.wait()                                # weight DMA hidden behind the GRU/conv
    big = (jnp.dot(text_feature, bigw_vmem[...],
                   preferred_element_type=jnp.float32) + bigb_ref[...])    # [B, 3*ND+3*N]
    hflat = big[:, 0:ND]                                                   # text propagation
    h_in = big[:, ND:2 * ND]                                               # child->parent agg
    h_out = big[:, 2 * ND:3 * ND]                                          # parent->child agg
    gates = jax.nn.sigmoid(big[:, 3 * ND:])                                # [B, 3N] in|out|loop
    gstack = jnp.concatenate([gates[:, 0:N], gates[:, N:2 * N], gates[:, 2 * N:]], axis=0)
    gexp = jnp.dot(gstack, eexp_ref[...], preferred_element_type=jnp.float32)  # [3B, ND]
    msg = h_in * gexp[0:B] + h_out * gexp[B:2 * B] + hflat * gexp[2 * B:]
    gcn = jnp.maximum(msg, 0.0)                                            # [B, ND]

    # ---- classifier ----
    o_ref[...] = (jnp.dot(gcn, cw_ref[...], preferred_element_type=jnp.float32)
                  + cb_ref[...])                                           # [B, N]


# ============================ model wrapper ============================

def hiagm_forward(params, tokens, token_len):
    del token_len
    # TODO(synk): pack_padded_sequence / per-example seq-length masking (RNN, conv windows,
    # max-pool) is not modeled; all sequences are treated as full length.  Dropouts are
    # eval-mode (identity).
    tok_fwd = jnp.transpose(tokens).reshape(-1)              # row (t, b) -> token[b, t]
    tok_bwd = jnp.transpose(tokens[:, ::-1]).reshape(-1)     # row (t, b) -> token[b, L-1-t]
    tok2 = jnp.stack([tok_fwd, tok_bwd + VOCAB], axis=1).astype(jnp.int32)   # [L*B, 2]

    vmem = pl.BlockSpec(memory_space=pltpu.MemorySpace.VMEM)
    return pl.pallas_call(
        _hiagm_fused_kernel,
        out_shape=jax.ShapeDtypeStruct((BATCH, NUM_LABELS), jnp.float32),
        in_specs=[vmem, vmem, vmem, vmem, vmem, vmem, vmem,
                  pl.BlockSpec(memory_space=pl.ANY),   # folded GCN weight: manual DMA overlap
                  vmem, vmem, vmem, vmem],
        scratch_shapes=[
            pltpu.VMEM((SEQ_LEN * BATCH, 6 * RNN_HIDDEN), jnp.float32),              # ih_all
            pltpu.VMEM(((SEQ_LEN + 2 * PAD_MAX) * BATCH, 2 * RNN_HIDDEN), jnp.float32),  # hpad
            pltpu.VMEM((FEAT, BIGW), jnp.float32),     # landing buffer for the folded weight
            pltpu.SemaphoreType.DMA,                   # its DMA completion semaphore
        ],
    )(tok2, params["gru_table"], params["gru_bih"], params["gru_whh"], params["gru_bhh"],
      params["conv_w"], params["conv_b"],
      params["gcn_big_w"], params["gcn_big_b"], params["gcn_expand"],
      params["cls_w"], params["cls_b"])


# ============================ deterministic init ============================

def init_params(key):
    keys = jax.random.split(key, 24)

    def nrm(k, shape, scale=0.1):
        return scale * jax.random.normal(k, shape, dtype=jnp.float32)

    H, E, N, D, C = RNN_HIDDEN, EMB_DIM, NUM_LABELS, NODE_DIM, NUM_KERNEL
    H2 = 2 * H
    p = {}

    emb = nrm(keys[0], (VOCAB, E)).at[0].set(0.0)            # padding_index = 0

    # raw per-direction, per-gate GRU weights, gate order (r, z, n)
    wih_f = nrm(keys[1], (3, E, H)); whh_f = nrm(keys[2], (3, H, H))
    bih_f = nrm(keys[3], (3, 1, H)); bhh_f = nrm(keys[4], (3, 1, H))
    wih_b = nrm(keys[5], (3, E, H)); whh_b = nrm(keys[6], (3, H, H))
    bih_b = nrm(keys[7], (3, 1, H)); bhh_b = nrm(keys[8], (3, 1, H))

    # packed gate-column layout [r_f, r_b, z_f, z_b, n_f, n_b]; embedding folded in:
    # rows 0:V of the table drive the fwd columns, rows V:2V the bwd columns.
    zcol = jnp.zeros((E, H), jnp.float32)
    wih_fc = jnp.concatenate([wih_f[0], zcol, wih_f[1], zcol, wih_f[2], zcol], axis=1)
    wih_bc = jnp.concatenate([zcol, wih_b[0], zcol, wih_b[1], zcol, wih_b[2]], axis=1)
    p["gru_table"] = jnp.concatenate([emb @ wih_fc, emb @ wih_bc], axis=0)   # [2V, 6H]
    p["gru_bih"] = jnp.concatenate(
        [bih_f[0], bih_b[0], bih_f[1], bih_b[1], bih_f[2], bih_b[2]], axis=1)  # [1, 6H]
    blk = jnp.zeros((H2, 6 * H), jnp.float32)     # block-diag so one matmul drives both dirs
    for g in range(3):
        blk = blk.at[:H, 2 * g * H:(2 * g + 1) * H].set(whh_f[g])
        blk = blk.at[H:, (2 * g + 1) * H:(2 * g + 2) * H].set(whh_b[g])
    p["gru_whh"] = blk                                                       # [2H, 6H]
    p["gru_bhh"] = jnp.concatenate(
        [bhh_f[0], bhh_b[0], bhh_f[1], bhh_b[1], bhh_f[2], bhh_b[2]], axis=1)  # [1, 6H]

    # fused conv: each kernel size zero-padded into the KMAX-tap window layout,
    # output channels concatenated in order (k=2 | k=3 | k=4).
    conv_keys = jax.random.split(keys[9], 2 * NUM_BRANCH)
    wconv = jnp.zeros((KMAX * H2, NUM_BRANCH * C), jnp.float32)
    bconv = []
    for i, k in enumerate(KERNEL_SIZES):
        wk = nrm(conv_keys[2 * i], (k, H2, C))
        bk = nrm(conv_keys[2 * i + 1], (1, C))
        off = PAD_MAX - k // 2                      # tap j of kernel k -> fused slot off + j
        for j in range(k):
            wconv = wconv.at[(off + j) * H2:(off + j + 1) * H2, i * C:(i + 1) * C].set(wk[j])
        bconv.append(bk)
    p["conv_w"] = wconv                                                      # [4*2H, 3*C]
    p["conv_b"] = jnp.concatenate(bconv, axis=1)                             # [1, 3*C]

    trans_w = nrm(keys[10], (FEAT, ND)); trans_b = nrm(keys[11], (1, ND))
    p["cls_w"] = nrm(keys[12], (ND, N)); p["cls_b"] = nrm(keys[13], (1, N))

    # fixed label hierarchy (tree), prior-normalized adjacency
    parents = [-1, 0, 0, 1, 1, 2, 2, 3]
    child_counts = [0] * N
    for c, pa in enumerate(parents):
        if pa >= 0:
            child_counts[pa] += 1
    down = jnp.zeros((N, N), jnp.float32)
    up = jnp.zeros((N, N), jnp.float32)
    for c, pa in enumerate(parents):
        if pa >= 0:
            down = down.at[pa, c].set(1.0 / child_counts[pa])
            up = up.at[c, pa].set(1.0)

    in_bias = nrm(keys[14], (N, D)); out_bias = nrm(keys[15], (N, D))
    in_gate_w = nrm(keys[16], (D, 1)); in_gate_b = nrm(keys[17], (N, 1))
    out_gate_w = nrm(keys[18], (D, 1)); out_gate_b = nrm(keys[19], (N, 1))
    loop_gate_w = nrm(keys[20], (D, 1))

    eye_d = jnp.eye(D, dtype=jnp.float32)
    eye_n = jnp.eye(N, dtype=jnp.float32)
    a_in = jnp.kron(down.T, eye_d)                  # [ND, ND] child -> parent aggregation
    a_out = jnp.kron(up.T, eye_d)                   # [ND, ND] parent -> child aggregation
    g_in = jnp.kron(eye_n, in_gate_w)               # [ND, N] per-node in gate
    g_out = jnp.kron(eye_n, out_gate_w)             # [ND, N] per-node out gate
    g_loop = jnp.kron(eye_n, loop_gate_w)           # [ND, N] per-node self-loop gate

    # Fold transformation Linear + every GCN label-space linear map into ONE text-feature
    # driven matmul: (tf@W+b)@A + c  ==  tf@(W@A) + (b@A + c).  Mathematically identical,
    # and the dense 256x256 kron operators never leave the host.
    p["gcn_big_w"] = jnp.concatenate(
        [trans_w, trans_w @ a_in, trans_w @ a_out,
         trans_w @ g_in, trans_w @ g_out, trans_w @ g_loop], axis=1)         # [FEAT, 792]
    p["gcn_big_b"] = jnp.concatenate(
        [trans_b,
         trans_b @ a_in + in_bias.reshape(1, ND),
         trans_b @ a_out + out_bias.reshape(1, ND),
         trans_b @ g_in + in_gate_b.reshape(1, N),
         trans_b @ g_out + out_gate_b.reshape(1, N),
         trans_b @ g_loop], axis=1)                                          # [1, 792]
    p["gcn_expand"] = jnp.kron(eye_n, jnp.ones((1, D), jnp.float32))         # [N, ND]
    return p


if __name__ == "__main__":
    root = jax.random.PRNGKey(0)
    pkey, tkey = jax.random.split(root)
    params = init_params(pkey)
    tokens = jax.random.randint(tkey, (BATCH, SEQ_LEN), 1, VOCAB, dtype=jnp.int32)
    token_len = jnp.full((BATCH,), SEQ_LEN, dtype=jnp.int32)

    logits = jax.jit(hiagm_forward)(params, tokens, token_len)
    logits = jax.block_until_ready(logits)
    assert logits.shape == (BATCH, NUM_LABELS)
    assert bool(jnp.all(jnp.isfinite(logits)))
    print("KERNEL_OK")
</pallas_src>

<mosaic_0001>
module attributes {stable_mosaic.version = 11 : i64} {
  func.func @_hiagm_fused_kernel(%arg0: memref<32x2xi32, #tpu.memory_space<vmem>>, %arg1: memref<128x192xf32, #tpu.memory_space<vmem>>, %arg2: memref<1x192xf32, #tpu.memory_space<vmem>>, %arg3: memref<64x192xf32, #tpu.memory_space<vmem>>, %arg4: memref<1x192xf32, #tpu.memory_space<vmem>>, %arg5: memref<256x48xf32, #tpu.memory_space<vmem>>, %arg6: memref<1x48xf32, #tpu.memory_space<vmem>>, %arg7: memref<48x792xf32, #tpu.memory_space<any>>, %arg8: memref<1x792xf32, #tpu.memory_space<vmem>>, %arg9: memref<8x256xf32, #tpu.memory_space<vmem>>, %arg10: memref<256x8xf32, #tpu.memory_space<vmem>>, %arg11: memref<1x8xf32, #tpu.memory_space<vmem>>, %arg12: memref<2x8xf32, #tpu.memory_space<vmem>>, %arg13: memref<32x192xf32, #tpu.memory_space<vmem>>, %arg14: memref<40x64xf32, #tpu.memory_space<vmem>>, %arg15: memref<48x792xf32, #tpu.memory_space<vmem>>, %arg16: memref<!tpu.dma_semaphore, #tpu.memory_space<semaphore_mem>>) attributes {dimension_semantics = [], scalar_prefetch = 0 : i64, scratch_operands = 4 : i64, tpu.core_type = #tpu.core_type<tc>} {
    tpu.enqueue_dma source(%arg7 : memref<48x792xf32, #tpu.memory_space<any>>) target(%arg15 : memref<48x792xf32, #tpu.memory_space<vmem>>) target_semaphore(%arg16 : memref<!tpu.dma_semaphore, #tpu.memory_space<semaphore_mem>>)
    %c0 = arith.constant 0 : index
    %c0_0 = arith.constant 0 : index
    %0 = vector.load %arg0[%c0, %c0_0] : memref<32x2xi32, #tpu.memory_space<vmem>>, vector<32x2xi32>
    %1 = tpu.iota {dimensions = array<i32: 1>} : vector<32x128xi32>
    %2 = vector.extract_strided_slice %0 {offsets = [0, 0], sizes = [32, 1], strides = [1, 1]} : vector<32x2xi32> to vector<32x1xi32>
    %3 = vector.broadcast %2 : vector<32x1xi32> to vector<32x128xi32>
    %4 = arith.cmpi eq, %1, %3 : vector<32x128xi32>
    %5 = vector.extract_strided_slice %0 {offsets = [0, 1], sizes = [32, 1], strides = [1, 1]} : vector<32x2xi32> to vector<32x1xi32>
    %6 = vector.broadcast %5 : vector<32x1xi32> to vector<32x128xi32>
    %7 = arith.cmpi eq, %1, %6 : vector<32x128xi32>
    %8 = arith.ori %4, %7 : vector<32x128xi1>
    %9 = arith.extui %8 : vector<32x128xi1> to vector<32x128xi32>
    %10 = arith.sitofp %9 : vector<32x128xi32> to vector<32x128xf32>
    %c0_1 = arith.constant 0 : index
    %c0_2 = arith.constant 0 : index
    %11 = vector.load %arg1[%c0_1, %c0_2] : memref<128x192xf32, #tpu.memory_space<vmem>>, vector<128x192xf32>
    %cst = arith.constant dense<0.000000e+00> : vector<32x192xf32>
    %12 = tpu.matmul %10, %11, %cst {dimension_numbers = #tpu.dot_dimension_numbers<[1], [0], [0], [1], [0, 0, 1, 1], [], []>} : vector<32x128xf32>, vector<128x192xf32>, vector<32x192xf32> -> vector<32x192xf32>
    %c0_3 = arith.constant 0 : index
    %c0_4 = arith.constant 0 : index
    %13 = vector.load %arg2[%c0_3, %c0_4] : memref<1x192xf32, #tpu.memory_space<vmem>>, vector<1x192xf32>
    %14 = vector.broadcast %13 : vector<1x192xf32> to vector<32x192xf32>
    %15 = arith.addf %12, %14 : vector<32x192xf32>
    %c0_5 = arith.constant 0 : index
    %c0_6 = arith.constant 0 : index
    %16 = vector.load %arg13[%c0_5, %c0_6] : memref<32x192xf32, #tpu.memory_space<vmem>>, vector<32x192xf32>
    tpu.vector_store %arg13[%c0_5, %c0_6], %15 {strides = array<i32>} : memref<32x192xf32, #tpu.memory_space<vmem>>, vector<32x192xf32>,
    %c0_7 = arith.constant 0 : index
    %c0_8 = arith.constant 0 : index
    %17 = vector.load %arg3[%c0_7, %c0_8] : memref<64x192xf32, #tpu.memory_space<vmem>>, vector<64x192xf32>
    %c0_9 = arith.constant 0 : index
    %c0_10 = arith.constant 0 : index
    %18 = vector.load %arg4[%c0_9, %c0_10] : memref<1x192xf32, #tpu.memory_space<vmem>>, vector<1x192xf32>
    %cst_11 = arith.constant 0.000000e+00 : f32
    %19 = vector.broadcast %cst_11 : f32 to vector<40x64xf32>
    %c0_12 = arith.constant 0 : index
    %c0_13 = arith.constant 0 : index
    %20 = vector.load %arg14[%c0_12, %c0_13] : memref<40x64xf32, #tpu.memory_space<vmem>>, vector<40x64xf32>
    tpu.vector_store %arg14[%c0_12, %c0_13], %19 {strides = array<i32>} : memref<40x64xf32, #tpu.memory_space<vmem>>, vector<40x64xf32>,
    %cst_14 = arith.constant 0.000000e+00 : f32
    %21 = vector.broadcast %cst_14 : f32 to vector<2x64xf32>
    %c0_15 = arith.constant 0 : index
    %c0_16 = arith.constant 0 : index
    %22 = vector.load %arg13[%c0_15, %c0_16] : memref<32x192xf32, #tpu.memory_space<vmem>>, vector<2x192xf32>
    %cst_17 = arith.constant dense<0.000000e+00> : vector<2x192xf32>
    %23 = tpu.matmul %21, %17, %cst_17 {dimension_numbers = #tpu.dot_dimension_numbers<[1], [0], [0], [1], [0, 0, 1, 1], [], []>} : vector<2x64xf32>, vector<64x192xf32>, vector<2x192xf32> -> vector<2x192xf32>
    %24 = vector.broadcast %18 : vector<1x192xf32> to vector<2x192xf32>
    %25 = arith.addf %23, %24 : vector<2x192xf32>
    %26 = vector.extract_strided_slice %22 {offsets = [0, 0], sizes = [2, 128], strides = [1, 1]} : vector<2x192xf32> to vector<2x128xf32>
    %27 = vector.extract_strided_slice %25 {offsets = [0, 0], sizes = [2, 128], strides = [1, 1]} : vector<2x192xf32> to vector<2x128xf32>
    %28 = arith.addf %26, %27 : vector<2x128xf32>
    %29 = arith.negf %28 : vector<2x128xf32>
    %30 = math.exp %29 : vector<2x128xf32>
    %cst_18 = arith.constant 1.000000e+00 : f32
    %31 = vector.broadcast %cst_18 : f32 to vector<2x128xf32>
    %32 = arith.addf %31, %30 : vector<2x128xf32>
    %33 = arith.divf %31, %32 : vector<2x128xf32>
    %34 = vector.extract_strided_slice %33 {offsets = [0, 0], sizes = [2, 64], strides = [1, 1]} : vector<2x128xf32> to vector<2x64xf32>
    %35 = vector.extract_strided_slice %33 {offsets = [0, 64], sizes = [2, 64], strides = [1, 1]} : vector<2x128xf32> to vector<2x64xf32>
    %36 = vector.extract_strided_slice %22 {offsets = [0, 128], sizes = [2, 64], strides = [1, 1]} : vector<2x192xf32> to vector<2x64xf32>
    %37 = vector.extract_strided_slice %25 {offsets = [0, 128], sizes = [2, 64], strides = [1, 1]} : vector<2x192xf32> to vector<2x64xf32>
    %38 = arith.mulf %34, %37 : vector<2x64xf32>
    %39 = arith.addf %36, %38 : vector<2x64xf32>
    %40 = math.tanh %39 : vector<2x64xf32>
    %41 = arith.subf %21, %40 : vector<2x64xf32>
    %42 = arith.mulf %35, %41 : vector<2x64xf32>
    %43 = arith.addf %40, %42 : vector<2x64xf32>
    %44 = vector.extract_strided_slice %43 {offsets = [0, 0], sizes = [2, 32], strides = [1, 1]} : vector<2x64xf32> to vector<2x32xf32>
    %c4 = arith.constant 4 : index
    %c0_19 = arith.constant 0 : index
    %45 = vector.load %arg14[%c4, %c0_19] : memref<40x64xf32, #tpu.memory_space<vmem>>, vector<2x32xf32>
    tpu.vector_store %arg14[%c4, %c0_19], %44 {strides = array<i32>} : memref<40x64xf32, #tpu.memory_space<vmem>>, vector<2x32xf32>,
    %46 = vector.extract_strided_slice %43 {offsets = [0, 32], sizes = [2, 32], strides = [1, 1]} : vector<2x64xf32> to vector<2x32xf32>
    %c34 = arith.constant 34 : index
    %c32 = arith.constant 32 : index
    %47 = vector.load %arg14[%c34, %c32] : memref<40x64xf32, #tpu.memory_space<vmem>>, vector<2x32xf32>
    tpu.vector_store %arg14[%c34, %c32], %46 {strides = array<i32>} : memref<40x64xf32, #tpu.memory_space<vmem>>, vector<2x32xf32>,
    %c2 = arith.constant 2 : index
    %c0_20 = arith.constant 0 : index
    %48 = vector.load %arg13[%c2, %c0_20] : memref<32x192xf32, #tpu.memory_space<vmem>>, vector<2x192xf32>
    %cst_21 = arith.constant dense<0.000000e+00> : vector<2x192xf32>
    %49 = tpu.matmul %43, %17, %cst_21 {dimension_numbers = #tpu.dot_dimension_numbers<[1], [0], [0], [1], [0, 0, 1, 1], [], []>} : vector<2x64xf32>, vector<64x192xf32>, vector<2x192xf32> -> vector<2x192xf32>
    %50 = vector.broadcast %18 : vector<1x192xf32> to vector<2x192xf32>
    %51 = arith.addf %49, %50 : vector<2x192xf32>
    %52 = vector.extract_strided_slice %48 {offsets = [0, 0], sizes = [2, 128], strides = [1, 1]} : vector<2x192xf32> to vector<2x128xf32>
    %53 = vector.extract_strided_slice %51 {offsets = [0, 0], sizes = [2, 128], strides = [1, 1]} : vector<2x192xf32> to vector<2x128xf32>
    %54 = arith.addf %52, %53 : vector<2x128xf32>
    %55 = arith.negf %54 : vector<2x128xf32>
    %56 = math.exp %55 : vector<2x128xf32>
    %cst_22 = arith.constant 1.000000e+00 : f32
    %57 = vector.broadcast %cst_22 : f32 to vector<2x128xf32>
    %58 = arith.addf %57, %56 : vector<2x128xf32>
    %59 = arith.divf %57, %58 : vector<2x128xf32>
    %60 = vector.extract_strided_slice %59 {offsets = [0, 0], sizes = [2, 64], strides = [1, 1]} : vector<2x128xf32> to vector<2x64xf32>
    %61 = vector.extract_strided_slice %59 {offsets = [0, 64], sizes = [2, 64], strides = [1, 1]} : vector<2x128xf32> to vector<2x64xf32>
    %62 = vector.extract_strided_slice %48 {offsets = [0, 128], sizes = [2, 64], strides = [1, 1]} : vector<2x192xf32> to vector<2x64xf32>
    %63 = vector.extract_strided_slice %51 {offsets = [0, 128], sizes = [2, 64], strides = [1, 1]} : vector<2x192xf32> to vector<2x64xf32>
    %64 = arith.mulf %60, %63 : vector<2x64xf32>
    %65 = arith.addf %62, %64 : vector<2x64xf32>
    %66 = math.tanh %65 : vector<2x64xf32>
    %67 = arith.subf %43, %66 : vector<2x64xf32>
    %68 = arith.mulf %61, %67 : vector<2x64xf32>
    %69 = arith.addf %66, %68 : vector<2x64xf32>
    %70 = vector.extract_strided_slice %69 {offsets = [0, 0], sizes = [2, 32], strides = [1, 1]} : vector<2x64xf32> to vector<2x32xf32>
    %c6 = arith.constant 6 : index
    %c0_23 = arith.constant 0 : index
    %71 = vector.load %arg14[%c6, %c0_23] : memref<40x64xf32, #tpu.memory_space<vmem>>, vector<2x32xf32>
    tpu.vector_store %arg14[%c6, %c0_23], %70 {strides = array<i32>} : memref<40x64xf32, #tpu.memory_space<vmem>>, vector<2x32xf32>,
    %72 = vector.extract_strided_slice %69 {offsets = [0, 32], sizes = [2, 32], strides = [1, 1]} : vector<2x64xf32> to vector<2x32xf32>
    %c32_24 = arith.constant 32 : index
    %c32_25 = arith.constant 32 : index
    %73 = vector.load %arg14[%c32_24, %c32_25] : memref<40x64xf32, #tpu.memory_space<vmem>>, vector<2x32xf32>
    tpu.vector_store %arg14[%c32_24, %c32_25], %72 {strides = array<i32>} : memref<40x64xf32, #tpu.memory_space<vmem>>, vector<2x32xf32>,
    %c4_26 = arith.constant 4 : index
    %c0_27 = arith.constant 0 : index
    %74 = vector.load %arg13[%c4_26, %c0_27] : memref<32x192xf32, #tpu.memory_space<vmem>>, vector<2x192xf32>
    %cst_28 = arith.constant dense<0.000000e+00> : vector<2x192xf32>
    %75 = tpu.matmul %69, %17, %cst_28 {dimension_numbers = #tpu.dot_dimension_numbers<[1], [0], [0], [1], [0, 0, 1, 1], [], []>} : vector<2x64xf32>, vector<64x192xf32>, vector<2x192xf32> -> vector<2x192xf32>
    %76 = vector.broadcast %18 : vector<1x192xf32> to vector<2x192xf32>
    %77 = arith.addf %75, %76 : vector<2x192xf32>
    %78 = vector.extract_strided_slice %74 {offsets = [0, 0], sizes = [2, 128], strides = [1, 1]} : vector<2x192xf32> to vector<2x128xf32>
    %79 = vector.extract_strided_slice %77 {offsets = [0, 0], sizes = [2, 128], strides = [1, 1]} : vector<2x192xf32> to vector<2x128xf32>
    %80 = arith.addf %78, %79 : vector<2x128xf32>
    %81 = arith.negf %80 : vector<2x128xf32>
    %82 = math.exp %81 : vector<2x128xf32>
    %cst_29 = arith.constant 1.000000e+00 : f32
    %83 = vector.broadcast %cst_29 : f32 to vector<2x128xf32>
    %84 = arith.addf %83, %82 : vector<2x128xf32>
    %85 = arith.divf %83, %84 : vector<2x128xf32>
    %86 = vector.extract_strided_slice %85 {offsets = [0, 0], sizes = [2, 64], strides = [1, 1]} : vector<2x128xf32> to vector<2x64xf32>
    %87 = vector.extract_strided_slice %85 {offsets = [0, 64], sizes = [2, 64], strides = [1, 1]} : vector<2x128xf32> to vector<2x64xf32>
    %88 = vector.extract_strided_slice %74 {offsets = [0, 128], sizes = [2, 64], strides = [1, 1]} : vector<2x192xf32> to vector<2x64xf32>
    %89 = vector.extract_strided_slice %77 {offsets = [0, 128], sizes = [2, 64], strides = [1, 1]} : vector<2x192xf32> to vector<2x64xf32>
    %90 = arith.mulf %86, %89 : vector<2x64xf32>
    %91 = arith.addf %88, %90 : vector<2x64xf32>
    %92 = math.tanh %91 : vector<2x64xf32>
    %93 = arith.subf %69, %92 : vector<2x64xf32>
    %94 = arith.mulf %87, %93 : vector<2x64xf32>
    %95 = arith.addf %92, %94 : vector<2x64xf32>
    %96 = vector.extract_strided_slice %95 {offsets = [0, 0], sizes = [2, 32], strides = [1, 1]} : vector<2x64xf32> to vector<2x32xf32>
    %c8 = arith.constant 8 : index
    %c0_30 = arith.constant 0 : index
    %97 = vector.load %arg14[%c8, %c0_30] : memref<40x64xf32, #tpu.memory_space<vmem>>, vector<2x32xf32>
    tpu.vector_store %arg14[%c8, %c0_30], %96 {strides = array<i32>} : memref<40x64xf32, #tpu.memory_space<vmem>>, vector<2x32xf32>,
    %98 = vector.extract_strided_slice %95 {offsets = [0, 32], sizes = [2, 32], strides = [1, 1]} : vector<2x64xf32> to vector<2x32xf32>
    %c30 = arith.constant 30 : index
    %c32_31 = arith.constant 32 : index
    %99 = vector.load %arg14[%c30, %c32_31] : memref<40x64xf32, #tpu.memory_space<vmem>>, vector<2x32xf32>
    tpu.vector_store %arg14[%c30, %c32_31], %98 {strides = array<i32>} : memref<40x64xf32, #tpu.memory_space<vmem>>, vector<2x32xf32>,
    %c6_32 = arith.constant 6 : index
    %c0_33 = arith.constant 0 : index
    %100 = vector.load %arg13[%c6_32, %c0_33] : memref<32x192xf32, #tpu.memory_space<vmem>>, vector<2x192xf32>
    %cst_34 = arith.constant dense<0.000000e+00> : vector<2x192xf32>
    %101 = tpu.matmul %95, %17, %cst_34 {dimension_numbers = #tpu.dot_dimension_numbers<[1], [0], [0], [1], [0, 0, 1, 1], [], []>} : vector<2x64xf32>, vector<64x192xf32>, vector<2x192xf32> -> vector<2x192xf32>
    %102 = vector.broadcast %18 : vector<1x192xf32> to vector<2x192xf32>
    %103 = arith.addf %101, %102 : vector<2x192xf32>
    %104 = vector.extract_strided_slice %100 {offsets = [0, 0], sizes = [2, 128], strides = [1, 1]} : vector<2x192xf32> to vector<2x128xf32>
    %105 = vector.extract_strided_slice %103 {offsets = [0, 0], sizes = [2, 128], strides = [1, 1]} : vector<2x192xf32> to vector<2x128xf32>
    %106 = arith.addf %104, %105 : vector<2x128xf32>
    %107 = arith.negf %106 : vector<2x128xf32>
    %108 = math.exp %107 : vector<2x128xf32>
    %cst_35 = arith.constant 1.000000e+00 : f32
    %109 = vector.broadcast %cst_35 : f32 to vector<2x128xf32>
    %110 = arith.addf %109, %108 : vector<2x128xf32>
    %111 = arith.divf %109, %110 : vector<2x128xf32>
    %112 = vector.extract_strided_slice %111 {offsets = [0, 0], sizes = [2, 64], strides = [1, 1]} : vector<2x128xf32> to vector<2x64xf32>
    %113 = vector.extract_strided_slice %111 {offsets = [0, 64], sizes = [2, 64], strides = [1, 1]} : vector<2x128xf32> to vector<2x64xf32>
    %114 = vector.extract_strided_slice %100 {offsets = [0, 128], sizes = [2, 64], strides = [1, 1]} : vector<2x192xf32> to vector<2x64xf32>
    %115 = vector.extract_strided_slice %103 {offsets = [0, 128], sizes = [2, 64], strides = [1, 1]} : vector<2x192xf32> to vector<2x64xf32>
    %116 = arith.mulf %112, %115 : vector<2x64xf32>
    %117 = arith.addf %114, %116 : vector<2x64xf32>
    %118 = math.tanh %117 : vector<2x64xf32>
    %119 = arith.subf %95, %118 : vector<2x64xf32>
    %120 = arith.mulf %113, %119 : vector<2x64xf32>
    %121 = arith.addf %118, %120 : vector<2x64xf32>
    %122 = vector.extract_strided_slice %121 {offsets = [0, 0], sizes = [2, 32], strides = [1, 1]} : vector<2x64xf32> to vector<2x32xf32>
    %c10 = arith.constant 10 : index
    %c0_36 = arith.constant 0 : index
    %123 = vector.load %arg14[%c10, %c0_36] : memref<40x64xf32, #tpu.memory_space<vmem>>, vector<2x32xf32>
    tpu.vector_store %arg14[%c10, %c0_36], %122 {strides = array<i32>} : memref<40x64xf32, #tpu.memory_space<vmem>>, vector<2x32xf32>,
    %124 = vector.extract_strided_slice %121 {offsets = [0, 32], sizes = [2, 32], strides = [1, 1]} : vector<2x64xf32> to vector<2x32xf32>
    %c28 = arith.constant 28 : index
    %c32_37 = arith.constant 32 : index
    %125 = vector.load %arg14[%c28, %c32_37] : memref<40x64xf32, #tpu.memory_space<vmem>>, vector<2x32xf32>
    tpu.vector_store %arg14[%c28, %c32_37], %124 {strides = array<i32>} : memref<40x64xf32, #tpu.memory_space<vmem>>, vector<2x32xf32>,
    %c8_38 = arith.constant 8 : index
    %c0_39 = arith.constant 0 : index
    %126 = vector.load %arg13[%c8_38, %c0_39] : memref<32x192xf32, #tpu.memory_space<vmem>>, vector<2x192xf32>
    %cst_40 = arith.constant dense<0.000000e+00> : vector<2x192xf32>
    %127 = tpu.matmul %121, %17, %cst_40 {dimension_numbers = #tpu.dot_dimension_numbers<[1], [0], [0], [1], [0, 0, 1, 1], [], []>} : vector<2x64xf32>, vector<64x192xf32>, vector<2x192xf32> -> vector<2x192xf32>
    %128 = vector.broadcast %18 : vector<1x192xf32> to vector<2x192xf32>
    %129 = arith.addf %127, %128 : vector<2x192xf32>
    %130 = vector.extract_strided_slice %126 {offsets = [0, 0], sizes = [2, 128], strides = [1, 1]} : vector<2x192xf32> to vector<2x128xf32>
    %131 = vector.extract_strided_slice %129 {offsets = [0, 0], sizes = [2, 128], strides = [1, 1]} : vector<2x192xf32> to vector<2x128xf32>
    %132 = arith.addf %130, %131 : vector<2x128xf32>
    %133 = arith.negf %132 : vector<2x128xf32>
    %134 = math.exp %133 : vector<2x128xf32>
    %cst_41 = arith.constant 1.000000e+00 : f32
    %135 = vector.broadcast %cst_41 : f32 to vector<2x128xf32>
    %136 = arith.addf %135, %134 : vector<2x128xf32>
    %137 = arith.divf %135, %136 : vector<2x128xf32>
    %138 = vector.extract_strided_slice %137 {offsets = [0, 0], sizes = [2, 64], strides = [1, 1]} : vector<2x128xf32> to vector<2x64xf32>
    %139 = vector.extract_strided_slice %137 {offsets = [0, 64], sizes = [2, 64], strides = [1, 1]} : vector<2x128xf32> to vector<2x64xf32>
    %140 = vector.extract_strided_slice %126 {offsets = [0, 128], sizes = [2, 64], strides = [1, 1]} : vector<2x192xf32> to vector<2x64xf32>
    %141 = vector.extract_strided_slice %129 {offsets = [0, 128], sizes = [2, 64], strides = [1, 1]} : vector<2x192xf32> to vector<2x64xf32>
    %142 = arith.mulf %138, %141 : vector<2x64xf32>
    %143 = arith.addf %140, %142 : vector<2x64xf32>
    %144 = math.tanh %143 : vector<2x64xf32>
    %145 = arith.subf %121, %144 : vector<2x64xf32>
    %146 = arith.mulf %139, %145 : vector<2x64xf32>
    %147 = arith.addf %144, %146 : vector<2x64xf32>
    %148 = vector.extract_strided_slice %147 {offsets = [0, 0], sizes = [2, 32], strides = [1, 1]} : vector<2x64xf32> to vector<2x32xf32>
    %c12 = arith.constant 12 : index
    %c0_42 = arith.constant 0 : index
    %149 = vector.load %arg14[%c12, %c0_42] : memref<40x64xf32, #tpu.memory_space<vmem>>, vector<2x32xf32>
    tpu.vector_store %arg14[%c12, %c0_42], %148 {strides = array<i32>} : memref<40x64xf32, #tpu.memory_space<vmem>>, vector<2x32xf32>,
    %150 = vector.extract_strided_slice %147 {offsets = [0, 32], sizes = [2, 32], strides = [1, 1]} : vector<2x64xf32> to vector<2x32xf32>
    %c26 = arith.constant 26 : index
    %c32_43 = arith.constant 32 : index
    %151 = vector.load %arg14[%c26, %c32_43] : memref<40x64xf32, #tpu.memory_space<vmem>>, vector<2x32xf32>
    tpu.vector_store %arg14[%c26, %c32_43], %150 {strides = array<i32>} : memref<40x64xf32, #tpu.memory_space<vmem>>, vector<2x32xf32>,
    %c10_44 = arith.constant 10 : index
    %c0_45 = arith.constant 0 : index
    %152 = vector.load %arg13[%c10_44, %c0_45] : memref<32x192xf32, #tpu.memory_space<vmem>>, vector<2x192xf32>
    %cst_46 = arith.constant dense<0.000000e+00> : vector<2x192xf32>
    %153 = tpu.matmul %147, %17, %cst_46 {dimension_numbers = #tpu.dot_dimension_numbers<[1], [0], [0], [1], [0, 0, 1, 1], [], []>} : vector<2x64xf32>, vector<64x192xf32>, vector<2x192xf32> -> vector<2x192xf32>
    %154 = vector.broadcast %18 : vector<1x192xf32> to vector<2x192xf32>
    %155 = arith.addf %153, %154 : vector<2x192xf32>
    %156 = vector.extract_strided_slice %152 {offsets = [0, 0], sizes = [2, 128], strides = [1, 1]} : vector<2x192xf32> to vector<2x128xf32>
    %157 = vector.extract_strided_slice %155 {offsets = [0, 0], sizes = [2, 128], strides = [1, 1]} : vector<2x192xf32> to vector<2x128xf32>
    %158 = arith.addf %156, %157 : vector<2x128xf32>
    %159 = arith.negf %158 : vector<2x128xf32>
    %160 = math.exp %159 : vector<2x128xf32>
    %cst_47 = arith.constant 1.000000e+00 : f32
    %161 = vector.broadcast %cst_47 : f32 to vector<2x128xf32>
    %162 = arith.addf %161, %160 : vector<2x128xf32>
    %163 = arith.divf %161, %162 : vector<2x128xf32>
    %164 = vector.extract_strided_slice %163 {offsets = [0, 0], sizes = [2, 64], strides = [1, 1]} : vector<2x128xf32> to vector<2x64xf32>
    %165 = vector.extract_strided_slice %163 {offsets = [0, 64], sizes = [2, 64], strides = [1, 1]} : vector<2x128xf32> to vector<2x64xf32>
    %166 = vector.extract_strided_slice %152 {offsets = [0, 128], sizes = [2, 64], strides = [1, 1]} : vector<2x192xf32> to vector<2x64xf32>
    %167 = vector.extract_strided_slice %155 {offsets = [0, 128], sizes = [2, 64], strides = [1, 1]} : vector<2x192xf32> to vector<2x64xf32>
    %168 = arith.mulf %164, %167 : vector<2x64xf32>
    %169 = arith.addf %166, %168 : vector<2x64xf32>
    %170 = math.tanh %169 : vector<2x64xf32>
    %171 = arith.subf %147, %170 : vector<2x64xf32>
    %172 = arith.mulf %165, %171 : vector<2x64xf32>
    %173 = arith.addf %170, %172 : vector<2x64xf32>
    %174 = vector.extract_strided_slice %173 {offsets = [0, 0], sizes = [2, 32], strides = [1, 1]} : vector<2x64xf32> to vector<2x32xf32>
    %c14 = arith.constant 14 : index
    %c0_48 = arith.constant 0 : index
    %175 = vector.load %arg14[%c14, %c0_48] : memref<40x64xf32, #tpu.memory_space<vmem>>, vector<2x32xf32>
    tpu.vector_store %arg14[%c14, %c0_48], %174 {strides = array<i32>} : memref<40x64xf32, #tpu.memory_space<vmem>>, vector<2x32xf32>,
    %176 = vector.extract_strided_slice %173 {offsets = [0, 32], sizes = [2, 32], strides = [1, 1]} : vector<2x64xf32> to vector<2x32xf32>
    %c24 = arith.constant 24 : index
    %c32_49 = arith.constant 32 : index
    %177 = vector.load %arg14[%c24, %c32_49] : memref<40x64xf32, #tpu.memory_space<vmem>>, vector<2x32xf32>
    tpu.vector_store %arg14[%c24, %c32_49], %176 {strides = array<i32>} : memref<40x64xf32, #tpu.memory_space<vmem>>, vector<2x32xf32>,
    %c12_50 = arith.constant 12 : index
    %c0_51 = arith.constant 0 : index
    %178 = vector.load %arg13[%c12_50, %c0_51] : memref<32x192xf32, #tpu.memory_space<vmem>>, vector<2x192xf32>
    %cst_52 = arith.constant dense<0.000000e+00> : vector<2x192xf32>
    %179 = tpu.matmul %173, %17, %cst_52 {dimension_numbers = #tpu.dot_dimension_numbers<[1], [0], [0], [1], [0, 0, 1, 1], [], []>} : vector<2x64xf32>, vector<64x192xf32>, vector<2x192xf32> -> vector<2x192xf32>
    %180 = vector.broadcast %18 : vector<1x192xf32> to vector<2x192xf32>
    %181 = arith.addf %179, %180 : vector<2x192xf32>
    %182 = vector.extract_strided_slice %178 {offsets = [0, 0], sizes = [2, 128], strides = [1, 1]} : vector<2x192xf32> to vector<2x128xf32>
    %183 = vector.extract_strided_slice %181 {offsets = [0, 0], sizes = [2, 128], strides = [1, 1]} : vector<2x192xf32> to vector<2x128xf32>
    %184 = arith.addf %182, %183 : vector<2x128xf32>
    %185 = arith.negf %184 : vector<2x128xf32>
    %186 = math.exp %185 : vector<2x128xf32>
    %cst_53 = arith.constant 1.000000e+00 : f32
    %187 = vector.broadcast %cst_53 : f32 to vector<2x128xf32>
    %188 = arith.addf %187, %186 : vector<2x128xf32>
    %189 = arith.divf %187, %188 : vector<2x128xf32>
    %190 = vector.extract_strided_slice %189 {offsets = [0, 0], sizes = [2, 64], strides = [1, 1]} : vector<2x128xf32> to vector<2x64xf32>
    %191 = vector.extract_strided_slice %189 {offsets = [0, 64], sizes = [2, 64], strides = [1, 1]} : vector<2x128xf32> to vector<2x64xf32>
    %192 = vector.extract_strided_slice %178 {offsets = [0, 128], sizes = [2, 64], strides = [1, 1]} : vector<2x192xf32> to vector<2x64xf32>
    %193 = vector.extract_strided_slice %181 {offsets = [0, 128], sizes = [2, 64], strides = [1, 1]} : vector<2x192xf32> to vector<2x64xf32>
    %194 = arith.mulf %190, %193 : vector<2x64xf32>
    %195 = arith.addf %192, %194 : vector<2x64xf32>
    %196 = math.tanh %195 : vector<2x64xf32>
    %197 = arith.subf %173, %196 : vector<2x64xf32>
    %198 = arith.mulf %191, %197 : vector<2x64xf32>
    %199 = arith.addf %196, %198 : vector<2x64xf32>
    %200 = vector.extract_strided_slice %199 {offsets = [0, 0], sizes = [2, 32], strides = [1, 1]} : vector<2x64xf32> to vector<2x32xf32>
    %c16 = arith.constant 16 : index
    %c0_54 = arith.constant 0 : index
    %201 = vector.load %arg14[%c16, %c0_54] : memref<40x64xf32, #tpu.memory_space<vmem>>, vector<2x32xf32>
    tpu.vector_store %arg14[%c16, %c0_54], %200 {strides = array<i32>} : memref<40x64xf32, #tpu.memory_space<vmem>>, vector<2x32xf32>,
    %202 = vector.extract_strided_slice %199 {offsets = [0, 32], sizes = [2, 32], strides = [1, 1]} : vector<2x64xf32> to vector<2x32xf32>
    %c22 = arith.constant 22 : index
    %c32_55 = arith.constant 32 : index
    %203 = vector.load %arg14[%c22, %c32_55] : memref<40x64xf32, #tpu.memory_space<vmem>>, vector<2x32xf32>
    tpu.vector_store %arg14[%c22, %c32_55], %202 {strides = array<i32>} : memref<40x64xf32, #tpu.memory_space<vmem>>, vector<2x32xf32>,
    %c14_56 = arith.constant 14 : index
    %c0_57 = arith.constant 0 : index
    %204 = vector.load %arg13[%c14_56, %c0_57] : memref<32x192xf32, #tpu.memory_space<vmem>>, vector<2x192xf32>
    %cst_58 = arith.constant dense<0.000000e+00> : vector<2x192xf32>
    %205 = tpu.matmul %199, %17, %cst_58 {dimension_numbers = #tpu.dot_dimension_numbers<[1], [0], [0], [1], [0, 0, 1, 1], [], []>} : vector<2x64xf32>, vector<64x192xf32>, vector<2x192xf32> -> vector<2x192xf32>
    %206 = vector.broadcast %18 : vector<1x192xf32> to vector<2x192xf32>
    %207 = arith.addf %205, %206 : vector<2x192xf32>
    %208 = vector.extract_strided_slice %204 {offsets = [0, 0], sizes = [2, 128], strides = [1, 1]} : vector<2x192xf32> to vector<2x128xf32>
    %209 = vector.extract_strided_slice %207 {offsets = [0, 0], sizes = [2, 128], strides = [1, 1]} : vector<2x192xf32> to vector<2x128xf32>
    %210 = arith.addf %208, %209 : vector<2x128xf32>
    %211 = arith.negf %210 : vector<2x128xf32>
    %212 = math.exp %211 : vector<2x128xf32>
    %cst_59 = arith.constant 1.000000e+00 : f32
    %213 = vector.broadcast %cst_59 : f32 to vector<2x128xf32>
    %214 = arith.addf %213, %212 : vector<2x128xf32>
    %215 = arith.divf %213, %214 : vector<2x128xf32>
    %216 = vector.extract_strided_slice %215 {offsets = [0, 0], sizes = [2, 64], strides = [1, 1]} : vector<2x128xf32> to vector<2x64xf32>
    %217 = vector.extract_strided_slice %215 {offsets = [0, 64], sizes = [2, 64], strides = [1, 1]} : vector<2x128xf32> to vector<2x64xf32>
    %218 = vector.extract_strided_slice %204 {offsets = [0, 128], sizes = [2, 64], strides = [1, 1]} : vector<2x192xf32> to vector<2x64xf32>
    %219 = vector.extract_strided_slice %207 {offsets = [0, 128], sizes = [2, 64], strides = [1, 1]} : vector<2x192xf32> to vector<2x64xf32>
    %220 = arith.mulf %216, %219 : vector<2x64xf32>
    %221 = arith.addf %218, %220 : vector<2x64xf32>
    %222 = math.tanh %221 : vector<2x64xf32>
    %223 = arith.subf %199, %222 : vector<2x64xf32>
    %224 = arith.mulf %217, %223 : vector<2x64xf32>
    %225 = arith.addf %222, %224 : vector<2x64xf32>
    %226 = vector.extract_strided_slice %225 {offsets = [0, 0], sizes = [2, 32], strides = [1, 1]} : vector<2x64xf32> to vector<2x32xf32>
    %c18 = arith.constant 18 : index
    %c0_60 = arith.constant 0 : index
    %227 = vector.load %arg14[%c18, %c0_60] : memref<40x64xf32, #tpu.memory_space<vmem>>, vector<2x32xf32>
    tpu.vector_store %arg14[%c18, %c0_60], %226 {strides = array<i32>} : memref<40x64xf32, #tpu.memory_space<vmem>>, vector<2x32xf32>,
    %228 = vector.extract_strided_slice %225 {offsets = [0, 32], sizes = [2, 32], strides = [1, 1]} : vector<2x64xf32> to vector<2x32xf32>
    %c20 = arith.constant 20 : index
    %c32_61 = arith.constant 32 : index
    %229 = vector.load %arg14[%c20, %c32_61] : memref<40x64xf32, #tpu.memory_space<vmem>>, vector<2x32xf32>
    tpu.vector_store %arg14[%c20, %c32_61], %228 {strides = array<i32>} : memref<40x64xf32, #tpu.memory_space<vmem>>, vector<2x32xf32>,
    %c16_62 = arith.constant 16 : index
    %c0_63 = arith.constant 0 : index
    %230 = vector.load %arg13[%c16_62, %c0_63] : memref<32x192xf32, #tpu.memory_space<vmem>>, vector<2x192xf32>
    %cst_64 = arith.constant dense<0.000000e+00> : vector<2x192xf32>
    %231 = tpu.matmul %225, %17, %cst_64 {dimension_numbers = #tpu.dot_dimension_numbers<[1], [0], [0], [1], [0, 0, 1, 1], [], []>} : vector<2x64xf32>, vector<64x192xf32>, vector<2x192xf32> -> vector<2x192xf32>
    %232 = vector.broadcast %18 : vector<1x192xf32> to vector<2x192xf32>
    %233 = arith.addf %231, %232 : vector<2x192xf32>
    %234 = vector.extract_strided_slice %230 {offsets = [0, 0], sizes = [2, 128], strides = [1, 1]} : vector<2x192xf32> to vector<2x128xf32>
    %235 = vector.extract_strided_slice %233 {offsets = [0, 0], sizes = [2, 128], strides = [1, 1]} : vector<2x192xf32> to vector<2x128xf32>
    %236 = arith.addf %234, %235 : vector<2x128xf32>
    %237 = arith.negf %236 : vector<2x128xf32>
    %238 = math.exp %237 : vector<2x128xf32>
    %cst_65 = arith.constant 1.000000e+00 : f32
    %239 = vector.broadcast %cst_65 : f32 to vector<2x128xf32>
    %240 = arith.addf %239, %238 : vector<2x128xf32>
    %241 = arith.divf %239, %240 : vector<2x128xf32>
    %242 = vector.extract_strided_slice %241 {offsets = [0, 0], sizes = [2, 64], strides = [1, 1]} : vector<2x128xf32> to vector<2x64xf32>
    %243 = vector.extract_strided_slice %241 {offsets = [0, 64], sizes = [2, 64], strides = [1, 1]} : vector<2x128xf32> to vector<2x64xf32>
    %244 = vector.extract_strided_slice %230 {offsets = [0, 128], sizes = [2, 64], strides = [1, 1]} : vector<2x192xf32> to vector<2x64xf32>
    %245 = vector.extract_strided_slice %233 {offsets = [0, 128], sizes = [2, 64], strides = [1, 1]} : vector<2x192xf32> to vector<2x64xf32>
    %246 = arith.mulf %242, %245 : vector<2x64xf32>
    %247 = arith.addf %244, %246 : vector<2x64xf32>
    %248 = math.tanh %247 : vector<2x64xf32>
    %249 = arith.subf %225, %248 : vector<2x64xf32>
    %250 = arith.mulf %243, %249 : vector<2x64xf32>
    %251 = arith.addf %248, %250 : vector<2x64xf32>
    %252 = vector.extract_strided_slice %251 {offsets = [0, 0], sizes = [2, 32], strides = [1, 1]} : vector<2x64xf32> to vector<2x32xf32>
    %c20_66 = arith.constant 20 : index
    %c0_67 = arith.constant 0 : index
    %253 = vector.load %arg14[%c20_66, %c0_67] : memref<40x64xf32, #tpu.memory_space<vmem>>, vector<2x32xf32>
    tpu.vector_store %arg14[%c20_66, %c0_67], %252 {strides = array<i32>} : memref<40x64xf32, #tpu.memory_space<vmem>>, vector<2x32xf32>,
    %254 = vector.extract_strided_slice %251 {offsets = [0, 32], sizes = [2, 32], strides = [1, 1]} : vector<2x64xf32> to vector<2x32xf32>
    %c18_68 = arith.constant 18 : index
    %c32_69 = arith.constant 32 : index
    %255 = vector.load %arg14[%c18_68, %c32_69] : memref<40x64xf32, #tpu.memory_space<vmem>>, vector<2x32xf32>
    tpu.vector_store %arg14[%c18_68, %c32_69], %254 {strides = array<i32>} : memref<40x64xf32, #tpu.memory_space<vmem>>, vector<2x32xf32>,
    %c18_70 = arith.constant 18 : index
    %c0_71 = arith.constant 0 : index
    %256 = vector.load %arg13[%c18_70, %c0_71] : memref<32x192xf32, #tpu.memory_space<vmem>>, vector<2x192xf32>
    %cst_72 = arith.constant dense<0.000000e+00> : vector<2x192xf32>
    %257 = tpu.matmul %251, %17, %cst_72 {dimension_numbers = #tpu.dot_dimension_numbers<[1], [0], [0], [1], [0, 0, 1, 1], [], []>} : vector<2x64xf32>, vector<64x192xf32>, vector<2x192xf32> -> vector<2x192xf32>
    %258 = vector.broadcast %18 : vector<1x192xf32> to vector<2x192xf32>
    %259 = arith.addf %257, %258 : vector<2x192xf32>
    %260 = vector.extract_strided_slice %256 {offsets = [0, 0], sizes = [2, 128], strides = [1, 1]} : vector<2x192xf32> to vector<2x128xf32>
    %261 = vector.extract_strided_slice %259 {offsets = [0, 0], sizes = [2, 128], strides = [1, 1]} : vector<2x192xf32> to vector<2x128xf32>
    %262 = arith.addf %260, %261 : vector<2x128xf32>
    %263 = arith.negf %262 : vector<2x128xf32>
    %264 = math.exp %263 : vector<2x128xf32>
    %cst_73 = arith.constant 1.000000e+00 : f32
    %265 = vector.broadcast %cst_73 : f32 to vector<2x128xf32>
    %266 = arith.addf %265, %264 : vector<2x128xf32>
    %267 = arith.divf %265, %266 : vector<2x128xf32>
    %268 = vector.extract_strided_slice %267 {offsets = [0, 0], sizes = [2, 64], strides = [1, 1]} : vector<2x128xf32> to vector<2x64xf32>
    %269 = vector.extract_strided_slice %267 {offsets = [0, 64], sizes = [2, 64], strides = [1, 1]} : vector<2x128xf32> to vector<2x64xf32>
    %270 = vector.extract_strided_slice %256 {offsets = [0, 128], sizes = [2, 64], strides = [1, 1]} : vector<2x192xf32> to vector<2x64xf32>
    %271 = vector.extract_strided_slice %259 {offsets = [0, 128], sizes = [2, 64], strides = [1, 1]} : vector<2x192xf32> to vector<2x64xf32>
    %272 = arith.mulf %268, %271 : vector<2x64xf32>
    %273 = arith.addf %270, %272 : vector<2x64xf32>
    %274 = math.tanh %273 : vector<2x64xf32>
    %275 = arith.subf %251, %274 : vector<2x64xf32>
    %276 = arith.mulf %269, %275 : vector<2x64xf32>
    %277 = arith.addf %274, %276 : vector<2x64xf32>
    %278 = vector.extract_strided_slice %277 {offsets = [0, 0], sizes = [2, 32], strides = [1, 1]} : vector<2x64xf32> to vector<2x32xf32>
    %c22_74 = arith.constant 22 : index
    %c0_75 = arith.constant 0 : index
    %279 = vector.load %arg14[%c22_74, %c0_75] : memref<40x64xf32, #tpu.memory_space<vmem>>, vector<2x32xf32>
    tpu.vector_store %arg14[%c22_74, %c0_75], %278 {strides = array<i32>} : memref<40x64xf32, #tpu.memory_space<vmem>>, vector<2x32xf32>,
    %280 = vector.extract_strided_slice %277 {offsets = [0, 32], sizes = [2, 32], strides = [1, 1]} : vector<2x64xf32> to vector<2x32xf32>
    %c16_76 = arith.constant 16 : index
    %c32_77 = arith.constant 32 : index
    %281 = vector.load %arg14[%c16_76, %c32_77] : memref<40x64xf32, #tpu.memory_space<vmem>>, vector<2x32xf32>
    tpu.vector_store %arg14[%c16_76, %c32_77], %280 {strides = array<i32>} : memref<40x64xf32, #tpu.memory_space<vmem>>, vector<2x32xf32>,
    %c20_78 = arith.constant 20 : index
    %c0_79 = arith.constant 0 : index
    %282 = vector.load %arg13[%c20_78, %c0_79] : memref<32x192xf32, #tpu.memory_space<vmem>>, vector<2x192xf32>
    %cst_80 = arith.constant dense<0.000000e+00> : vector<2x192xf32>
    %283 = tpu.matmul %277, %17, %cst_80 {dimension_numbers = #tpu.dot_dimension_numbers<[1], [0], [0], [1], [0, 0, 1, 1], [], []>} : vector<2x64xf32>, vector<64x192xf32>, vector<2x192xf32> -> vector<2x192xf32>
    %284 = vector.broadcast %18 : vector<1x192xf32> to vector<2x192xf32>
    %285 = arith.addf %283, %284 : vector<2x192xf32>
    %286 = vector.extract_strided_slice %282 {offsets = [0, 0], sizes = [2, 128], strides = [1, 1]} : vector<2x192xf32> to vector<2x128xf32>
    %287 = vector.extract_strided_slice %285 {offsets = [0, 0], sizes = [2, 128], strides = [1, 1]} : vector<2x192xf32> to vector<2x128xf32>
    %288 = arith.addf %286, %287 : vector<2x128xf32>
    %289 = arith.negf %288 : vector<2x128xf32>
    %290 = math.exp %289 : vector<2x128xf32>
    %cst_81 = arith.constant 1.000000e+00 : f32
    %291 = vector.broadcast %cst_81 : f32 to vector<2x128xf32>
    %292 = arith.addf %291, %290 : vector<2x128xf32>
    %293 = arith.divf %291, %292 : vector<2x128xf32>
    %294 = vector.extract_strided_slice %293 {offsets = [0, 0], sizes = [2, 64], strides = [1, 1]} : vector<2x128xf32> to vector<2x64xf32>
    %295 = vector.extract_strided_slice %293 {offsets = [0, 64], sizes = [2, 64], strides = [1, 1]} : vector<2x128xf32> to vector<2x64xf32>
    %296 = vector.extract_strided_slice %282 {offsets = [0, 128], sizes = [2, 64], strides = [1, 1]} : vector<2x192xf32> to vector<2x64xf32>
    %297 = vector.extract_strided_slice %285 {offsets = [0, 128], sizes = [2, 64], strides = [1, 1]} : vector<2x192xf32> to vector<2x64xf32>
    %298 = arith.mulf %294, %297 : vector<2x64xf32>
    %299 = arith.addf %296, %298 : vector<2x64xf32>
    %300 = math.tanh %299 : vector<2x64xf32>
    %301 = arith.subf %277, %300 : vector<2x64xf32>
    %302 = arith.mulf %295, %301 : vector<2x64xf32>
    %303 = arith.addf %300, %302 : vector<2x64xf32>
    %304 = vector.extract_strided_slice %303 {offsets = [0, 0], sizes = [2, 32], strides = [1, 1]} : vector<2x64xf32> to vector<2x32xf32>
    %c24_82 = arith.constant 24 : index
    %c0_83 = arith.constant 0 : index
    %305 = vector.load %arg14[%c24_82, %c0_83] : memref<40x64xf32, #tpu.memory_space<vmem>>, vector<2x32xf32>
    tpu.vector_store %arg14[%c24_82, %c0_83], %304 {strides = array<i32>} : memref<40x64xf32, #tpu.memory_space<vmem>>, vector<2x32xf32>,
    %306 = vector.extract_strided_slice %303 {offsets = [0, 32], sizes = [2, 32], strides = [1, 1]} : vector<2x64xf32> to vector<2x32xf32>
    %c14_84 = arith.constant 14 : index
    %c32_85 = arith.constant 32 : index
    %307 = vector.load %arg14[%c14_84, %c32_85] : memref<40x64xf32, #tpu.memory_space<vmem>>, vector<2x32xf32>
    tpu.vector_store %arg14[%c14_84, %c32_85], %306 {strides = array<i32>} : memref<40x64xf32, #tpu.memory_space<vmem>>, vector<2x32xf32>,
    %c22_86 = arith.constant 22 : index
    %c0_87 = arith.constant 0 : index
    %308 = vector.load %arg13[%c22_86, %c0_87] : memref<32x192xf32, #tpu.memory_space<vmem>>, vector<2x192xf32>
    %cst_88 = arith.constant dense<0.000000e+00> : vector<2x192xf32>
    %309 = tpu.matmul %303, %17, %cst_88 {dimension_numbers = #tpu.dot_dimension_numbers<[1], [0], [0], [1], [0, 0, 1, 1], [], []>} : vector<2x64xf32>, vector<64x192xf32>, vector<2x192xf32> -> vector<2x192xf32>
    %310 = vector.broadcast %18 : vector<1x192xf32> to vector<2x192xf32>
    %311 = arith.addf %309, %310 : vector<2x192xf32>
    %312 = vector.extract_strided_slice %308 {offsets = [0, 0], sizes = [2, 128], strides = [1, 1]} : vector<2x192xf32> to vector<2x128xf32>
    %313 = vector.extract_strided_slice %311 {offsets = [0, 0], sizes = [2, 128], strides = [1, 1]} : vector<2x192xf32> to vector<2x128xf32>
    %314 = arith.addf %312, %313 : vector<2x128xf32>
    %315 = arith.negf %314 : vector<2x128xf32>
    %316 = math.exp %315 : vector<2x128xf32>
    %cst_89 = arith.constant 1.000000e+00 : f32
    %317 = vector.broadcast %cst_89 : f32 to vector<2x128xf32>
    %318 = arith.addf %317, %316 : vector<2x128xf32>
    %319 = arith.divf %317, %318 : vector<2x128xf32>
    %320 = vector.extract_strided_slice %319 {offsets = [0, 0], sizes = [2, 64], strides = [1, 1]} : vector<2x128xf32> to vector<2x64xf32>
    %321 = vector.extract_strided_slice %319 {offsets = [0, 64], sizes = [2, 64], strides = [1, 1]} : vector<2x128xf32> to vector<2x64xf32>
    %322 = vector.extract_strided_slice %308 {offsets = [0, 128], sizes = [2, 64], strides = [1, 1]} : vector<2x192xf32> to vector<2x64xf32>
    %323 = vector.extract_strided_slice %311 {offsets = [0, 128], sizes = [2, 64], strides = [1, 1]} : vector<2x192xf32> to vector<2x64xf32>
    %324 = arith.mulf %320, %323 : vector<2x64xf32>
    %325 = arith.addf %322, %324 : vector<2x64xf32>
    %326 = math.tanh %325 : vector<2x64xf32>
    %327 = arith.subf %303, %326 : vector<2x64xf32>
    %328 = arith.mulf %321, %327 : vector<2x64xf32>
    %329 = arith.addf %326, %328 : vector<2x64xf32>
    %330 = vector.extract_strided_slice %329 {offsets = [0, 0], sizes = [2, 32], strides = [1, 1]} : vector<2x64xf32> to vector<2x32xf32>
    %c26_90 = arith.constant 26 : index
    %c0_91 = arith.constant 0 : index
    %331 = vector.load %arg14[%c26_90, %c0_91] : memref<40x64xf32, #tpu.memory_space<vmem>>, vector<2x32xf32>
    tpu.vector_store %arg14[%c26_90, %c0_91], %330 {strides = array<i32>} : memref<40x64xf32, #tpu.memory_space<vmem>>, vector<2x32xf32>,
    %332 = vector.extract_strided_slice %329 {offsets = [0, 32], sizes = [2, 32], strides = [1, 1]} : vector<2x64xf32> to vector<2x32xf32>
    %c12_92 = arith.constant 12 : index
    %c32_93 = arith.constant 32 : index
    %333 = vector.load %arg14[%c12_92, %c32_93] : memref<40x64xf32, #tpu.memory_space<vmem>>, vector<2x32xf32>
    tpu.vector_store %arg14[%c12_92, %c32_93], %332 {strides = array<i32>} : memref<40x64xf32, #tpu.memory_space<vmem>>, vector<2x32xf32>,
    %c24_94 = arith.constant 24 : index
    %c0_95 = arith.constant 0 : index
    %334 = vector.load %arg13[%c24_94, %c0_95] : memref<32x192xf32, #tpu.memory_space<vmem>>, vector<2x192xf32>
    %cst_96 = arith.constant dense<0.000000e+00> : vector<2x192xf32>
    %335 = tpu.matmul %329, %17, %cst_96 {dimension_numbers = #tpu.dot_dimension_numbers<[1], [0], [0], [1], [0, 0, 1, 1], [], []>} : vector<2x64xf32>, vector<64x192xf32>, vector<2x192xf32> -> vector<2x192xf32>
    %336 = vector.broadcast %18 : vector<1x192xf32> to vector<2x192xf32>
    %337 = arith.addf %335, %336 : vector<2x192xf32>
    %338 = vector.extract_strided_slice %334 {offsets = [0, 0], sizes = [2, 128], strides = [1, 1]} : vector<2x192xf32> to vector<2x128xf32>
    %339 = vector.extract_strided_slice %337 {offsets = [0, 0], sizes = [2, 128], strides = [1, 1]} : vector<2x192xf32> to vector<2x128xf32>
    %340 = arith.addf %338, %339 : vector<2x128xf32>
    %341 = arith.negf %340 : vector<2x128xf32>
    %342 = math.exp %341 : vector<2x128xf32>
    %cst_97 = arith.constant 1.000000e+00 : f32
    %343 = vector.broadcast %cst_97 : f32 to vector<2x128xf32>
    %344 = arith.addf %343, %342 : vector<2x128xf32>
    %345 = arith.divf %343, %344 : vector<2x128xf32>
    %346 = vector.extract_strided_slice %345 {offsets = [0, 0], sizes = [2, 64], strides = [1, 1]} : vector<2x128xf32> to vector<2x64xf32>
    %347 = vector.extract_strided_slice %345 {offsets = [0, 64], sizes = [2, 64], strides = [1, 1]} : vector<2x128xf32> to vector<2x64xf32>
    %348 = vector.extract_strided_slice %334 {offsets = [0, 128], sizes = [2, 64], strides = [1, 1]} : vector<2x192xf32> to vector<2x64xf32>
    %349 = vector.extract_strided_slice %337 {offsets = [0, 128], sizes = [2, 64], strides = [1, 1]} : vector<2x192xf32> to vector<2x64xf32>
    %350 = arith.mulf %346, %349 : vector<2x64xf32>
    %351 = arith.addf %348, %350 : vector<2x64xf32>
    %352 = math.tanh %351 : vector<2x64xf32>
    %353 = arith.subf %329, %352 : vector<2x64xf32>
    %354 = arith.mulf %347, %353 : vector<2x64xf32>
    %355 = arith.addf %352, %354 : vector<2x64xf32>
    %356 = vector.extract_strided_slice %355 {offsets = [0, 0], sizes = [2, 32], strides = [1, 1]} : vector<2x64xf32> to vector<2x32xf32>
    %c28_98 = arith.constant 28 : index
    %c0_99 = arith.constant 0 : index
    %357 = vector.load %arg14[%c28_98, %c0_99] : memref<40x64xf32, #tpu.memory_space<vmem>>, vector<2x32xf32>
    tpu.vector_store %arg14[%c28_98, %c0_99], %356 {strides = array<i32>} : memref<40x64xf32, #tpu.memory_space<vmem>>, vector<2x32xf32>,
    %358 = vector.extract_strided_slice %355 {offsets = [0, 32], sizes = [2, 32], strides = [1, 1]} : vector<2x64xf32> to vector<2x32xf32>
    %c10_100 = arith.constant 10 : index
    %c32_101 = arith.constant 32 : index
    %359 = vector.load %arg14[%c10_100, %c32_101] : memref<40x64xf32, #tpu.memory_space<vmem>>, vector<2x32xf32>
    tpu.vector_store %arg14[%c10_100, %c32_101], %358 {strides = array<i32>} : memref<40x64xf32, #tpu.memory_space<vmem>>, vector<2x32xf32>,
    %c26_102 = arith.constant 26 : index
    %c0_103 = arith.constant 0 : index
    %360 = vector.load %arg13[%c26_102, %c0_103] : memref<32x192xf32, #tpu.memory_space<vmem>>, vector<2x192xf32>
    %cst_104 = arith.constant dense<0.000000e+00> : vector<2x192xf32>
    %361 = tpu.matmul %355, %17, %cst_104 {dimension_numbers = #tpu.dot_dimension_numbers<[1], [0], [0], [1], [0, 0, 1, 1], [], []>} : vector<2x64xf32>, vector<64x192xf32>, vector<2x192xf32> -> vector<2x192xf32>
    %362 = vector.broadcast %18 : vector<1x192xf32> to vector<2x192xf32>
    %363 = arith.addf %361, %362 : vector<2x192xf32>
    %364 = vector.extract_strided_slice %360 {offsets = [0, 0], sizes = [2, 128], strides = [1, 1]} : vector<2x192xf32> to vector<2x128xf32>
    %365 = vector.extract_strided_slice %363 {offsets = [0, 0], sizes = [2, 128], strides = [1, 1]} : vector<2x192xf32> to vector<2x128xf32>
    %366 = arith.addf %364, %365 : vector<2x128xf32>
    %367 = arith.negf %366 : vector<2x128xf32>
    %368 = math.exp %367 : vector<2x128xf32>
    %cst_105 = arith.constant 1.000000e+00 : f32
    %369 = vector.broadcast %cst_105 : f32 to vector<2x128xf32>
    %370 = arith.addf %369, %368 : vector<2x128xf32>
    %371 = arith.divf %369, %370 : vector<2x128xf32>
    %372 = vector.extract_strided_slice %371 {offsets = [0, 0], sizes = [2, 64], strides = [1, 1]} : vector<2x128xf32> to vector<2x64xf32>
    %373 = vector.extract_strided_slice %371 {offsets = [0, 64], sizes = [2, 64], strides = [1, 1]} : vector<2x128xf32> to vector<2x64xf32>
    %374 = vector.extract_strided_slice %360 {offsets = [0, 128], sizes = [2, 64], strides = [1, 1]} : vector<2x192xf32> to vector<2x64xf32>
    %375 = vector.extract_strided_slice %363 {offsets = [0, 128], sizes = [2, 64], strides = [1, 1]} : vector<2x192xf32> to vector<2x64xf32>
    %376 = arith.mulf %372, %375 : vector<2x64xf32>
    %377 = arith.addf %374, %376 : vector<2x64xf32>
    %378 = math.tanh %377 : vector<2x64xf32>
    %379 = arith.subf %355, %378 : vector<2x64xf32>
    %380 = arith.mulf %373, %379 : vector<2x64xf32>
    %381 = arith.addf %378, %380 : vector<2x64xf32>
    %382 = vector.extract_strided_slice %381 {offsets = [0, 0], sizes = [2, 32], strides = [1, 1]} : vector<2x64xf32> to vector<2x32xf32>
    %c30_106 = arith.constant 30 : index
    %c0_107 = arith.constant 0 : index
    %383 = vector.load %arg14[%c30_106, %c0_107] : memref<40x64xf32, #tpu.memory_space<vmem>>, vector<2x32xf32>
    tpu.vector_store %arg14[%c30_106, %c0_107], %382 {strides = array<i32>} : memref<40x64xf32, #tpu.memory_space<vmem>>, vector<2x32xf32>,
    %384 = vector.extract_strided_slice %381 {offsets = [0, 32], sizes = [2, 32], strides = [1, 1]} : vector<2x64xf32> to vector<2x32xf32>
    %c8_108 = arith.constant 8 : index
    %c32_109 = arith.constant 32 : index
    %385 = vector.load %arg14[%c8_108, %c32_109] : memref<40x64xf32, #tpu.memory_space<vmem>>, vector<2x32xf32>
    tpu.vector_store %arg14[%c8_108, %c32_109], %384 {strides = array<i32>} : memref<40x64xf32, #tpu.memory_space<vmem>>, vector<2x32xf32>,
    %c28_110 = arith.constant 28 : index
    %c0_111 = arith.constant 0 : index
    %386 = vector.load %arg13[%c28_110, %c0_111] : memref<32x192xf32, #tpu.memory_space<vmem>>, vector<2x192xf32>
    %cst_112 = arith.constant dense<0.000000e+00> : vector<2x192xf32>
    %387 = tpu.matmul %381, %17, %cst_112 {dimension_numbers = #tpu.dot_dimension_numbers<[1], [0], [0], [1], [0, 0, 1, 1], [], []>} : vector<2x64xf32>, vector<64x192xf32>, vector<2x192xf32> -> vector<2x192xf32>
    %388 = vector.broadcast %18 : vector<1x192xf32> to vector<2x192xf32>
    %389 = arith.addf %387, %388 : vector<2x192xf32>
    %390 = vector.extract_strided_slice %386 {offsets = [0, 0], sizes = [2, 128], strides = [1, 1]} : vector<2x192xf32> to vector<2x128xf32>
    %391 = vector.extract_strided_slice %389 {offsets = [0, 0], sizes = [2, 128], strides = [1, 1]} : vector<2x192xf32> to vector<2x128xf32>
    %392 = arith.addf %390, %391 : vector<2x128xf32>
    %393 = arith.negf %392 : vector<2x128xf32>
    %394 = math.exp %393 : vector<2x128xf32>
    %cst_113 = arith.constant 1.000000e+00 : f32
    %395 = vector.broadcast %cst_113 : f32 to vector<2x128xf32>
    %396 = arith.addf %395, %394 : vector<2x128xf32>
    %397 = arith.divf %395, %396 : vector<2x128xf32>
    %398 = vector.extract_strided_slice %397 {offsets = [0, 0], sizes = [2, 64], strides = [1, 1]} : vector<2x128xf32> to vector<2x64xf32>
    %399 = vector.extract_strided_slice %397 {offsets = [0, 64], sizes = [2, 64], strides = [1, 1]} : vector<2x128xf32> to vector<2x64xf32>
    %400 = vector.extract_strided_slice %386 {offsets = [0, 128], sizes = [2, 64], strides = [1, 1]} : vector<2x192xf32> to vector<2x64xf32>
    %401 = vector.extract_strided_slice %389 {offsets = [0, 128], sizes = [2, 64], strides = [1, 1]} : vector<2x192xf32> to vector<2x64xf32>
    %402 = arith.mulf %398, %401 : vector<2x64xf32>
    %403 = arith.addf %400, %402 : vector<2x64xf32>
    %404 = math.tanh %403 : vector<2x64xf32>
    %405 = arith.subf %381, %404 : vector<2x64xf32>
    %406 = arith.mulf %399, %405 : vector<2x64xf32>
    %407 = arith.addf %404, %406 : vector<2x64xf32>
    %408 = vector.extract_strided_slice %407 {offsets = [0, 0], sizes = [2, 32], strides = [1, 1]} : vector<2x64xf32> to vector<2x32xf32>
    %c32_114 = arith.constant 32 : index
    %c0_115 = arith.constant 0 : index
    %409 = vector.load %arg14[%c32_114, %c0_115] : memref<40x64xf32, #tpu.memory_space<vmem>>, vector<2x32xf32>
    tpu.vector_store %arg14[%c32_114, %c0_115], %408 {strides = array<i32>} : memref<40x64xf32, #tpu.memory_space<vmem>>, vector<2x32xf32>,
    %410 = vector.extract_strided_slice %407 {offsets = [0, 32], sizes = [2, 32], strides = [1, 1]} : vector<2x64xf32> to vector<2x32xf32>
    %c6_116 = arith.constant 6 : index
    %c32_117 = arith.constant 32 : index
    %411 = vector.load %arg14[%c6_116, %c32_117] : memref<40x64xf32, #tpu.memory_space<vmem>>, vector<2x32xf32>
    tpu.vector_store %arg14[%c6_116, %c32_117], %410 {strides = array<i32>} : memref<40x64xf32, #tpu.memory_space<vmem>>, vector<2x32xf32>,
    %c30_118 = arith.constant 30 : index
    %c0_119 = arith.constant 0 : index
    %412 = vector.load %arg13[%c30_118, %c0_119] : memref<32x192xf32, #tpu.memory_space<vmem>>, vector<2x192xf32>
    %cst_120 = arith.constant dense<0.000000e+00> : vector<2x192xf32>
    %413 = tpu.matmul %407, %17, %cst_120 {dimension_numbers = #tpu.dot_dimension_numbers<[1], [0], [0], [1], [0, 0, 1, 1], [], []>} : vector<2x64xf32>, vector<64x192xf32>, vector<2x192xf32> -> vector<2x192xf32>
    %414 = vector.broadcast %18 : vector<1x192xf32> to vector<2x192xf32>
    %415 = arith.addf %413, %414 : vector<2x192xf32>
    %416 = vector.extract_strided_slice %412 {offsets = [0, 0], sizes = [2, 128], strides = [1, 1]} : vector<2x192xf32> to vector<2x128xf32>
    %417 = vector.extract_strided_slice %415 {offsets = [0, 0], sizes = [2, 128], strides = [1, 1]} : vector<2x192xf32> to vector<2x128xf32>
    %418 = arith.addf %416, %417 : vector<2x128xf32>
    %419 = arith.negf %418 : vector<2x128xf32>
    %420 = math.exp %419 : vector<2x128xf32>
    %cst_121 = arith.constant 1.000000e+00 : f32
    %421 = vector.broadcast %cst_121 : f32 to vector<2x128xf32>
    %422 = arith.addf %421, %420 : vector<2x128xf32>
    %423 = arith.divf %421, %422 : vector<2x128xf32>
    %424 = vector.extract_strided_slice %423 {offsets = [0, 0], sizes = [2, 64], strides = [1, 1]} : vector<2x128xf32> to vector<2x64xf32>
    %425 = vector.extract_strided_slice %423 {offsets = [0, 64], sizes = [2, 64], strides = [1, 1]} : vector<2x128xf32> to vector<2x64xf32>
    %426 = vector.extract_strided_slice %412 {offsets = [0, 128], sizes = [2, 64], strides = [1, 1]} : vector<2x192xf32> to vector<2x64xf32>
    %427 = vector.extract_strided_slice %415 {offsets = [0, 128], sizes = [2, 64], strides = [1, 1]} : vector<2x192xf32> to vector<2x64xf32>
    %428 = arith.mulf %424, %427 : vector<2x64xf32>
    %429 = arith.addf %426, %428 : vector<2x64xf32>
    %430 = math.tanh %429 : vector<2x64xf32>
    %431 = arith.subf %407, %430 : vector<2x64xf32>
    %432 = arith.mulf %425, %431 : vector<2x64xf32>
    %433 = arith.addf %430, %432 : vector<2x64xf32>
    %434 = vector.extract_strided_slice %433 {offsets = [0, 0], sizes = [2, 32], strides = [1, 1]} : vector<2x64xf32> to vector<2x32xf32>
    %c34_122 = arith.constant 34 : index
    %c0_123 = arith.constant 0 : index
    %435 = vector.load %arg14[%c34_122, %c0_123] : memref<40x64xf32, #tpu.memory_space<vmem>>, vector<2x32xf32>
    tpu.vector_store %arg14[%c34_122, %c0_123], %434 {strides = array<i32>} : memref<40x64xf32, #tpu.memory_space<vmem>>, vector<2x32xf32>,
    %436 = vector.extract_strided_slice %433 {offsets = [0, 32], sizes = [2, 32], strides = [1, 1]} : vector<2x64xf32> to vector<2x32xf32>
    %c4_124 = arith.constant 4 : index
    %c32_125 = arith.constant 32 : index
    %437 = vector.load %arg14[%c4_124, %c32_125] : memref<40x64xf32, #tpu.memory_space<vmem>>, vector<2x32xf32>
    tpu.vector_store %arg14[%c4_124, %c32_125], %436 {strides = array<i32>} : memref<40x64xf32, #tpu.memory_space<vmem>>, vector<2x32xf32>,
    %c0_126 = arith.constant 0 : index
    %c0_127 = arith.constant 0 : index
    %438 = vector.load %arg14[%c0_126, %c0_127] : memref<40x64xf32, #tpu.memory_space<vmem>>, vector<34x64xf32>
    %c2_128 = arith.constant 2 : index
    %c0_129 = arith.constant 0 : index
    %439 = vector.load %arg14[%c2_128, %c0_129] : memref<40x64xf32, #tpu.memory_space<vmem>>, vector<34x64xf32>
    %c4_130 = arith.constant 4 : index
    %c0_131 = arith.constant 0 : index
    %440 = vector.load %arg14[%c4_130, %c0_131] : memref<40x64xf32, #tpu.memory_space<vmem>>, vector<34x64xf32>
    %c6_132 = arith.constant 6 : index
    %c0_133 = arith.constant 0 : index
    %441 = vector.load %arg14[%c6_132, %c0_133] : memref<40x64xf32, #tpu.memory_space<vmem>>, vector<34x64xf32>
    %442 = tpu.concatenate %438, %439, %440, %441 in 1 : vector<34x64xf32>, vector<34x64xf32>, vector<34x64xf32>, vector<34x64xf32> -> vector<34x256xf32>
    %c0_134 = arith.constant 0 : index
    %c0_135 = arith.constant 0 : index
    %443 = vector.load %arg5[%c0_134, %c0_135] : memref<256x48xf32, #tpu.memory_space<vmem>>, vector<256x48xf32>
    %cst_136 = arith.constant dense<0.000000e+00> : vector<34x48xf32>
    %444 = tpu.matmul %442, %443, %cst_136 {dimension_numbers = #tpu.dot_dimension_numbers<[1], [0], [0], [1], [0, 0, 1, 1], [], []>} : vector<34x256xf32>, vector<256x48xf32>, vector<34x48xf32> -> vector<34x48xf32>
    %c0_137 = arith.constant 0 : index
    %c0_138 = arith.constant 0 : index
    %445 = vector.load %arg6[%c0_137, %c0_138] : memref<1x48xf32, #tpu.memory_space<vmem>>, vector<1x48xf32>
    %446 = vector.broadcast %445 : vector<1x48xf32> to vector<34x48xf32>
    %447 = arith.addf %444, %446 : vector<34x48xf32>
    %cst_139 = arith.constant 0.000000e+00 : f32
    %448 = vector.broadcast %cst_139 : f32 to vector<34x48xf32>
    %449 = arith.maximumf %447, %448 : vector<34x48xf32>
    %450 = tpu.iota {dimensions = array<i32: 0>} : vector<34x48xi32>
    %451 = tpu.iota {dimensions = array<i32: 1>} : vector<34x48xi32>
    %c32_i32 = arith.constant 32 : i32
    %452 = vector.broadcast %c32_i32 : i32 to vector<34x48xi32>
    %453 = arith.cmpi sge, %450, %452 : vector<34x48xi32>
    %c16_i32 = arith.constant 16 : i32
    %454 = vector.broadcast %c16_i32 : i32 to vector<34x48xi32>
    %455 = arith.cmpi sge, %451, %454 : vector<34x48xi32>
    %456 = arith.andi %453, %455 : vector<34x48xi1>
    %c32_i32_140 = arith.constant 32 : i32
    %457 = vector.broadcast %c32_i32_140 : i32 to vector<34x48xi32>
    %458 = arith.cmpi slt, %451, %457 : vector<34x48xi32>
    %459 = arith.andi %456, %458 : vector<34x48xi1>
    %cst_141 = arith.constant 0.000000e+00 : f32
    %460 = vector.broadcast %cst_141 : f32 to vector<34x48xf32>
    %461 = arith.select %459, %460, %449 : vector<34x48xi1>, vector<34x48xf32>
    %462 = tpu.iota {dimensions = array<i32: 0>} : vector<34x1xi32>
    %c2_i32 = arith.constant 2 : i32
    %c0_i32 = arith.constant 0 : i32
    %463 = arith.cmpi eq, %c2_i32, %c0_i32 : i32
    %c1_i32 = arith.constant 1 : i32
    %464 = arith.select %463, %c1_i32, %c2_i32 : i32
    %465 = vector.broadcast %464 : i32 to vector<34x1xi32>
    %466 = arith.remsi %462, %465 : vector<34x1xi32>
    %c0_i32_142 = arith.constant 0 : i32
    %467 = vector.broadcast %c0_i32_142 : i32 to vector<34x1xi32>
    %468 = arith.cmpi ne, %466, %467 : vector<34x1xi32>
    %c0_i32_143 = arith.constant 0 : i32
    %469 = vector.broadcast %c0_i32_143 : i32 to vector<34x1xi32>
    %470 = arith.cmpi slt, %466, %469 : vector<34x1xi32>
    %c0_i32_144 = arith.constant 0 : i32
    %471 = arith.cmpi slt, %464, %c0_i32_144 : i32
    %472 = vector.broadcast %471 : i1 to vector<34x1xi1>
    %473 = vector.broadcast %472 : vector<34x1xi1> to vector<34x1xi1>
    %474 = arith.xori %470, %473 : vector<34x1xi1>
    %475 = arith.andi %474, %468 : vector<34x1xi1>
    %476 = vector.broadcast %464 : i32 to vector<34x1xi32>
    %477 = arith.addi %466, %476 : vector<34x1xi32>
    %478 = arith.select %475, %477, %466 : vector<34x1xi1>, vector<34x1xi32>
    %c0_i32_145 = arith.constant 0 : i32
    %479 = vector.broadcast %c0_i32_145 : i32 to vector<34x1xi32>
    %480 = arith.cmpi eq, %478, %479 : vector<34x1xi32>
    %cst_146 = arith.constant 0.000000e+00 : f32
    %481 = vector.shape_cast %480 : vector<34x1xi1> to vector<34x1xi1>
    %482 = vector.broadcast %481 : vector<34x1xi1> to vector<34x48xi1>
    %483 = vector.broadcast %cst_146 : f32 to vector<34x48xf32>
    %484 = arith.select %482, %461, %483 : vector<34x48xi1>, vector<34x48xf32>
    %cst_147 = arith.constant dense<0xFF800000> : vector<48xf32>
    %485 = vector.multi_reduction <maximumf>, %484, %cst_147 [0] : vector<34x48xf32> to vector<48xf32>
    %486 = vector.shape_cast %485 : vector<48xf32> to vector<1x48xf32>
    %c1_i32_148 = arith.constant 1 : i32
    %487 = vector.broadcast %c1_i32_148 : i32 to vector<34x1xi32>
    %488 = arith.cmpi eq, %478, %487 : vector<34x1xi32>
    %cst_149 = arith.constant 0.000000e+00 : f32
    %489 = vector.shape_cast %488 : vector<34x1xi1> to vector<34x1xi1>
    %490 = vector.broadcast %489 : vector<34x1xi1> to vector<34x48xi1>
    %491 = vector.broadcast %cst_149 : f32 to vector<34x48xf32>
    %492 = arith.select %490, %461, %491 : vector<34x48xi1>, vector<34x48xf32>
    %cst_150 = arith.constant dense<0xFF800000> : vector<48xf32>
    %493 = vector.multi_reduction <maximumf>, %492, %cst_150 [0] : vector<34x48xf32> to vector<48xf32>
    %494 = vector.shape_cast %493 : vector<48xf32> to vector<1x48xf32>
    %495 = tpu.concatenate %486, %494 in 0 : vector<1x48xf32>, vector<1x48xf32> -> vector<2x48xf32>
    tpu.wait_dma2 semaphore(%arg16 : memref<!tpu.dma_semaphore, #tpu.memory_space<semaphore_mem>>) src(%arg7 : memref<48x792xf32, #tpu.memory_space<any>>) dst(%arg15 : memref<48x792xf32, #tpu.memory_space<vmem>>)
    %c0_151 = arith.constant 0 : index
    %c0_152 = arith.constant 0 : index
    %496 = vector.load %arg15[%c0_151, %c0_152] : memref<48x792xf32, #tpu.memory_space<vmem>>, vector<48x792xf32>
    %cst_153 = arith.constant dense<0.000000e+00> : vector<2x792xf32>
    %497 = tpu.matmul %495, %496, %cst_153 {dimension_numbers = #tpu.dot_dimension_numbers<[1], [0], [0], [1], [0, 0, 1, 1], [], []>} : vector<2x48xf32>, vector<48x792xf32>, vector<2x792xf32> -> vector<2x792xf32>
    %c0_154 = arith.constant 0 : index
    %c0_155 = arith.constant 0 : index
    %498 = vector.load %arg8[%c0_154, %c0_155] : memref<1x792xf32, #tpu.memory_space<vmem>>, vector<1x792xf32>
    %499 = vector.broadcast %498 : vector<1x792xf32> to vector<2x792xf32>
    %500 = arith.addf %497, %499 : vector<2x792xf32>
    %501 = vector.extract_strided_slice %500 {offsets = [0, 0], sizes = [2, 256], strides = [1, 1]} : vector<2x792xf32> to vector<2x256xf32>
    %502 = vector.extract_strided_slice %500 {offsets = [0, 256], sizes = [2, 256], strides = [1, 1]} : vector<2x792xf32> to vector<2x256xf32>
    %503 = vector.extract_strided_slice %500 {offsets = [0, 512], sizes = [2, 256], strides = [1, 1]} : vector<2x792xf32> to vector<2x256xf32>
    %504 = vector.extract_strided_slice %500 {offsets = [0, 768], sizes = [2, 24], strides = [1, 1]} : vector<2x792xf32> to vector<2x24xf32>
    %505 = arith.negf %504 : vector<2x24xf32>
    %506 = math.exp %505 : vector<2x24xf32>
    %cst_156 = arith.constant 1.000000e+00 : f32
    %507 = vector.broadcast %cst_156 : f32 to vector<2x24xf32>
    %508 = arith.addf %507, %506 : vector<2x24xf32>
    %509 = arith.divf %507, %508 : vector<2x24xf32>
    %510 = vector.extract_strided_slice %509 {offsets = [0, 0], sizes = [2, 8], strides = [1, 1]} : vector<2x24xf32> to vector<2x8xf32>
    %511 = vector.extract_strided_slice %509 {offsets = [0, 8], sizes = [2, 8], strides = [1, 1]} : vector<2x24xf32> to vector<2x8xf32>
    %512 = vector.extract_strided_slice %509 {offsets = [0, 16], sizes = [2, 8], strides = [1, 1]} : vector<2x24xf32> to vector<2x8xf32>
    %513 = tpu.concatenate %510, %511, %512 in 0 : vector<2x8xf32>, vector<2x8xf32>, vector<2x8xf32> -> vector<6x8xf32>
    %c0_157 = arith.constant 0 : index
    %c0_158 = arith.constant 0 : index
    %514 = vector.load %arg9[%c0_157, %c0_158] : memref<8x256xf32, #tpu.memory_space<vmem>>, vector<8x256xf32>
    %cst_159 = arith.constant dense<0.000000e+00> : vector<6x256xf32>
    %515 = tpu.matmul %513, %514, %cst_159 {dimension_numbers = #tpu.dot_dimension_numbers<[1], [0], [0], [1], [0, 0, 1, 1], [], []>} : vector<6x8xf32>, vector<8x256xf32>, vector<6x256xf32> -> vector<6x256xf32>
    %516 = vector.extract_strided_slice %515 {offsets = [0, 0], sizes = [2, 256], strides = [1, 1]} : vector<6x256xf32> to vector<2x256xf32>
    %517 = arith.mulf %502, %516 : vector<2x256xf32>
    %518 = vector.extract_strided_slice %515 {offsets = [2, 0], sizes = [2, 256], strides = [1, 1]} : vector<6x256xf32> to vector<2x256xf32>
    %519 = arith.mulf %503, %518 : vector<2x256xf32>
    %520 = arith.addf %517, %519 : vector<2x256xf32>
    %521 = vector.extract_strided_slice %515 {offsets = [4, 0], sizes = [2, 256], strides = [1, 1]} : vector<6x256xf32> to vector<2x256xf32>
    %522 = arith.mulf %501, %521 : vector<2x256xf32>
    %523 = arith.addf %520, %522 : vector<2x256xf32>
    %cst_160 = arith.constant 0.000000e+00 : f32
    %524 = vector.broadcast %cst_160 : f32 to vector<2x256xf32>
    %525 = arith.maximumf %523, %524 : vector<2x256xf32>
    %c0_161 = arith.constant 0 : index
    %c0_162 = arith.constant 0 : index
    %526 = vector.load %arg10[%c0_161, %c0_162] : memref<256x8xf32, #tpu.memory_space<vmem>>, vector<256x8xf32>
    %cst_163 = arith.constant dense<0.000000e+00> : vector<2x8xf32>
    %527 = tpu.matmul %525, %526, %cst_163 {dimension_numbers = #tpu.dot_dimension_numbers<[1], [0], [0], [1], [0, 0, 1, 1], [], []>} : vector<2x256xf32>, vector<256x8xf32>, vector<2x8xf32> -> vector<2x8xf32>
    %c0_164 = arith.constant 0 : index
    %c0_165 = arith.constant 0 : index
    %528 = vector.load %arg11[%c0_164, %c0_165] : memref<1x8xf32, #tpu.memory_space<vmem>>, vector<1x8xf32>
    %529 = vector.broadcast %528 : vector<1x8xf32> to vector<2x8xf32>
    %530 = arith.addf %527, %529 : vector<2x8xf32>
    %c0_166 = arith.constant 0 : index
    %c0_167 = arith.constant 0 : index
    %531 = vector.load %arg12[%c0_166, %c0_167] : memref<2x8xf32, #tpu.memory_space<vmem>>, vector<2x8xf32>
    tpu.vector_store %arg12[%c0_166, %c0_167], %530 {strides = array<i32>} : memref<2x8xf32, #tpu.memory_space<vmem>>, vector<2x8xf32>,
    return
  }
}

</mosaic_0001>

<bundles_post_ra>
// kernel: hiagm_forward.1
= control target key start
LH: loop header
LB: loop body
LE: loop exit
PB: predicated region body
PF: predicated region fallthrough
CT: control target
= control target key end

     0   :  { %17 = vsyncpa [#allocation7], 0  ;;  %v3831_v44 = vmov 0   ;;  %s4966_s0 = inlined_call_operand.vmem [shape: s32[32,2], index: 0, kind: input, shape index: {}]   ;;  %s4967_s1 = inlined_call_operand.vmem [shape: f32[128,192], index: 1, kind: input, shape index: {}]   ;;  %s4968_s2 = inlined_call_operand.vmem [shape: f32[1,192], index: 2, kind: input, shape index: {}]   ;;  %s4969_s3 = inlined_call_operand.vmem [shape: f32[64,192], index: 3, kind: input, shape index: {}]   ;;  %s4970_s4 = inlined_call_operand.vmem [shape: f32[1,192], index: 4, kind: input, shape index: {}]   ;;  %s4971_s5 = inlined_call_operand.vmem [shape: f32[256,48], index: 5, kind: input, shape index: {}]   ;;  %s4972_s6 = inlined_call_operand.vmem [shape: f32[1,48], index: 6, kind: input, shape index: {}]   ;;  %s4973_s7 = inlined_call_operand.vmem [shape: f32[48,792], index: 7, kind: input, shape index: {}]   ;;  %s4974_s8 = inlined_call_operand.vmem [shape: f32[1,792], index: 8, kind: input, shape index: {}]   ;;  %s4975_s9 = inlined_call_operand.vmem [shape: f32[8,256], index: 9, kind: input, shape index: {}]   ;;  %s4976_s10 = inlined_call_operand.vmem [shape: f32[256,8], index: 10, kind: input, shape index: {}]   ;;  %s4977_s11 = inlined_call_operand.vmem [shape: f32[1,8], index: 11, kind: input, shape index: {}]   ;;  %s4978_s12 = inlined_call_operand.hbm [shape: f32[2,8], index: 12, kind: output, shape index: {}]  }
   0x1   :  { %v3909_v0 = vld [vmem:[%s4973_s7] sm:$0xff]  ;;  %v3914_v1 = vld [vmem:[%s4973_s7 + $0x8] sm:$0xff]  ;;  %v3919_v2 = vld [vmem:[%s4973_s7 + $0x10] sm:$0xff]  ;;  %3677 = vset.pattern.permute.xlu1 %v3831_v44  ;;  %3675 = vset.pattern.permute.xlu0 %v3831_v44 }
   0x2   :  { %v3924_v3 = vld [vmem:[%s4973_s7 + $0x18] sm:$0xff]  ;;  %v3929_v4 = vld [vmem:[%s4973_s7 + $0x20] sm:$0xff]  ;;  %v3934_v5 = vld [vmem:[%s4973_s7 + $0x28] sm:$0xff] }
   0x3   :  { %v3939_v6 = vld [vmem:[%s4973_s7 + $0x30] sm:$0xff]  ;;  %v3944_v7 = vld [vmem:[%s4973_s7 + $0x38] sm:$0xff]  ;;  %v3949_v8 = vld [vmem:[%s4973_s7 + $0x40] sm:$0xff] }
   0x4   :  { %4983 = vst [vmem:[#allocation11_spill] sm:$0xff] %v3939_v6  ;;  %v3954_v9 = vld [vmem:[%s4973_s7 + $0x48] sm:$0xff]  ;;  %v3959_v10 = vld [vmem:[%s4973_s7 + $0x50] sm:$0xff]  ;;  %v3964_v11 = vld [vmem:[%s4973_s7 + $0x58] sm:$0xff] }
   0x5   :  { %v3969_v12 = vld [vmem:[%s4973_s7 + $0x60] sm:$0xff]  ;;  %v3974_v13 = vld [vmem:[%s4973_s7 + $0x68] sm:$0xff]  ;;  %v3979_v14 = vld [vmem:[%s4973_s7 + $0x70] sm:$0xff] }
   0x6   :  { %4984 = vst [vmem:[#allocation12_spill] sm:$0xff] %v3974_v13  ;;  %v3984_v15 = vld [vmem:[%s4973_s7 + $0x78] sm:$0xff]  ;;  %v3989_v16 = vld [vmem:[%s4973_s7 + $0x80] sm:$0xff]  ;;  %v3994_v17 = vld [vmem:[%s4973_s7 + $0x88] sm:$0xff] }
   0x7   :  { %v3999_v18 = vld [vmem:[%s4973_s7 + $0x90] sm:$0xff]  ;;  %v4004_v19 = vld [vmem:[%s4973_s7 + $0x98] sm:$0xff]  ;;  %v4009_v20 = vld [vmem:[%s4973_s7 + $0xa0] sm:$0xff] }
   0x8   :  { %4985 = vst [vmem:[#allocation13_spill] sm:$0xff] %v4009_v20  ;;  %v4014_v21 = vld [vmem:[%s4973_s7 + $0xa8] sm:$0xff]  ;;  %v4019_v22 = vld [vmem:[%s4973_s7 + $0xb0] sm:$0xff]  ;;  %v4024_v23 = vld [vmem:[%s4973_s7 + $0xb8] sm:$0xff] }
   0x9   :  { %v4029_v24 = vld [vmem:[%s4973_s7 + $0xc0] sm:$0xff]  ;;  %v4034_v25 = vld [vmem:[%s4973_s7 + $0xc8] sm:$0xff]  ;;  %v4039_v26 = vld [vmem:[%s4973_s7 + $0xd0] sm:$0xff] }
   0xa   :  { %v4044_v27 = vld [vmem:[%s4973_s7 + $0xd8] sm:$0xff]  ;;  %v4049_v28 = vld [vmem:[%s4973_s7 + $0xe0] sm:$0xff]  ;;  %v4054_v29 = vld [vmem:[%s4973_s7 + $0xe8] sm:$0xff] }
   0xb   :  { %4986 = vst [vmem:[#allocation14_spill] sm:$0xff] %v4044_v27  ;;  %v4059_v30 = vld [vmem:[%s4973_s7 + $0xf0] sm:$0xff]  ;;  %v4064_v31 = vld [vmem:[%s4973_s7 + $0xf8] sm:$0xff]  ;;  %v4069_v32 = vld [vmem:[%s4973_s7 + $0x100] sm:$0xff] }
   0xc   :  { %4987 = vst [vmem:[#allocation15_spill] sm:$0xff] %v4069_v32  ;;  %v4074_v33 = vld [vmem:[%s4973_s7 + $0x108] sm:$0xff]  ;;  %v4079_v34 = vld [vmem:[%s4973_s7 + $0x110] sm:$0xff]  ;;  %v4084_v35 = vld [vmem:[%s4973_s7 + $0x118] sm:$0xff] }
   0xd   :  { %4988 = vst [vmem:[#allocation16_spill] sm:$0xff] %v4074_v33  ;;  %4989 = vst [vmem:[#allocation17_spill] sm:$0xff] %v4079_v34  ;;  %v4089_v36 = vld [vmem:[%s4973_s7 + $0x120] sm:$0xff]  ;;  %v4094_v37 = vld [vmem:[%s4973_s7 + $0x128] sm:$0xff] }
   0xe   :  { %v4099_v38 = vld [vmem:[%s4973_s7 + $0x130] sm:$0xff]  ;;  %v4104_v39 = vld [vmem:[%s4973_s7 + $0x138] sm:$0xff]  ;;  %v4109_v40 = vld [vmem:[%s4973_s7 + $0x140] sm:$0xff] }
   0xf   :  { %4990 = vst [vmem:[#allocation18_spill] sm:$0xff] %v4104_v39  ;;  %4991 = vst [vmem:[#allocation19_spill] sm:$0xff] %v4109_v40  ;;  %v4114_v41 = vld [vmem:[%s4973_s7 + $0x148] sm:$0xff]  ;;  %v164_v43 = vld [vmem:[%s4966_s0] sm:$0xff] }
  0x10   :  { %4992 = vst [vmem:[#allocation20_spill] sm:$0xff] %v4114_v41  ;;  %v165_v42 = vld [vmem:[%s4966_s0 + $0x8] sm:$0xff] }
  0x11   :  { %163 = vsyncadd [#allocation5], 5376  ;;  %v215_v45 = vld [vmem:[%s4967_s1 + $0x8] sm:$0xff]  ;;  %174 = vperm.xlu1 %3677, %v165_v42   ;;  %171 = vperm.xlu0 %3675, %v164_v43   ;;  %v217_v46 = vld [vmem:[%s4967_s1 + $0x18] sm:$0xff]  ;;  %v3832_v56 = vmov 1   ;;  %vm348_vm12 = vcmask 523264  }
  0x12   :  { %v214_v47 = vld [vmem:[%s4967_s1] sm:$0xff]  ;;  %v216_v48 = vld [vmem:[%s4967_s1 + $0x10] sm:$0xff]  ;;  %v3268_v49 = vpack.c.bf16 %v217_v46, %v215_v45  ;;  %v219_v50 = vld [vmem:[%s4967_s1 + $0x28] sm:$0xff]  ;;  %v4979_v45 = vmov 0.0   ;;  %vm486_vm13 = vcmask 254976   ;;  %vm488_vm14 = vcmask 517376  }
  0x13   :  { %v221_v51 = vld [vmem:[%s4967_s1 + $0x38] sm:$0xff]  ;;  %v3270_v52 = vpack.c.bf16 %v216_v48, %v214_v47  ;;  %v218_v54 = vld [vmem:[%s4967_s1 + $0x20] sm:$0xff]  ;;  %v220_v55 = vld [vmem:[%s4967_s1 + $0x30] sm:$0xff]  ;;  %322 = vmatprep.mubr.f32.mxu0 %v4979_v45  ;;  %559 = vmatprep.mubr.f32.mxu1 %v4979_v45  ;;  %vm597_vm15 = vcmask 257026  }
  0x14   :  { %3269 = vmatprep.subr.bf16.mxu0 %v3268_v49  ;;  %v3272_v53 = vpack.c.bf16 %v221_v51, %v219_v50  ;;  %v223_v57 = vld [vmem:[%s4967_s1 + $0x48] sm:$0xff]  ;;  %v225_v58 = vld [vmem:[%s4967_s1 + $0x58] sm:$0xff]  ;;  %v166_v59 = vld [vmem:[%s4966_s0 + $0x10] sm:$0xff]  ;;  %v3274_v60 = vpack.c.bf16 %v220_v55, %v218_v54 }
  0x15   :  { %3678 = vset.pattern.permute.xlu1 %v3832_v56  ;;  %3676 = vset.pattern.permute.xlu0 %v3832_v56  ;;  %v3276_v61 = vpack.c.bf16 %v225_v58, %v223_v57  ;;  %v222_v62 = vld [vmem:[%s4967_s1 + $0x40] sm:$0xff]  ;;  %v224_v63 = vld [vmem:[%s4967_s1 + $0x50] sm:$0xff]  ;;  %v167_v46 = vld [vmem:[%s4966_s0 + $0x18] sm:$0xff] }
  0x16   :  { %190 = vperm.xlu1 %3678, %v165_v42   ;;  %187 = vperm.xlu0 %3676, %v164_v43   ;;  %v227_v42 = vld [vmem:[%s4967_s1 + $0x68] sm:$0xff]  ;;  %v229_v43 = vld [vmem:[%s4967_s1 + $0x78] sm:$0xff]  ;;  %v226_v47 = vld [vmem:[%s4967_s1 + $0x60] sm:$0xff]  ;;  %v3278_v48 = vpack.c.bf16 %v224_v63, %v222_v62 }
  0x17   :  { %3271 = vmatpush1.bf16.msra.mxu0 %v3270_v52  ;;  %v228_v49 = vld [vmem:[%s4967_s1 + $0x70] sm:$0xff]  ;;  %v359_v50 = vld [vmem:[%s4969_s3 + $0x18] sm:$0xff]  ;;  %v3280_v51 = vpack.c.bf16 %v229_v43, %v227_v42  ;;  %v361_v55 = vld [vmem:[%s4969_s3 + $0x28] sm:$0xff] }
  0x18   :  { %3273 = vmatprep.subr.bf16.mxu0 %v3272_v53  ;;  %v356_v53 = vld [vmem:[%s4969_s3] sm:$0xff]  ;;  %v358_v54 = vld [vmem:[%s4969_s3 + $0x10] sm:$0xff]  ;;  %v231_v56 = vld [vmem:[%s4967_s1 + $0x88] sm:$0xff] }
  0x19   :  { %v233_v57 = vld [vmem:[%s4967_s1 + $0x98] sm:$0xff]  ;;  %v360_v63 = vld [vmem:[%s4969_s3 + $0x20] sm:$0xff]  ;;  %v362_v42 = vld [vmem:[%s4969_s3 + $0x30] sm:$0xff] }
  0x1a   :  { %3679 = vset.pattern.permute.xlu1 %v3831_v44  ;;  %193 = vperm.xlu0 %3676, %v166_v59   ;;  %v357_v44 = vld [vmem:[%s4969_s3 + $0x8] sm:$0xff]  ;;  %v363_v58 = vld [vmem:[%s4969_s3 + $0x38] sm:$0xff]  ;;  %v3284_v43 = vpack.c.bf16 %v233_v57, %v231_v56  ;;  %v366_v56 = vld [vmem:[%s4969_s3 + $0x50] sm:$0xff] }
  0x1b   :  { %177 = vperm.xlu1 %3679, %v166_v59   ;;  %3275 = vmatpush1.bf16.msra.mxu0 %v3274_v60  ;;  %v4184_v52 = vpack.c.bf16 %v359_v50, %v357_v44  ;;  %v4204_v59 = vpack.c.bf16 %v358_v54, %v356_v53  ;;  %v3282_v60 = vpack.c.bf16 %v228_v49, %v226_v47  ;;  %v365_v47 = vld [vmem:[%s4969_s3 + $0x48] sm:$0xff]  ;;  %v237_v44 = vld [vmem:[%s4967_s1 + $0xb8] sm:$0xff]  ;;  %v234_v53 = vld [vmem:[%s4967_s1 + $0xa0] sm:$0xff] }
  0x1c   :  { %3277 = vmatprep.subr.bf16.mxu0 %v3276_v61  ;;  %v230_v61 = vld [vmem:[%s4967_s1 + $0x80] sm:$0xff]  ;;  %v4210_v62 = vpack.c.bf16 %v363_v58, %v361_v55  ;;  %v235_v49 = vld [vmem:[%s4967_s1 + $0xa8] sm:$0xff]  ;;  %v4235_v50 = vpack.c.bf16 %v362_v42, %v360_v63  ;;  %v236_v58 = vld [vmem:[%s4967_s1 + $0xb0] sm:$0xff] }
  0x1d   :  { %3317 = vmatprep.subr.bf16.mxu1 %v4184_v52  ;;  %v364_v55 = vld [vmem:[%s4969_s3 + $0x40] sm:$0xff]  ;;  %v3288_v57 = vpack.c.bf16 %v237_v44, %v235_v49  ;;  %v239_v63 = vld [vmem:[%s4967_s1 + $0xc8] sm:$0xff]  ;;  %v241_v42 = vld [vmem:[%s4967_s1 + $0xd8] sm:$0xff] }
  0x1e   :  { %196 = vperm.xlu0 %3676, %v167_v46   ;;  %3319 = vmatpush1.bf16.msra.mxu1 %v4204_v59  ;;  %v370_v49 = vld [vmem:[%s4969_s3 + $0x70] sm:$0xff]  ;;  %v3292_v44 = vpack.c.bf16 %v241_v42, %v239_v63  ;;  %v238_v45 = vld [vmem:[%s4967_s1 + $0xc0] sm:$0xff] }
  0x1f   :  { %180 = vperm.xlu1 %3679, %v167_v46   ;;  %3279 = vmatpush1.bf16.msra.mxu0 %v3278_v48  ;;  %v232_v46 = vld [vmem:[%s4967_s1 + $0x90] sm:$0xff]  ;;  %v367_v48 = vld [vmem:[%s4969_s3 + $0x58] sm:$0xff] }
  0x20   :  { %3281 = vmatprep.subr.bf16.mxu0 %v3280_v51  ;;  %3321 = vmatprep.subr.bf16.mxu1 %v4210_v62  ;;  %v3286_v51 = vpack.c.bf16 %v232_v46, %v230_v61  ;;  %v4240_v54 = vpack.c.bf16 %v367_v48, %v365_v47  ;;  %v371_v61 = vld [vmem:[%s4969_s3 + $0x78] sm:$0xff]  ;;  %v3290_v46 = vpack.c.bf16 %v236_v58, %v234_v53  ;;  %v368_v48 = vld [vmem:[%s4969_s3 + $0x60] sm:$0xff]  ;;  %v243_v53 = vld [vmem:[%s4967_s1 + $0xe8] sm:$0xff] }
  0x22   :  { %3323 = vmatpush1.bf16.msra.mxu1 %v4235_v50 }
  0x23   :  { %3283 = vmatpush1.bf16.msra.mxu0 %v3282_v60  ;;  %v369_v60 = vld [vmem:[%s4969_s3 + $0x68] sm:$0xff]  ;;  %3325 = vmatprep.subr.bf16.mxu1 %v4240_v54 }
  0x24   :  { %3285 = vmatprep.subr.bf16.mxu0 %v3284_v43  ;;  %v4265_v43 = vpack.c.bf16 %v366_v56, %v364_v55  ;;  %v4267_v47 = vpack.c.bf16 %v371_v61, %v369_v60  ;;  %v245_v55 = vld [vmem:[%s4967_s1 + $0xf8] sm:$0xff]  ;;  %v4289_v56 = vpack.c.bf16 %v370_v49, %v368_v48  ;;  %v242_v60 = vld [vmem:[%s4967_s1 + $0xe0] sm:$0xff]  ;;  %v244_v61 = vld [vmem:[%s4967_s1 + $0xf0] sm:$0xff] }
  0x25   :  { %v3296_v58 = vpack.c.bf16 %v245_v55, %v243_v53  ;;  %v3298_v63 = vpack.c.bf16 %v244_v61, %v242_v60 }
  0x26   :  { %3327 = vmatpush1.bf16.msra.mxu1 %v4265_v43 }
  0x27   :  { %3287 = vmatpush1.bf16.msra.mxu0 %v3286_v51  ;;  %v240_v51 = vld [vmem:[%s4967_s1 + $0xd0] sm:$0xff]  ;;  %3329 = vmatprep.subr.bf16.mxu1 %v4267_v47 }
  0x28   :  { %3289 = vmatprep.subr.bf16.mxu0 %v3288_v57  ;;  %v3294_v57 = vpack.c.bf16 %v240_v51, %v238_v45  ;;  %v168_v45 = vlaneseq  ;;  %v3834_v51 = vmov 1.0  }
  0x2a   :  { %3331 = vmatpush1.bf16.msra.mxu1 %v4289_v56  ;;  %v4300_v48 = vand.u32 127, %v168_v45  ;;  %v4342_v61 = vshrl.u32 %v168_v45, 7 }
  0x2b   :  { %3291 = vmatpush1.bf16.msra.mxu0 %v3290_v46  ;;  %3349 = vmatprep.subr.bf16.mxu1 %v4184_v52 }
  0x2c   :  { %3293 = vmatprep.subr.bf16.mxu0 %v3292_v44 }
  0x2f   :  { %3295 = vmatpush1.bf16.msra.mxu0 %v3294_v57  ;;  %v4993_v57 = vmov 0.0  }
  0x30   :  { %3297 = vmatprep.subr.bf16.mxu0 %v3296_v58  ;;  %373 = vst.msk [vmem:[#allocation3] sm:$0xff] %vm348_vm12, %v4993_v57  ;;  %374 = vst.msk [vmem:[#allocation3 + $0x8] sm:$0xff] %vm348_vm12, %v4993_v57 }
  0x31   :  { %375 = vst.msk [vmem:[#allocation3 + $0x10] sm:$0xff] %vm348_vm12, %v4993_v57  ;;  %376 = vst.msk [vmem:[#allocation3 + $0x18] sm:$0xff] %vm348_vm12, %v4993_v57 }
  0x32   :  { %377 = vst.msk [vmem:[#allocation3 + $0x20] sm:$0xff] %vm348_vm12, %v4993_v57 }
  0x33   :  { %3299 = vmatpush1.bf16.msra.mxu0 %v3298_v63  ;;  %v4345_v63 = vsub.s32 0, %v4342_v61 }
  0x34   :  { %3301 = vmatprep.subr.bf16.mxu0 %v4184_v52 }
  0x35   :  { %4994 = vst [vmem:[#allocation21_spill] sm:$0xff] %v4345_v63 }
  0x90   :  { %v172_v42 = vpop.permute.xlu0 %171  ;;  %v175_v46 = vpop.permute.xlu1 %174 }
  0x91   :  { %vm182_vm1 = vcmp.eq.s32.totalorder %v4300_v48, %v172_v42  ;;  %vm183_vm4 = vcmp.eq.s32.totalorder %v4300_v48, %v175_v46  ;;  %v246_v42 = vld [vmem:[%s4968_s2] sm:$0x3]  ;;  %v4351_v46 = vsub.s32 1, %v4342_v61 }
  0x93   :  { %4995 = vst [vmem:[#allocation22_spill] sm:$0xff] %v4351_v46 }
  0x95   :  { %v191_v49 = vpop.permute.xlu1 %190  ;;  %v188_v44 = vpop.permute.xlu0 %187 }
  0x96   :  { %vm198_vm0 = vcmp.eq.s32.totalorder %v4300_v48, %v188_v44  ;;  %vm199_vm3 = vcmp.eq.s32.totalorder %v4300_v48, %v191_v49  ;;  %v251_v49 = vrot.slane %v246_v42, %v4345_v63  ;;  %v255_v44 = vrot.slane %v246_v42, %v4351_v46  ;;  %v372_v42 = vld [vmem:[%s4970_s4] sm:$0x3]  ;;  %s3835_s4 = smov 64  }
  0x97   :  { %vm202_vm2 = vmor %vm182_vm1, %vm198_vm0  ;;  %vm599_vm0 = vcmask 519426   ;;  %vm709_vm1 = vcmask 259076  }
  0x98   :  { %3120 = vmatmul.mubr.msk.f32.vlgmr.msra.gmra.mrb[0].mxu0 %vm202_vm2, %v3834_v51  ;;  %vm203_vm5 = vmor %vm183_vm4, %vm199_vm3  ;;  %vm711_vm2 = vcmask 521476   ;;  %vm821_vm3 = vcmask 261126   ;;  %vm823_vm4 = vcmask 523526  }
  0x99   :  { %v194_v53 = vpop.permute.xlu0 %193  ;;  %3303 = vmatpush1.bf16.msra.mxu0 %v4204_v59  ;;  %328 = vmatprep.mubr.f32.mxu0 %v4993_v57 }
  0x9a   :  { %v178_v55 = vpop.permute.xlu1 %177  ;;  %3305 = vmatprep.subr.bf16.mxu0 %v4210_v62  ;;  %vm200_vm6 = vcmp.eq.s32.totalorder %v4300_v48, %v194_v53 }
  0x9b   :  { %vm184_vm7 = vcmp.eq.s32.totalorder %v4300_v48, %v178_v55 }
  0x9c   :  { %3121 = vmatmul.mubr.msk.f32.gmra.mrb[2].mxu0 %vm203_vm5, %v3834_v51  ;;  %vm204_vm8 = vmor %vm184_vm7, %vm200_vm6 }
  0x9d   :  { %3307 = vmatpush1.bf16.msra.mxu0 %v4235_v50  ;;  %v197_v58 = vpop.permute.xlu0 %196  ;;  %334 = vmatprep.mubr.f32.mxu0 %v4993_v57 }
  0x9e   :  { %v181_v60 = vpop.permute.xlu1 %180  ;;  %3309 = vmatprep.subr.bf16.mxu0 %v4240_v54  ;;  %vm201_vm9 = vcmp.eq.s32.totalorder %v4300_v48, %v197_v58 }
  0x9f   :  { %vm185_vm10 = vcmp.eq.s32.totalorder %v4300_v48, %v181_v60 }
  0xa0   :  { %3122 = vmatmul.mubr.msk.f32.gmra.mrb[4].mxu0 %vm204_vm8, %v3834_v51  ;;  %vm205_vm11 = vmor %vm185_vm10, %vm201_vm9  ;;  %vm2436_vm8 = vcmask 392192  }
  0xa1   :  { %3311 = vmatpush1.bf16.msra.mxu0 %v4265_v43  ;;  %340 = vmatprep.mubr.f32.mxu0 %v4993_v57 }
  0xa2   :  { %3313 = vmatprep.subr.bf16.mxu0 %v4267_v47 }
  0xa4   :  { %3123 = vmatmul.mubr.msk.f32.gmra.mrb[6].mxu0 %vm205_vm11, %v3834_v51 }
  0xa5   :  { %3315 = vmatpush1.bf16.msra.mxu0 %v4289_v56  ;;  %458 = vmatprep.mubr.f32.mxu0 %v4993_v57 }
  0xa6   :  { %3333 = vmatprep.subr.bf16.mxu0 %v4184_v52 }
  0xa8   :  { %459 = vmatmul.mubr.f32.vlgmr.msra.gmra.mrb[8].mxu0 %v4993_v57 }
  0xa9   :  { %3335 = vmatpush1.bf16.msra.mxu0 %v4204_v59  ;;  %671 = vmatprep.mubr.f32.mxu0 %v4993_v57 }
  0xaa   :  { %3337 = vmatprep.subr.bf16.mxu0 %v4210_v62 }
  0xad   :  { %3339 = vmatpush1.bf16.msra.mxu0 %v4235_v50 }
  0xae   :  { %3341 = vmatprep.subr.bf16.mxu0 %v4240_v54 }
  0xb1   :  { %3343 = vmatpush1.bf16.msra.mxu0 %v4265_v43 }
  0xb2   :  { %3345 = vmatprep.subr.bf16.mxu0 %v4267_v47 }
  0xb5   :  { %3347 = vmatpush1.bf16.msra.mxu0 %v4289_v56 }
  0xb6   :  { %3365 = vmatprep.subr.bf16.mxu0 %v4184_v52 }
 0x16b   :  { %v324_v51 = vpop.f32.mrb[0].mxu0 }
 0x16c   :  { %v325_v53 = vadd.f32 %v324_v51, %v251_v49  ;;  %v326_v55 = vpop.f32.mrb[1].mxu0 }
 0x16d   :  { %v327_v58 = vadd.f32 %v326_v55, %v255_v44  ;;  %v4362_v55 = vrot.slane %v372_v42, %v4345_v63  ;;  %v4367_v63 = vrot.slane %v372_v42, %v4351_v46 }
 0x16e   :  { %347 = vst [vmem:[#allocation2] sm:$0xff] %v325_v53 }
 0x16f   :  { %349 = vst.msk [vmem:[#allocation2 + $0x8] sm:$0xff] %vm348_vm12, %v327_v58  ;;  %v330_v45 = vpop.f32.mrb[2].mxu0 }
 0x170   :  { %v331_v60 = vadd.f32 %v330_v45, %v251_v49  ;;  %v332_v41 = vpop.f32.mrb[3].mxu0 }
 0x171   :  { %v333_v34 = vadd.f32 %v332_v41, %v255_v44 }
 0x172   :  { %350 = vst [vmem:[#allocation2 + $0x10] sm:$0xff] %v331_v60 }
 0x173   :  { %351 = vst.msk [vmem:[#allocation2 + $0x18] sm:$0xff] %vm348_vm12, %v333_v34  ;;  %v336_v27 = vpop.f32.mrb[4].mxu0 }
 0x174   :  { %v337_v20 = vadd.f32 %v336_v27, %v251_v49  ;;  %v338_v13 = vpop.f32.mrb[5].mxu0 }
 0x175   :  { %v339_v51 = vadd.f32 %v338_v13, %v255_v44  ;;  %v378_v6 = vld [vmem:[#allocation2] sm:$0x3] }
 0x176   :  { %352 = vst [vmem:[#allocation2 + $0x20] sm:$0xff] %v337_v20 }
 0x177   :  { %353 = vst.msk [vmem:[#allocation2 + $0x28] sm:$0xff] %vm348_vm12, %v339_v51  ;;  %v342_v53 = vpop.f32.mrb[6].mxu0 }
 0x178   :  { %v343_v58 = vadd.f32 %v342_v53, %v251_v49  ;;  %v344_v41 = vpop.f32.mrb[7].mxu0 }
 0x179   :  { %v345_v45 = vadd.f32 %v344_v41, %v255_v44 }
 0x17a   :  { %354 = vst [vmem:[#allocation2 + $0x30] sm:$0xff] %v343_v58  ;;  %v379_v58 = vld [vmem:[#allocation2 + $0x8] sm:$0x3] }
 0x17b   :  { %355 = vst.msk [vmem:[#allocation2 + $0x38] sm:$0xff] %vm348_vm12, %v345_v45  ;;  %v460_v27 = vpop.f32.mrb[8].mxu0 }
 0x17c   :  { %v461_v34 = vadd.f32 %v460_v27, %v4362_v55  ;;  %v462_v60 = vpop.f32.mrb[9].mxu0 }
 0x17d   :  { %v463_v49 = vadd.f32 %v462_v60, %v4367_v63 }
 0x17e   :  { %v465_v39 = vadd.f32 %v461_v34, %v378_v6 }
 0x180   :  { %v3124_v13 = vmul.f32 -1.442695, %v465_v39 }
 0x182   :  { %3705 = vpow2.f32 %v3124_v13 }
 0x18c   :  { %v3706_v20 = vpop.eup %3705 }
 0x18d   :  { %v469_v51 = vadd.f32 1.0, %v3706_v20 }
 0x18f   :  { %3707 = vrcp.f32 %v469_v51 }
 0x199   :  { %v3708_v44 = vpop.eup %3707 }
 0x19a   :  { %v472_v53 = vmul.f32 %v3708_v44, %v463_v49  ;;  %v490_v49 = vld [vmem:[#allocation2] sm:$0xc] }
 0x19c   :  { %v473_v41 = vadd.f32 %v472_v53, %v379_v58 }
 0x19e   :  { %3709 = vtanh.f32 %v473_v41 }
 0x1a8   :  { %v3710_v45 = vpop.eup %3709 }
 0x1a9   :  { %v475_v27 = vsub.f32 0.0, %v3710_v45 }
 0x1ab   :  { %477 = vrot.lane.b32.xlu1 %v475_v27, %s3835_s4 }
 0x21d   :  { %v478_v6 = vpop.permute.xlu1 %477 }
 0x21e   :  { %v480_v39 = vmul.f32 %v3708_v44, %v478_v6 }
 0x220   :  { %482 = vrot.lane.b32.xlu0 %v480_v39, %s3835_s4 }
 0x292   :  { %v483_v34 = vpop.permute.xlu0 %482 }
 0x293   :  { %v485_v42 = vadd.f32 %v3710_v45, %v483_v34  ;;  %v491_v34 = vld [vmem:[#allocation2 + $0x8] sm:$0xc] }
 0x295   :  { %3125 = vmatmul.mubr.msk.f32.vlgmr.msra.gmra.mrb[0].mxu1 %vm348_vm12, %v485_v42  ;;  %487 = vst.msk [vmem:[#allocation3 + $0x4] sm:$0x3] %vm486_vm13, %v485_v42 }
 0x296   :  { %489 = vst.msk [vmem:[#allocation3 + $0x22] sm:$0x3] %vm488_vm14, %v485_v42  ;;  %3351 = vmatpush1.bf16.msra.mxu1 %v4204_v59  ;;  %783 = vmatprep.mubr.f32.mxu1 %v4993_v57 }
 0x297   :  { %3353 = vmatprep.subr.bf16.mxu1 %v4210_v62 }
 0x29a   :  { %3355 = vmatpush1.bf16.msra.mxu1 %v4235_v50 }
 0x29b   :  { %3357 = vmatprep.subr.bf16.mxu1 %v4240_v54 }
 0x29e   :  { %3359 = vmatpush1.bf16.msra.mxu1 %v4265_v43 }
 0x29f   :  { %3361 = vmatprep.subr.bf16.mxu1 %v4267_v47 }
 0x2a2   :  { %3363 = vmatpush1.bf16.msra.mxu1 %v4289_v56 }
 0x2a3   :  { %3381 = vmatprep.subr.bf16.mxu1 %v4184_v52 }
 0x368   :  { %v561_v60 = vpop.f32.mrb[0].mxu1 }
 0x369   :  { %v562_v13 = vadd.f32 %v561_v60, %v4362_v55  ;;  %v563_v20 = vpop.f32.mrb[1].mxu1 }
 0x36a   :  { %v564_v45 = vadd.f32 %v563_v20, %v4367_v63 }
 0x36b   :  { %v567_v51 = vrot.slane %v562_v13, 6 }
 0x36c   :  { %v577_v27 = vrot.slane %v564_v45, 6 }
 0x36d   :  { %v569_v44 = vadd.f32 %v567_v51, %v490_v49 }
 0x36f   :  { %v3126_v53 = vmul.f32 -1.442695, %v569_v44 }
 0x371   :  { %3711 = vpow2.f32 %v3126_v53 }
 0x37b   :  { %v3712_v58 = vpop.eup %3711 }
 0x37c   :  { %v573_v41 = vadd.f32 1.0, %v3712_v58 }
 0x37e   :  { %3713 = vrcp.f32 %v573_v41 }
 0x388   :  { %v3714_v6 = vpop.eup %3713 }
 0x389   :  { %v579_v39 = vmul.f32 %v3714_v6, %v577_v27 }
 0x38b   :  { %v580_v46 = vadd.f32 %v579_v39, %v491_v34 }
 0x38d   :  { %3715 = vtanh.f32 %v580_v46 }
 0x397   :  { %v3716_v32 = vpop.eup %3715 }
 0x398   :  { %v583_v40 = vrot.slane %v3716_v32, 2 }
 0x39a   :  { %v585_v60 = vsub.f32 %v485_v42, %v583_v40  ;;  %v601_v42 = vld [vmem:[#allocation2] sm:$0x30] }
 0x39c   :  { %v587_v33 = vrot.slane %v585_v60, 6  ;;  %v602_v60 = vld [vmem:[#allocation2 + $0x8] sm:$0x30] }
 0x39e   :  { %588 = vrot.lane.b32.xlu1 %v587_v33, %s3835_s4 }
 0x410   :  { %v589_v13 = vpop.permute.xlu1 %588 }
 0x411   :  { %v591_v51 = vmul.f32 %v3714_v6, %v589_v13 }
 0x413   :  { %593 = vrot.lane.b32.xlu0 %v591_v51, %s3835_s4 }
 0x485   :  { %v594_v49 = vpop.permute.xlu0 %593 }
 0x486   :  { %v596_v20 = vadd.f32 %v3716_v32, %v594_v49 }
 0x488   :  { %598 = vst.msk [vmem:[#allocation3 + $0x4] sm:$0xc] %vm597_vm15, %v596_v20  ;;  %v604_v44 = vrot.slane %v596_v20, 2 }
 0x489   :  { %600 = vst.msk [vmem:[#allocation3 + $0x1e] sm:$0xc] %vm599_vm0, %v596_v20 }
 0x48a   :  { %3127 = vmatmul.mubr.msk.f32.vlgmr.msra.gmra.mrb[10].mxu0 %vm348_vm12, %v604_v44 }
 0x48b   :  { %3367 = vmatpush1.bf16.msra.mxu0 %v4204_v59  ;;  %895 = vmatprep.mubr.f32.mxu0 %v4993_v57 }
 0x48c   :  { %3369 = vmatprep.subr.bf16.mxu0 %v4210_v62 }
 0x48f   :  { %3371 = vmatpush1.bf16.msra.mxu0 %v4235_v50 }
 0x490   :  { %3373 = vmatprep.subr.bf16.mxu0 %v4240_v54 }
 0x493   :  { %3375 = vmatpush1.bf16.msra.mxu0 %v4265_v43 }
 0x494   :  { %3377 = vmatprep.subr.bf16.mxu0 %v4267_v47 }
 0x497   :  { %3379 = vmatpush1.bf16.msra.mxu0 %v4289_v56 }
 0x498   :  { %3397 = vmatprep.subr.bf16.mxu0 %v4184_v52 }
 0x55d   :  { %v673_v32 = vpop.f32.mrb[10].mxu0 }
 0x55e   :  { %v674_v33 = vadd.f32 %v673_v32, %v4362_v55  ;;  %v675_v40 = vpop.f32.mrb[11].mxu0 }
 0x55f   :  { %v676_v27 = vadd.f32 %v675_v40, %v4367_v63 }
 0x560   :  { %v679_v46 = vrot.slane %v674_v33, 4 }
 0x561   :  { %v689_v6 = vrot.slane %v676_v27, 4  ;;  %v713_v27 = vld [vmem:[#allocation2] sm:$0xc0] }
 0x562   :  { %v681_v53 = vadd.f32 %v679_v46, %v601_v42 }
 0x564   :  { %v3128_v58 = vmul.f32 -1.442695, %v681_v53 }
 0x566   :  { %3717 = vpow2.f32 %v3128_v58 }
 0x570   :  { %v3718_v41 = vpop.eup %3717 }
 0x571   :  { %v685_v45 = vadd.f32 1.0, %v3718_v41 }
 0x573   :  { %3719 = vrcp.f32 %v685_v45 }
 0x57d   :  { %v3720_v39 = vpop.eup %3719 }
 0x57e   :  { %v691_v34 = vmul.f32 %v3720_v39, %v689_v6 }
 0x580   :  { %v692_v13 = vadd.f32 %v691_v34, %v602_v60 }
 0x582   :  { %3721 = vtanh.f32 %v692_v13 }
 0x58c   :  { %v3722_v51 = vpop.eup %3721 }
 0x58d   :  { %v695_v49 = vrot.slane %v3722_v51, 2 }
 0x58f   :  { %v697_v44 = vsub.f32 %v596_v20, %v695_v49 }
 0x591   :  { %v699_v32 = vrot.slane %v697_v44, 6 }
 0x593   :  { %700 = vrot.lane.b32.xlu1 %v699_v32, %s3835_s4  ;;  %v714_v32 = vld [vmem:[#allocation2 + $0x8] sm:$0xc0] }
 0x605   :  { %v701_v33 = vpop.permute.xlu1 %700 }
 0x606   :  { %v703_v46 = vmul.f32 %v3720_v39, %v701_v33 }
 0x608   :  { %705 = vrot.lane.b32.xlu0 %v703_v46, %s3835_s4 }
 0x67a   :  { %v706_v42 = vpop.permute.xlu0 %705 }
 0x67b   :  { %v708_v40 = vadd.f32 %v3722_v51, %v706_v42 }
 0x67d   :  { %710 = vst.msk [vmem:[#allocation3 + $0x4] sm:$0x30] %vm709_vm1, %v708_v40  ;;  %v716_v53 = vrot.slane %v708_v40, 4 }
 0x67e   :  { %712 = vst.msk [vmem:[#allocation3 + $0x1a] sm:$0x30] %vm711_vm2, %v708_v40 }
 0x67f   :  { %3129 = vmatmul.mubr.msk.f32.vlgmr.msra.gmra.mrb[2].mxu1 %vm348_vm12, %v716_v53 }
 0x680   :  { %3383 = vmatpush1.bf16.msra.mxu1 %v4204_v59  ;;  %998 = vmatprep.mubr.f32.mxu1 %v4993_v57 }
 0x681   :  { %3385 = vmatprep.subr.bf16.mxu1 %v4210_v62 }
 0x684   :  { %3387 = vmatpush1.bf16.msra.mxu1 %v4235_v50 }
 0x685   :  { %3389 = vmatprep.subr.bf16.mxu1 %v4240_v54 }
 0x688   :  { %3391 = vmatpush1.bf16.msra.mxu1 %v4265_v43 }
 0x689   :  { %3393 = vmatprep.subr.bf16.mxu1 %v4267_v47 }
 0x68c   :  { %3395 = vmatpush1.bf16.msra.mxu1 %v4289_v56 }
 0x68d   :  { %3413 = vmatprep.subr.bf16.mxu1 %v4184_v52 }
 0x752   :  { %v785_v20 = vpop.f32.mrb[2].mxu1 }
 0x753   :  { %v786_v58 = vadd.f32 %v785_v20, %v4362_v55  ;;  %v787_v41 = vpop.f32.mrb[3].mxu1 }
 0x754   :  { %v788_v13 = vadd.f32 %v787_v41, %v4367_v63 }
 0x755   :  { %v791_v45 = vrot.slane %v786_v58, 2 }
 0x756   :  { %v801_v51 = vrot.slane %v788_v13, 2 }
 0x757   :  { %v793_v6 = vadd.f32 %v791_v45, %v713_v27 }
 0x759   :  { %v3130_v39 = vmul.f32 -1.442695, %v793_v6 }
 0x75b   :  { %3723 = vpow2.f32 %v3130_v39 }
 0x765   :  { %v3724_v34 = vpop.eup %3723 }
 0x766   :  { %v797_v60 = vadd.f32 1.0, %v3724_v34 }
 0x768   :  { %3725 = vrcp.f32 %v797_v60  ;;  %v825_v60 = vld [vmem:[#allocation2 + $0x10] sm:$0x3] }
 0x772   :  { %v3726_v49 = vpop.eup %3725 }
 0x773   :  { %v803_v44 = vmul.f32 %v3726_v49, %v801_v51 }
 0x775   :  { %v804_v33 = vadd.f32 %v803_v44, %v714_v32 }
 0x777   :  { %3727 = vtanh.f32 %v804_v33 }
 0x781   :  { %v3728_v46 = vpop.eup %3727 }
 0x782   :  { %v807_v42 = vrot.slane %v3728_v46, 2 }
 0x784   :  { %v809_v53 = vsub.f32 %v708_v40, %v807_v42  ;;  %v826_v42 = vld [vmem:[#allocation2 + $0x18] sm:$0x3] }
 0x786   :  { %v811_v20 = vrot.slane %v809_v53, 6 }
 0x788   :  { %812 = vrot.lane.b32.xlu1 %v811_v20, %s3835_s4 }
 0x7fa   :  { %v813_v58 = vpop.permute.xlu1 %812 }
 0x7fb   :  { %v815_v45 = vmul.f32 %v3726_v49, %v813_v58 }
 0x7fd   :  { %817 = vrot.lane.b32.xlu0 %v815_v45, %s3835_s4 }
 0x86f   :  { %v818_v27 = vpop.permute.xlu0 %817 }
 0x870   :  { %v820_v41 = vadd.f32 %v3728_v46, %v818_v27 }
 0x872   :  { %822 = vst.msk [vmem:[#allocation3 + $0x4] sm:$0xc0] %vm821_vm3, %v820_v41  ;;  %v828_v6 = vrot.slane %v820_v41, 6 }
 0x873   :  { %824 = vst.msk [vmem:[#allocation3 + $0x16] sm:$0xc0] %vm823_vm4, %v820_v41 }
 0x874   :  { %3131 = vmatmul.mubr.msk.f32.vlgmr.msra.gmra.mrb[12].mxu0 %vm348_vm12, %v828_v6 }
 0x875   :  { %3399 = vmatpush1.bf16.msra.mxu0 %v4204_v59  ;;  %1108 = vmatprep.mubr.f32.mxu0 %v4993_v57 }
 0x876   :  { %3401 = vmatprep.subr.bf16.mxu0 %v4210_v62 }
 0x879   :  { %3403 = vmatpush1.bf16.msra.mxu0 %v4235_v50 }
 0x87a   :  { %3405 = vmatprep.subr.bf16.mxu0 %v4240_v54 }
 0x87d   :  { %3407 = vmatpush1.bf16.msra.mxu0 %v4265_v43 }
 0x87e   :  { %3409 = vmatprep.subr.bf16.mxu0 %v4267_v47 }
 0x881   :  { %3411 = vmatpush1.bf16.msra.mxu0 %v4289_v56 }
 0x882   :  { %3429 = vmatprep.subr.bf16.mxu0 %v4184_v52 }
 0x947   :  { %v897_v40 = vpop.f32.mrb[12].mxu0 }
 0x948   :  { %v898_v39 = vadd.f32 %v897_v40, %v4362_v55  ;;  %v899_v34 = vpop.f32.mrb[13].mxu0 }
 0x949   :  { %v900_v32 = vadd.f32 %v899_v34, %v4367_v63 }
 0x94a   :  { %v902_v13 = vadd.f32 %v898_v39, %v825_v60 }
 0x94c   :  { %v3132_v51 = vmul.f32 -1.442695, %v902_v13 }
 0x94e   :  { %3729 = vpow2.f32 %v3132_v51 }
 0x958   :  { %v3730_v49 = vpop.eup %3729 }
 0x959   :  { %v906_v44 = vadd.f32 1.0, %v3730_v49  ;;  %v929_v49 = vld [vmem:[#allocation2 + $0x10] sm:$0xc] }
 0x95b   :  { %3731 = vrcp.f32 %v906_v44 }
 0x965   :  { %v3732_v33 = vpop.eup %3731 }
 0x966   :  { %v909_v46 = vmul.f32 %v3732_v33, %v900_v32 }
 0x968   :  { %v910_v53 = vadd.f32 %v909_v46, %v826_v42 }
 0x96a   :  { %3733 = vtanh.f32 %v910_v53 }
 0x974   :  { %v3734_v20 = vpop.eup %3733 }
 0x975   :  { %v913_v58 = vrot.slane %v3734_v20, 2 }
 0x977   :  { %v915_v45 = vsub.f32 %v820_v41, %v913_v58 }
 0x979   :  { %v917_v27 = vrot.slane %v915_v45, 6  ;;  %v930_v45 = vld [vmem:[#allocation2 + $0x18] sm:$0xc] }
 0x97b   :  { %918 = vrot.lane.b32.xlu1 %v917_v27, %s3835_s4 }
 0x9ed   :  { %v919_v6 = vpop.permute.xlu1 %918 }
 0x9ee   :  { %v921_v40 = vmul.f32 %v3732_v33, %v919_v6 }
 0x9f0   :  { %923 = vrot.lane.b32.xlu0 %v921_v40, %s3835_s4 }
 0xa62   :  { %v924_v39 = vpop.permute.xlu0 %923 }
 0xa63   :  { %v926_v60 = vadd.f32 %v3734_v20, %v924_v39 }
 0xa65   :  { %927 = vst.msk [vmem:[#allocation3 + $0xc] sm:$0x3] %vm486_vm13, %v926_v60  ;;  %3133 = vmatmul.mubr.msk.f32.vlgmr.msra.gmra.mrb[4].mxu1 %vm348_vm12, %v926_v60 }
 0xa66   :  { %928 = vst.msk [vmem:[#allocation3 + $0x1a] sm:$0x3] %vm488_vm14, %v926_v60  ;;  %3415 = vmatpush1.bf16.msra.mxu1 %v4204_v59  ;;  %1218 = vmatprep.mubr.f32.mxu1 %v4993_v57 }
 0xa67   :  { %3417 = vmatprep.subr.bf16.mxu1 %v4210_v62 }
 0xa6a   :  { %3419 = vmatpush1.bf16.msra.mxu1 %v4235_v50 }
 0xa6b   :  { %3421 = vmatprep.subr.bf16.mxu1 %v4240_v54 }
 0xa6e   :  { %3423 = vmatpush1.bf16.msra.mxu1 %v4265_v43 }
 0xa6f   :  { %3425 = vmatprep.subr.bf16.mxu1 %v4267_v47 }
 0xa72   :  { %3427 = vmatpush1.bf16.msra.mxu1 %v4289_v56 }
 0xa73   :  { %3445 = vmatprep.subr.bf16.mxu1 %v4184_v52 }
 0xb38   :  { %v1000_v41 = vpop.f32.mrb[4].mxu1 }
 0xb39   :  { %v1001_v34 = vadd.f32 %v1000_v41, %v4362_v55  ;;  %v1002_v13 = vpop.f32.mrb[5].mxu1 }
 0xb3a   :  { %v1003_v42 = vadd.f32 %v1002_v13, %v4367_v63 }
 0xb3b   :  { %v1006_v51 = vrot.slane %v1001_v34, 6 }
 0xb3c   :  { %v1016_v53 = vrot.slane %v1003_v42, 6  ;;  %v1038_v42 = vld [vmem:[#allocation2 + $0x10] sm:$0x30] }
 0xb3d   :  { %v1008_v44 = vadd.f32 %v1006_v51, %v929_v49 }
 0xb3f   :  { %v3134_v32 = vmul.f32 -1.442695, %v1008_v44 }
 0xb41   :  { %3735 = vpow2.f32 %v3134_v32 }
 0xb4b   :  { %v3736_v33 = vpop.eup %3735 }
 0xb4c   :  { %v1012_v46 = vadd.f32 1.0, %v3736_v33 }
 0xb4e   :  { %3737 = vrcp.f32 %v1012_v46 }
 0xb58   :  { %v3738_v20 = vpop.eup %3737 }
 0xb59   :  { %v1018_v58 = vmul.f32 %v3738_v20, %v1016_v53 }
 0xb5b   :  { %v1019_v27 = vadd.f32 %v1018_v58, %v930_v45 }
 0xb5d   :  { %3739 = vtanh.f32 %v1019_v27 }
 0xb67   :  { %v3740_v6 = vpop.eup %3739 }
 0xb68   :  { %v1022_v40 = vrot.slane %v3740_v6, 2 }
 0xb6a   :  { %v1024_v39 = vsub.f32 %v926_v60, %v1022_v40 }
 0xb6c   :  { %v1026_v41 = vrot.slane %v1024_v39, 6 }
 0xb6e   :  { %1027 = vrot.lane.b32.xlu1 %v1026_v41, %s3835_s4  ;;  %v1039_v41 = vld [vmem:[#allocation2 + $0x18] sm:$0x30] }
 0xbe0   :  { %v1028_v34 = vpop.permute.xlu1 %1027 }
 0xbe1   :  { %v1030_v51 = vmul.f32 %v3738_v20, %v1028_v34 }
 0xbe3   :  { %1032 = vrot.lane.b32.xlu0 %v1030_v51, %s3835_s4 }
 0xc55   :  { %v1033_v49 = vpop.permute.xlu0 %1032 }
 0xc56   :  { %v1035_v44 = vadd.f32 %v3740_v6, %v1033_v49 }
 0xc58   :  { %1036 = vst.msk [vmem:[#allocation3 + $0xc] sm:$0xc] %vm597_vm15, %v1035_v44  ;;  %v1041_v13 = vrot.slane %v1035_v44, 2 }
 0xc59   :  { %1037 = vst.msk [vmem:[#allocation3 + $0x16] sm:$0xc] %vm599_vm0, %v1035_v44 }
 0xc5a   :  { %3135 = vmatmul.mubr.msk.f32.vlgmr.msra.gmra.mrb[14].mxu0 %vm348_vm12, %v1041_v13 }
 0xc5b   :  { %3431 = vmatpush1.bf16.msra.mxu0 %v4204_v59  ;;  %1328 = vmatprep.mubr.f32.mxu0 %v4993_v57 }
 0xc5c   :  { %3433 = vmatprep.subr.bf16.mxu0 %v4210_v62 }
 0xc5f   :  { %3435 = vmatpush1.bf16.msra.mxu0 %v4235_v50 }
 0xc60   :  { %3437 = vmatprep.subr.bf16.mxu0 %v4240_v54 }
 0xc63   :  { %3439 = vmatpush1.bf16.msra.mxu0 %v4265_v43 }
 0xc64   :  { %3441 = vmatprep.subr.bf16.mxu0 %v4267_v47 }
 0xc67   :  { %3443 = vmatpush1.bf16.msra.mxu0 %v4289_v56 }
 0xc68   :  { %3461 = vmatprep.subr.bf16.mxu0 %v4184_v52 }
 0xd2d   :  { %v1110_v60 = vpop.f32.mrb[14].mxu0 }
 0xd2e   :  { %v1111_v32 = vadd.f32 %v1110_v60, %v4362_v55  ;;  %v1112_v33 = vpop.f32.mrb[15].mxu0 }
 0xd2f   :  { %v1113_v27 = vadd.f32 %v1112_v33, %v4367_v63 }
 0xd30   :  { %v1116_v46 = vrot.slane %v1111_v32, 4 }
 0xd31   :  { %v1126_v6 = vrot.slane %v1113_v27, 4  ;;  %v1148_v27 = vld [vmem:[#allocation2 + $0x10] sm:$0xc0] }
 0xd32   :  { %v1118_v53 = vadd.f32 %v1116_v46, %v1038_v42 }
 0xd34   :  { %v3136_v20 = vmul.f32 -1.442695, %v1118_v53 }
 0xd36   :  { %3741 = vpow2.f32 %v3136_v20 }
 0xd40   :  { %v3742_v58 = vpop.eup %3741 }
 0xd41   :  { %v1122_v45 = vadd.f32 1.0, %v3742_v58 }
 0xd43   :  { %3743 = vrcp.f32 %v1122_v45 }
 0xd4d   :  { %v3744_v40 = vpop.eup %3743 }
 0xd4e   :  { %v1128_v39 = vmul.f32 %v3744_v40, %v1126_v6 }
 0xd50   :  { %v1129_v34 = vadd.f32 %v1128_v39, %v1039_v41 }
 0xd52   :  { %3745 = vtanh.f32 %v1129_v34 }
 0xd5c   :  { %v3746_v51 = vpop.eup %3745 }
 0xd5d   :  { %v1132_v49 = vrot.slane %v3746_v51, 2 }
 0xd5f   :  { %v1134_v13 = vsub.f32 %v1035_v44, %v1132_v49 }
 0xd61   :  { %v1136_v60 = vrot.slane %v1134_v13, 6 }
 0xd63   :  { %1137 = vrot.lane.b32.xlu1 %v1136_v60, %s3835_s4  ;;  %v1149_v60 = vld [vmem:[#allocation2 + $0x18] sm:$0xc0] }
 0xdd5   :  { %v1138_v32 = vpop.permute.xlu1 %1137 }
 0xdd6   :  { %v1140_v46 = vmul.f32 %v3744_v40, %v1138_v32 }
 0xdd8   :  { %1142 = vrot.lane.b32.xlu0 %v1140_v46, %s3835_s4 }
 0xe4a   :  { %v1143_v42 = vpop.permute.xlu0 %1142 }
 0xe4b   :  { %v1145_v53 = vadd.f32 %v3746_v51, %v1143_v42 }
 0xe4d   :  { %1146 = vst.msk [vmem:[#allocation3 + $0xc] sm:$0x30] %vm709_vm1, %v1145_v53  ;;  %v1151_v33 = vrot.slane %v1145_v53, 4 }
 0xe4e   :  { %1147 = vst.msk [vmem:[#allocation3 + $0x12] sm:$0x30] %vm711_vm2, %v1145_v53 }
 0xe4f   :  { %3137 = vmatmul.mubr.msk.f32.vlgmr.msra.gmra.mrb[6].mxu1 %vm348_vm12, %v1151_v33 }
 0xe50   :  { %3447 = vmatpush1.bf16.msra.mxu1 %v4204_v59  ;;  %1431 = vmatprep.mubr.f32.mxu1 %v4993_v57 }
 0xe51   :  { %3449 = vmatprep.subr.bf16.mxu1 %v4210_v62 }
 0xe54   :  { %3451 = vmatpush1.bf16.msra.mxu1 %v4235_v50 }
 0xe55   :  { %3453 = vmatprep.subr.bf16.mxu1 %v4240_v54 }
 0xe58   :  { %3455 = vmatpush1.bf16.msra.mxu1 %v4265_v43 }
 0xe59   :  { %3457 = vmatprep.subr.bf16.mxu1 %v4267_v47 }
 0xe5c   :  { %3459 = vmatpush1.bf16.msra.mxu1 %v4289_v56 }
 0xe5d   :  { %3477 = vmatprep.subr.bf16.mxu1 %v4184_v52 }
 0xf22   :  { %v1220_v44 = vpop.f32.mrb[6].mxu1 }
 0xf23   :  { %v1221_v20 = vadd.f32 %v1220_v44, %v4362_v55  ;;  %v1222_v58 = vpop.f32.mrb[7].mxu1 }
 0xf24   :  { %v1223_v34 = vadd.f32 %v1222_v58, %v4367_v63 }
 0xf25   :  { %v1226_v45 = vrot.slane %v1221_v20, 2 }
 0xf26   :  { %v1236_v51 = vrot.slane %v1223_v34, 2 }
 0xf27   :  { %v1228_v6 = vadd.f32 %v1226_v45, %v1148_v27 }
 0xf29   :  { %v3138_v40 = vmul.f32 -1.442695, %v1228_v6 }
 0xf2b   :  { %3747 = vpow2.f32 %v3138_v40 }
 0xf35   :  { %v3748_v39 = vpop.eup %3747 }
 0xf36   :  { %v1232_v41 = vadd.f32 1.0, %v3748_v39 }
 0xf38   :  { %3749 = vrcp.f32 %v1232_v41  ;;  %v1258_v41 = vld [vmem:[#allocation2 + $0x20] sm:$0x3] }
 0xf42   :  { %v3750_v49 = vpop.eup %3749 }
 0xf43   :  { %v1238_v13 = vmul.f32 %v3750_v49, %v1236_v51 }
 0xf45   :  { %v1239_v32 = vadd.f32 %v1238_v13, %v1149_v60 }
 0xf47   :  { %3751 = vtanh.f32 %v1239_v32 }
 0xf51   :  { %v3752_v46 = vpop.eup %3751 }
 0xf52   :  { %v1242_v42 = vrot.slane %v3752_v46, 2 }
 0xf54   :  { %v1244_v33 = vsub.f32 %v1145_v53, %v1242_v42  ;;  %v1259_v42 = vld [vmem:[#allocation2 + $0x28] sm:$0x3] }
 0xf56   :  { %v1246_v44 = vrot.slane %v1244_v33, 6 }
 0xf58   :  { %1247 = vrot.lane.b32.xlu1 %v1246_v44, %s3835_s4 }
 0xfca   :  { %v1248_v20 = vpop.permute.xlu1 %1247 }
 0xfcb   :  { %v1250_v45 = vmul.f32 %v3750_v49, %v1248_v20 }
 0xfcd   :  { %1252 = vrot.lane.b32.xlu0 %v1250_v45, %s3835_s4 }
0x103f   :  { %v1253_v27 = vpop.permute.xlu0 %1252 }
0x1040   :  { %v1255_v6 = vadd.f32 %v3752_v46, %v1253_v27 }
0x1042   :  { %1256 = vst.msk [vmem:[#allocation3 + $0xc] sm:$0xc0] %vm821_vm3, %v1255_v6  ;;  %v1261_v58 = vrot.slane %v1255_v6, 6 }
0x1043   :  { %1257 = vst.msk [vmem:[#allocation3 + $0xe] sm:$0xc0] %vm823_vm4, %v1255_v6 }
0x1044   :  { %3139 = vmatmul.mubr.msk.f32.vlgmr.msra.gmra.mrb[16].mxu0 %vm348_vm12, %v1261_v58 }
0x1045   :  { %3463 = vmatpush1.bf16.msra.mxu0 %v4204_v59  ;;  %1541 = vmatprep.mubr.f32.mxu0 %v4993_v57 }
0x1046   :  { %3465 = vmatprep.subr.bf16.mxu0 %v4210_v62 }
0x1049   :  { %3467 = vmatpush1.bf16.msra.mxu0 %v4235_v50 }
0x104a   :  { %3469 = vmatprep.subr.bf16.mxu0 %v4240_v54 }
0x104d   :  { %3471 = vmatpush1.bf16.msra.mxu0 %v4265_v43 }
0x104e   :  { %3473 = vmatprep.subr.bf16.mxu0 %v4267_v47 }
0x1051   :  { %3475 = vmatpush1.bf16.msra.mxu0 %v4289_v56 }
0x1052   :  { %3493 = vmatprep.subr.bf16.mxu0 %v4184_v52 }
0x1117   :  { %v1330_v53 = vpop.f32.mrb[16].mxu0 }
0x1118   :  { %v1331_v40 = vadd.f32 %v1330_v53, %v4362_v55  ;;  %v1332_v39 = vpop.f32.mrb[17].mxu0 }
0x1119   :  { %v1333_v60 = vadd.f32 %v1332_v39, %v4367_v63 }
0x111a   :  { %v1335_v34 = vadd.f32 %v1331_v40, %v1258_v41 }
0x111c   :  { %v3140_v51 = vmul.f32 -1.442695, %v1335_v34 }
0x111e   :  { %3753 = vpow2.f32 %v3140_v51 }
0x1128   :  { %v3754_v49 = vpop.eup %3753 }
0x1129   :  { %v1339_v13 = vadd.f32 1.0, %v3754_v49  ;;  %v1362_v49 = vld [vmem:[#allocation2 + $0x20] sm:$0xc] }
0x112b   :  { %3755 = vrcp.f32 %v1339_v13 }
0x1135   :  { %v3756_v32 = vpop.eup %3755 }
0x1136   :  { %v1342_v46 = vmul.f32 %v3756_v32, %v1333_v60 }
0x1138   :  { %v1343_v33 = vadd.f32 %v1342_v46, %v1259_v42 }
0x113a   :  { %3757 = vtanh.f32 %v1343_v33 }
0x1144   :  { %v3758_v44 = vpop.eup %3757 }
0x1145   :  { %v1346_v20 = vrot.slane %v3758_v44, 2 }
0x1147   :  { %v1348_v45 = vsub.f32 %v1255_v6, %v1346_v20 }
0x1149   :  { %v1350_v27 = vrot.slane %v1348_v45, 6  ;;  %v1363_v45 = vld [vmem:[#allocation2 + $0x28] sm:$0xc] }
0x114b   :  { %1351 = vrot.lane.b32.xlu1 %v1350_v27, %s3835_s4 }
0x11bd   :  { %v1352_v58 = vpop.permute.xlu1 %1351 }
0x11be   :  { %v1354_v53 = vmul.f32 %v3756_v32, %v1352_v58 }
0x11c0   :  { %1356 = vrot.lane.b32.xlu0 %v1354_v53, %s3835_s4 }
0x1232   :  { %v1357_v40 = vpop.permute.xlu0 %1356 }
0x1233   :  { %v1359_v41 = vadd.f32 %v3758_v44, %v1357_v40 }
0x1235   :  { %1360 = vst.msk [vmem:[#allocation3 + $0x14] sm:$0x3] %vm486_vm13, %v1359_v41  ;;  %3141 = vmatmul.mubr.msk.f32.vlgmr.msra.gmra.mrb[8].mxu1 %vm348_vm12, %v1359_v41 }
0x1236   :  { %1361 = vst.msk [vmem:[#allocation3 + $0x12] sm:$0x3] %vm488_vm14, %v1359_v41  ;;  %3479 = vmatpush1.bf16.msra.mxu1 %v4204_v59  ;;  %1651 = vmatprep.mubr.f32.mxu1 %v4993_v57 }
0x1237   :  { %3481 = vmatprep.subr.bf16.mxu1 %v4210_v62 }
0x123a   :  { %3483 = vmatpush1.bf16.msra.mxu1 %v4235_v50 }
0x123b   :  { %3485 = vmatprep.subr.bf16.mxu1 %v4240_v54 }
0x123e   :  { %3487 = vmatpush1.bf16.msra.mxu1 %v4265_v43 }
0x123f   :  { %3489 = vmatprep.subr.bf16.mxu1 %v4267_v47 }
0x1242   :  { %3491 = vmatpush1.bf16.msra.mxu1 %v4289_v56 }
0x1243   :  { %3509 = vmatprep.subr.bf16.mxu1 %v4184_v52 }
0x1308   :  { %v1433_v6 = vpop.f32.mrb[8].mxu1 }
0x1309   :  { %v1434_v39 = vadd.f32 %v1433_v6, %v4362_v55  ;;  %v1435_v34 = vpop.f32.mrb[9].mxu1 }
0x130a   :  { %v1436_v42 = vadd.f32 %v1435_v34, %v4367_v63 }
0x130b   :  { %v1439_v51 = vrot.slane %v1434_v39, 6 }
0x130c   :  { %v1449_v33 = vrot.slane %v1436_v42, 6  ;;  %v1471_v42 = vld [vmem:[#allocation2 + $0x20] sm:$0x30] }
0x130d   :  { %v1441_v13 = vadd.f32 %v1439_v51, %v1362_v49 }
0x130f   :  { %v3142_v60 = vmul.f32 -1.442695, %v1441_v13 }
0x1311   :  { %3759 = vpow2.f32 %v3142_v60 }
0x131b   :  { %v3760_v32 = vpop.eup %3759 }
0x131c   :  { %v1445_v46 = vadd.f32 1.0, %v3760_v32 }
0x131e   :  { %3761 = vrcp.f32 %v1445_v46 }
0x1328   :  { %v3762_v44 = vpop.eup %3761 }
0x1329   :  { %v1451_v20 = vmul.f32 %v3762_v44, %v1449_v33 }
0x132b   :  { %v1452_v27 = vadd.f32 %v1451_v20, %v1363_v45 }
0x132d   :  { %3763 = vtanh.f32 %v1452_v27 }
0x1337   :  { %v3764_v58 = vpop.eup %3763 }
0x1338   :  { %v1455_v53 = vrot.slane %v3764_v58, 2 }
0x133a   :  { %v1457_v40 = vsub.f32 %v1359_v41, %v1455_v53 }
0x133c   :  { %v1459_v6 = vrot.slane %v1457_v40, 6 }
0x133e   :  { %1460 = vrot.lane.b32.xlu1 %v1459_v6, %s3835_s4  ;;  %v1472_v6 = vld [vmem:[#allocation2 + $0x28] sm:$0x30] }
0x13b0   :  { %v1461_v39 = vpop.permute.xlu1 %1460 }
0x13b1   :  { %v1463_v51 = vmul.f32 %v3762_v44, %v1461_v39 }
0x13b3   :  { %1465 = vrot.lane.b32.xlu0 %v1463_v51, %s3835_s4 }
0x1425   :  { %v1466_v49 = vpop.permute.xlu0 %1465 }
0x1426   :  { %v1468_v13 = vadd.f32 %v3764_v58, %v1466_v49 }
0x1428   :  { %1469 = vst.msk [vmem:[#allocation3 + $0x14] sm:$0xc] %vm597_vm15, %v1468_v13  ;;  %v1474_v34 = vrot.slane %v1468_v13, 2 }
0x1429   :  { %1470 = vst.msk [vmem:[#allocation3 + $0xe] sm:$0xc] %vm599_vm0, %v1468_v13 }
0x142a   :  { %3143 = vmatmul.mubr.msk.f32.vlgmr.msra.gmra.mrb[18].mxu0 %vm348_vm12, %v1474_v34 }
0x142b   :  { %3495 = vmatpush1.bf16.msra.mxu0 %v4204_v59  ;;  %1761 = vmatprep.mubr.f32.mxu0 %v4993_v57 }
0x142c   :  { %3497 = vmatprep.subr.bf16.mxu0 %v4210_v62 }
0x142f   :  { %3499 = vmatpush1.bf16.msra.mxu0 %v4235_v50 }
0x1430   :  { %3501 = vmatprep.subr.bf16.mxu0 %v4240_v54 }
0x1433   :  { %3503 = vmatpush1.bf16.msra.mxu0 %v4265_v43 }
0x1434   :  { %3505 = vmatprep.subr.bf16.mxu0 %v4267_v47 }
0x1437   :  { %3507 = vmatpush1.bf16.msra.mxu0 %v4289_v56 }
0x1438   :  { %3525 = vmatprep.subr.bf16.mxu0 %v4184_v52 }
0x14fd   :  { %v1543_v41 = vpop.f32.mrb[18].mxu0 }
0x14fe   :  { %v1544_v60 = vadd.f32 %v1543_v41, %v4362_v55  ;;  %v1545_v32 = vpop.f32.mrb[19].mxu0 }
0x14ff   :  { %v1546_v27 = vadd.f32 %v1545_v32, %v4367_v63 }
0x1500   :  { %v1549_v46 = vrot.slane %v1544_v60, 4 }
0x1501   :  { %v1559_v58 = vrot.slane %v1546_v27, 4  ;;  %v1581_v27 = vld [vmem:[#allocation2 + $0x20] sm:$0xc0] }
0x1502   :  { %v1551_v33 = vadd.f32 %v1549_v46, %v1471_v42 }
0x1504   :  { %v3144_v44 = vmul.f32 -1.442695, %v1551_v33 }
0x1506   :  { %3765 = vpow2.f32 %v3144_v44 }
0x1510   :  { %v3766_v20 = vpop.eup %3765 }
0x1511   :  { %v1555_v45 = vadd.f32 1.0, %v3766_v20 }
0x1513   :  { %3767 = vrcp.f32 %v1555_v45 }
0x151d   :  { %v3768_v53 = vpop.eup %3767 }
0x151e   :  { %v1561_v40 = vmul.f32 %v3768_v53, %v1559_v58 }
0x1520   :  { %v1562_v39 = vadd.f32 %v1561_v40, %v1472_v6 }
0x1522   :  { %3769 = vtanh.f32 %v1562_v39 }
0x152c   :  { %v3770_v51 = vpop.eup %3769 }
0x152d   :  { %v1565_v49 = vrot.slane %v3770_v51, 2 }
0x152f   :  { %v1567_v34 = vsub.f32 %v1468_v13, %v1565_v49 }
0x1531   :  { %v1569_v41 = vrot.slane %v1567_v34, 6 }
0x1533   :  { %1570 = vrot.lane.b32.xlu1 %v1569_v41, %s3835_s4  ;;  %v1582_v41 = vld [vmem:[#allocation2 + $0x28] sm:$0xc0] }
0x15a5   :  { %v1571_v60 = vpop.permute.xlu1 %1570 }
0x15a6   :  { %v1573_v46 = vmul.f32 %v3768_v53, %v1571_v60 }
0x15a8   :  { %1575 = vrot.lane.b32.xlu0 %v1573_v46, %s3835_s4 }
0x161a   :  { %v1576_v42 = vpop.permute.xlu0 %1575 }
0x161b   :  { %v1578_v33 = vadd.f32 %v3770_v51, %v1576_v42 }
0x161d   :  { %1579 = vst.msk [vmem:[#allocation3 + $0x14] sm:$0x30] %vm709_vm1, %v1578_v33  ;;  %v1584_v32 = vrot.slane %v1578_v33, 4 }
0x161e   :  { %1580 = vst.msk [vmem:[#allocation3 + $0xa] sm:$0x30] %vm711_vm2, %v1578_v33 }
0x161f   :  { %3145 = vmatmul.mubr.msk.f32.vlgmr.msra.gmra.mrb[10].mxu1 %vm348_vm12, %v1584_v32 }
0x1620   :  { %3511 = vmatpush1.bf16.msra.mxu1 %v4204_v59  ;;  %1864 = vmatprep.mubr.f32.mxu1 %v4993_v57 }
0x1621   :  { %3513 = vmatprep.subr.bf16.mxu1 %v4210_v62 }
0x1624   :  { %3515 = vmatpush1.bf16.msra.mxu1 %v4235_v50 }
0x1625   :  { %3517 = vmatprep.subr.bf16.mxu1 %v4240_v54 }
0x1628   :  { %3519 = vmatpush1.bf16.msra.mxu1 %v4265_v43 }
0x1629   :  { %3521 = vmatprep.subr.bf16.mxu1 %v4267_v47 }
0x162c   :  { %3523 = vmatpush1.bf16.msra.mxu1 %v4289_v56 }
0x162d   :  { %3541 = vmatprep.subr.bf16.mxu1 %v4184_v52 }
0x16f2   :  { %v1653_v13 = vpop.f32.mrb[10].mxu1 }
0x16f3   :  { %v1654_v44 = vadd.f32 %v1653_v13, %v4362_v55  ;;  %v1655_v20 = vpop.f32.mrb[11].mxu1 }
0x16f4   :  { %v1656_v39 = vadd.f32 %v1655_v20, %v4367_v63 }
0x16f5   :  { %v1659_v45 = vrot.slane %v1654_v44, 2 }
0x16f6   :  { %v1669_v51 = vrot.slane %v1656_v39, 2 }
0x16f7   :  { %v1661_v58 = vadd.f32 %v1659_v45, %v1581_v27 }
0x16f9   :  { %v3146_v53 = vmul.f32 -1.442695, %v1661_v58 }
0x16fb   :  { %3771 = vpow2.f32 %v3146_v53 }
0x1705   :  { %v3772_v40 = vpop.eup %3771 }
0x1706   :  { %v1665_v6 = vadd.f32 1.0, %v3772_v40  ;;  %v1691_v40 = vld [vmem:[#allocation2 + $0x30] sm:$0x3] }
0x1708   :  { %3773 = vrcp.f32 %v1665_v6 }
0x1712   :  { %v3774_v49 = vpop.eup %3773 }
0x1713   :  { %v1671_v34 = vmul.f32 %v3774_v49, %v1669_v51 }
0x1715   :  { %v1672_v60 = vadd.f32 %v1671_v34, %v1582_v41 }
0x1717   :  { %3775 = vtanh.f32 %v1672_v60 }
0x1721   :  { %v3776_v52 = vpop.eup %3775 }
0x1722   :  { %v1675_v46 = vrot.slane %v3776_v52, 2 }
0x1724   :  { %v1677_v42 = vsub.f32 %v1578_v33, %v1675_v46 }
0x1726   :  { %v1679_v32 = vrot.slane %v1677_v42, 6 }
0x1728   :  { %1680 = vrot.lane.b32.xlu1 %v1679_v32, %s3835_s4 }
0x179a   :  { %v1681_v13 = vpop.permute.xlu1 %1680 }
0x179b   :  { %v1683_v44 = vmul.f32 %v3774_v49, %v1681_v13 }
0x179d   :  { %1685 = vrot.lane.b32.xlu0 %v1683_v44, %s3835_s4 }
0x180f   :  { %v1686_v45 = vpop.permute.xlu0 %1685 }
0x1810   :  { %v1688_v27 = vadd.f32 %v3776_v52, %v1686_v45  ;;  %v1692_v52 = vld [vmem:[#allocation2 + $0x38] sm:$0x3] }
0x1812   :  { %1689 = vst.msk [vmem:[#allocation3 + $0x14] sm:$0xc0] %vm821_vm3, %v1688_v27  ;;  %v1694_v20 = vrot.slane %v1688_v27, 6 }
0x1813   :  { %1690 = vst.msk [vmem:[#allocation3 + $0x6] sm:$0xc0] %vm823_vm4, %v1688_v27 }
0x1814   :  { %3147 = vmatmul.mubr.msk.f32.vlgmr.msra.gmra.mrb[20].mxu0 %vm348_vm12, %v1694_v20 }
0x1815   :  { %3527 = vmatpush1.bf16.msra.mxu0 %v4204_v59  ;;  %1974 = vmatprep.mubr.f32.mxu0 %v4993_v57 }
0x1816   :  { %3529 = vmatprep.subr.bf16.mxu0 %v4210_v62 }
0x1819   :  { %3531 = vmatpush1.bf16.msra.mxu0 %v4235_v50 }
0x181a   :  { %3533 = vmatprep.subr.bf16.mxu0 %v4240_v54 }
0x181d   :  { %3535 = vmatpush1.bf16.msra.mxu0 %v4265_v43 }
0x181e   :  { %3537 = vmatprep.subr.bf16.mxu0 %v4267_v47 }
0x1821   :  { %3539 = vmatpush1.bf16.msra.mxu0 %v4289_v56 }
0x18e7   :  { %v1763_v33 = vpop.f32.mrb[20].mxu0 }
0x18e8   :  { %v1764_v58 = vadd.f32 %v1763_v33, %v4362_v55  ;;  %v1765_v53 = vpop.f32.mrb[21].mxu0 }
0x18e9   :  { %v1766_v34 = vadd.f32 %v1765_v53, %v4367_v63 }
0x18ea   :  { %v1768_v6 = vadd.f32 %v1764_v58, %v1691_v40 }
0x18ec   :  { %v3148_v39 = vmul.f32 -1.442695, %v1768_v6 }
0x18ee   :  { %3777 = vpow2.f32 %v3148_v39 }
0x18f8   :  { %v3778_v51 = vpop.eup %3777 }
0x18f9   :  { %v1772_v49 = vadd.f32 1.0, %v3778_v51 }
0x18fb   :  { %3779 = vrcp.f32 %v1772_v49 }
0x1905   :  { %v3780_v41 = vpop.eup %3779 }
0x1906   :  { %v1775_v60 = vmul.f32 %v3780_v41, %v1766_v34 }
0x1908   :  { %v1776_v46 = vadd.f32 %v1775_v60, %v1692_v52 }
0x190a   :  { %3781 = vtanh.f32 %v1776_v46 }
0x1914   :  { %v3782_v42 = vpop.eup %3781 }
0x1915   :  { %v1779_v32 = vrot.slane %v3782_v42, 2 }
0x1917   :  { %v1781_v13 = vsub.f32 %v1688_v27, %v1779_v32 }
0x1919   :  { %v1783_v44 = vrot.slane %v1781_v13, 6 }
0x191b   :  { %1784 = vrot.lane.b32.xlu1 %v1783_v44, %s3835_s4 }
0x198d   :  { %v1785_v45 = vpop.permute.xlu1 %1784 }
0x198e   :  { %v1787_v20 = vmul.f32 %v3780_v41, %v1785_v45 }
0x1990   :  { %1789 = vrot.lane.b32.xlu0 %v1787_v20, %s3835_s4 }
0x1a02   :  { %v1790_v33 = vpop.permute.xlu0 %1789 }
0x1a03   :  { %v1792_v58 = vadd.f32 %v3782_v42, %v1790_v33 }
0x1a05   :  { %1793 = vst.msk [vmem:[#allocation3 + $0x1c] sm:$0x3] %vm486_vm13, %v1792_v58  ;;  %3149 = vmatmul.mubr.msk.f32.vlgmr.msra.gmra.mrb[12].mxu1 %vm348_vm12, %v1792_v58  ;;  %vm2345_vm13 = vcmp.lt.s32.totalorder %v4300_v48, 32 }
0x1a06   :  { %1794 = vst.msk [vmem:[#allocation3 + $0xa] sm:$0x3] %vm488_vm14, %v1792_v58  ;;  %3543 = vmatpush1.bf16.msra.mxu1 %v4204_v59  ;;  %2084 = vmatprep.mubr.f32.mxu1 %v4993_v57  ;;  %v1795_v59 = vld [vmem:[#allocation2 + $0x30] sm:$0xc] }
0x1a07   :  { %3545 = vmatprep.subr.bf16.mxu1 %v4210_v62 }
0x1a0a   :  { %3547 = vmatpush1.bf16.msra.mxu1 %v4235_v50 }
0x1a0b   :  { %3549 = vmatprep.subr.bf16.mxu1 %v4240_v54 }
0x1a0e   :  { %3551 = vmatpush1.bf16.msra.mxu1 %v4265_v43 }
0x1a0f   :  { %3553 = vmatprep.subr.bf16.mxu1 %v4267_v47  ;;  %v1796_v47 = vld [vmem:[#allocation2 + $0x38] sm:$0xc] }
0x1a12   :  { %3555 = vmatpush1.bf16.msra.mxu1 %v4289_v56 }
0x1ad8   :  { %v1866_v27 = vpop.f32.mrb[12].mxu1 }
0x1ad9   :  { %v1867_v53 = vadd.f32 %v1866_v27, %v4362_v55  ;;  %v1868_v40 = vpop.f32.mrb[13].mxu1 }
0x1ada   :  { %v1869_v50 = vadd.f32 %v1868_v40, %v4367_v63 }
0x1adb   :  { %v1872_v6 = vrot.slane %v1867_v53, 6  ;;  %v1904_v53 = vld [vmem:[#allocation2 + $0x30] sm:$0x30] }
0x1adc   :  { %v1882_v54 = vrot.slane %v1869_v50, 6 }
0x1add   :  { %v1874_v39 = vadd.f32 %v1872_v6, %v1795_v59 }
0x1adf   :  { %v3150_v51 = vmul.f32 -1.442695, %v1874_v39 }
0x1ae1   :  { %3783 = vpow2.f32 %v3150_v51 }
0x1aeb   :  { %v3784_v62 = vpop.eup %3783 }
0x1aec   :  { %v1878_v49 = vadd.f32 1.0, %v3784_v62 }
0x1aee   :  { %3785 = vrcp.f32 %v1878_v49 }
0x1af8   :  { %v3786_v43 = vpop.eup %3785 }
0x1af9   :  { %v1884_v34 = vmul.f32 %v3786_v43, %v1882_v54  ;;  %v1905_v54 = vld [vmem:[#allocation2 + $0x38] sm:$0x30] }
0x1afb   :  { %v1885_v41 = vadd.f32 %v1884_v34, %v1796_v47 }
0x1afd   :  { %3787 = vtanh.f32 %v1885_v41 }
0x1b07   :  { %v3788_v56 = vpop.eup %3787 }
0x1b08   :  { %v1888_v60 = vrot.slane %v3788_v56, 2 }
0x1b0a   :  { %v1890_v52 = vsub.f32 %v1792_v58, %v1888_v60 }
0x1b0c   :  { %v1892_v46 = vrot.slane %v1890_v52, 6 }
0x1b0e   :  { %1893 = vrot.lane.b32.xlu1 %v1892_v46, %s3835_s4 }
0x1b80   :  { %v1894_v42 = vpop.permute.xlu1 %1893 }
0x1b81   :  { %v1896_v32 = vmul.f32 %v3786_v43, %v1894_v42 }
0x1b83   :  { %1898 = vrot.lane.b32.xlu0 %v1896_v32, %s3835_s4 }
0x1bf5   :  { %v1899_v13 = vpop.permute.xlu0 %1898 }
0x1bf6   :  { %v1901_v44 = vadd.f32 %v3788_v56, %v1899_v13 }
0x1bf8   :  { %1902 = vst.msk [vmem:[#allocation3 + $0x1c] sm:$0xc] %vm597_vm15, %v1901_v44  ;;  %v1907_v45 = vrot.slane %v1901_v44, 2 }
0x1bf9   :  { %1903 = vst.msk [vmem:[#allocation3 + $0x6] sm:$0xc] %vm599_vm0, %v1901_v44 }
0x1bfa   :  { %3151 = vmatmul.mubr.msk.f32.vlgmr.msra.gmra.mrb[22].mxu0 %vm348_vm12, %v1907_v45 }
0x1ccd   :  { %v1976_v20 = vpop.f32.mrb[22].mxu0 }
0x1cce   :  { %v1977_v33 = vadd.f32 %v1976_v20, %v4362_v55  ;;  %v1978_v58 = vpop.f32.mrb[23].mxu0 }
0x1ccf   :  { %v1979_v51 = vadd.f32 %v1978_v58, %v4367_v63 }
0x1cd0   :  { %v1982_v27 = vrot.slane %v1977_v33, 4  ;;  %v2014_v33 = vld [vmem:[#allocation2 + $0x30] sm:$0xc0] }
0x1cd1   :  { %v1992_v62 = vrot.slane %v1979_v51, 4 }
0x1cd2   :  { %v1984_v40 = vadd.f32 %v1982_v27, %v1904_v53 }
0x1cd4   :  { %v3152_v6 = vmul.f32 -1.442695, %v1984_v40 }
0x1cd6   :  { %3789 = vpow2.f32 %v3152_v6 }
0x1ce0   :  { %v3790_v59 = vpop.eup %3789 }
0x1ce1   :  { %v1988_v39 = vadd.f32 1.0, %v3790_v59 }
0x1ce3   :  { %3791 = vrcp.f32 %v1988_v39 }
0x1ced   :  { %v3792_v49 = vpop.eup %3791 }
0x1cee   :  { %v1994_v50 = vmul.f32 %v3792_v49, %v1992_v62  ;;  %v2015_v62 = vld [vmem:[#allocation2 + $0x38] sm:$0xc0] }
0x1cf0   :  { %v1995_v43 = vadd.f32 %v1994_v50, %v1905_v54 }
0x1cf2   :  { %3793 = vtanh.f32 %v1995_v43 }
0x1cfc   :  { %v3794_v34 = vpop.eup %3793 }
0x1cfd   :  { %v1998_v47 = vrot.slane %v3794_v34, 2 }
0x1cff   :  { %v2000_v41 = vsub.f32 %v1901_v44, %v1998_v47 }
0x1d01   :  { %v2002_v56 = vrot.slane %v2000_v41, 6  ;;  %v2130_v41 = vld [vmem:[#allocation3 + $0xa] sm:$0xff] }
0x1d03   :  { %2003 = vrot.lane.b32.xlu1 %v2002_v56, %s3835_s4 }
0x1d75   :  { %v2004_v60 = vpop.permute.xlu1 %2003 }
0x1d76   :  { %v2006_v52 = vmul.f32 %v3792_v49, %v2004_v60  ;;  %v2210_v60 = vld [vmem:[%s4971_s5 + $0x80] sm:$0xff] }
0x1d78   :  { %2008 = vrot.lane.b32.xlu0 %v2006_v52, %s3835_s4  ;;  %v2211_v52 = vld [vmem:[%s4971_s5 + $0x88] sm:$0xff] }
0x1dea   :  { %v2009_v46 = vpop.permute.xlu0 %2008 }
0x1deb   :  { %v2011_v42 = vadd.f32 %v3794_v34, %v2009_v46  ;;  %v2194_v46 = vld [vmem:[%s4971_s5] sm:$0xff] }
0x1ded   :  { %2012 = vst.msk [vmem:[#allocation3 + $0x1c] sm:$0x30] %vm709_vm1, %v2011_v42  ;;  %v2017_v32 = vrot.slane %v2011_v42, 4 }
0x1dee   :  { %2013 = vst.msk [vmem:[#allocation3 + $0x2] sm:$0x30] %vm711_vm2, %v2011_v42 }
0x1def   :  { %3153 = vmatmul.mubr.msk.f32.vlgmr.msra.gmra.mrb[14].mxu1 %vm348_vm12, %v2017_v32  ;;  %v2195_v32 = vld [vmem:[%s4971_s5 + $0x8] sm:$0xff] }
0x1df0   :  { %2640 = vmatprep.mubr.f32.mxu1 %v4993_v57 }
0x1ec2   :  { %v2086_v13 = vpop.f32.mrb[14].mxu1 }
0x1ec3   :  { %v2087_v45 = vadd.f32 %v2086_v13, %v4362_v55  ;;  %v2088_v44 = vpop.f32.mrb[15].mxu1  ;;  %v2212_v13 = vld [vmem:[%s4971_s5 + $0x90] sm:$0xff] }
0x1ec4   :  { %v2089_v6 = vadd.f32 %v2088_v44, %v4367_v63  ;;  %v2140_v63 = vld [vmem:[#allocation3 + $0xe] sm:$0xff]  ;;  %v3558_v44 = vpack.c.bf16 %v2195_v32, %v2194_v46  ;;  %v2221_v46 = vld [vmem:[%s4971_s5 + $0xd8] sm:$0xff] }
0x1ec5   :  { %v2092_v20 = vrot.slane %v2087_v45, 2  ;;  %v3685_v56 = vpack.i.bf16 %v2130_v41, %v2140_v63  ;;  %v2213_v45 = vld [vmem:[%s4971_s5 + $0x98] sm:$0xff] }
0x1ec6   :  { %v2102_v59 = vrot.slane %v2089_v6, 2 }
0x1ec7   :  { %v2094_v58 = vadd.f32 %v2092_v20, %v2014_v33  ;;  %v3560_v20 = vpack.c.bf16 %v2213_v45, %v2212_v13  ;;  %v2196_v33 = vld [vmem:[%s4971_s5 + $0x10] sm:$0xff]  ;;  %v2205_v45 = vld [vmem:[%s4971_s5 + $0x58] sm:$0xff] }
0x1ec8   :  { %v2204_v13 = vld [vmem:[%s4971_s5 + $0x50] sm:$0xff] }
0x1ec9   :  { %v3154_v27 = vmul.f32 -1.442695, %v2094_v58  ;;  %v2197_v58 = vld [vmem:[%s4971_s5 + $0x18] sm:$0xff] }
0x1ecb   :  { %3795 = vpow2.f32 %v3154_v27  ;;  %v2214_v27 = vld [vmem:[%s4971_s5 + $0xa0] sm:$0xff] }
0x1ed5   :  { %v3796_v53 = vpop.eup %3795 }
0x1ed6   :  { %v2098_v40 = vadd.f32 1.0, %v3796_v53  ;;  %v2215_v53 = vld [vmem:[%s4971_s5 + $0xa8] sm:$0xff] }
0x1ed7   :  { %v3564_v6 = vpack.c.bf16 %v2215_v53, %v2214_v27  ;;  %v2206_v27 = vld [vmem:[%s4971_s5 + $0x60] sm:$0xff]  ;;  %v2207_v53 = vld [vmem:[%s4971_s5 + $0x68] sm:$0xff] }
0x1ed8   :  { %3797 = vrcp.f32 %v2098_v40  ;;  %v3562_v40 = vpack.c.bf16 %v2197_v58, %v2196_v33  ;;  %v3578_v33 = vpack.c.bf16 %v2205_v45, %v2204_v13 }
0x1ee2   :  { %v3798_v39 = vpop.eup %3797 }
0x1ee3   :  { %v2104_v51 = vmul.f32 %v3798_v39, %v2102_v59  ;;  %v2198_v59 = vld [vmem:[%s4971_s5 + $0x20] sm:$0xff] }
0x1ee5   :  { %v2105_v49 = vadd.f32 %v2104_v51, %v2015_v62  ;;  %v2216_v51 = vld [vmem:[%s4971_s5 + $0xb0] sm:$0xff]  ;;  %v2217_v62 = vld [vmem:[%s4971_s5 + $0xb8] sm:$0xff] }
0x1ee7   :  { %3799 = vtanh.f32 %v2105_v49 }
0x1ef1   :  { %v4590_v50 = vpop.eup %3799 }
0x1ef2   :  { %v2108_v55 = vrot.slane %v4590_v50, 2 }
0x1ef4   :  { %v2110_v54 = vsub.f32 %v2011_v42, %v2108_v55  ;;  %v3556_v42 = vpack.c.bf16 %v2211_v52, %v2210_v60  ;;  %v3568_v55 = vpack.c.bf16 %v2217_v62, %v2216_v51  ;;  %v2203_v60 = vld [vmem:[%s4971_s5 + $0x48] sm:$0xff]  ;;  %v2220_v52 = vld [vmem:[%s4971_s5 + $0xd0] sm:$0xff] }
0x1ef5   :  { %v3576_v32 = vpack.c.bf16 %v2221_v46, %v2220_v52  ;;  %v2208_v62 = vld [vmem:[%s4971_s5 + $0x70] sm:$0xff] }
0x1ef6   :  { %v2112_v43 = vrot.slane %v2110_v54, 6  ;;  %3557 = vmatprep.subr.bf16.mxu0 %v3556_v42  ;;  %v2200_v54 = vld [vmem:[%s4971_s5 + $0x30] sm:$0xff] }
0x1ef7   :  { %3559 = vmatpush3.bf16.msra.mxu0 %v3558_v44  ;;  %v2222_v44 = vld [vmem:[%s4971_s5 + $0xe0] sm:$0xff]  ;;  %v2131_v52 = vld [vmem:[#allocation3 + $0x12] sm:$0xff] }
0x1ef8   :  { %2113 = vrot.lane.b32.xlu1 %v2112_v43, %s3835_s4  ;;  %3561 = vmatprep.subr.bf16.mxu0 %v3560_v20  ;;  %v2201_v43 = vld [vmem:[%s4971_s5 + $0x38] sm:$0xff]  ;;  %v2223_v20 = vld [vmem:[%s4971_s5 + $0xe8] sm:$0xff] }
0x1ef9   :  { %v3570_v41 = vpack.c.bf16 %v2201_v43, %v2200_v54  ;;  %v3580_v58 = vpack.c.bf16 %v2223_v20, %v2222_v44  ;;  %v2139_v43 = vld [vmem:[#allocation3 + $0x6] sm:$0xff] }
0x1efb   :  { %3563 = vmatpush3.bf16.msra.mxu0 %v3562_v40  ;;  %v3582_v40 = vpack.c.bf16 %v2207_v53, %v2206_v27 }
0x1efc   :  { %3565 = vmatprep.subr.bf16.mxu0 %v3564_v6  ;;  %v2224_v6 = vld [vmem:[%s4971_s5 + $0xf0] sm:$0xff] }
0x1f6a   :  { %v2114_v34 = vpop.permute.xlu1 %2113 }
0x1f6b   :  { %v2116_v47 = vmul.f32 %v3798_v39, %v2114_v34  ;;  %v2199_v39 = vld [vmem:[%s4971_s5 + $0x28] sm:$0xff]  ;;  %v2218_v34 = vld [vmem:[%s4971_s5 + $0xc0] sm:$0xff] }
0x1f6c   :  { %v3566_v49 = vpack.c.bf16 %v2199_v39, %v2198_v59  ;;  %v2225_v59 = vld [vmem:[%s4971_s5 + $0xf8] sm:$0xff] }
0x1f6d   :  { %2118 = vrot.lane.b32.xlu0 %v2116_v47, %s3835_s4  ;;  %v2219_v47 = vld [vmem:[%s4971_s5 + $0xc8] sm:$0xff]  ;;  %v3584_v51 = vpack.c.bf16 %v2225_v59, %v2224_v6 }
0x1f6e   :  { %3567 = vmatpush3.bf16.msra.mxu0 %v3566_v49  ;;  %v3572_v63 = vpack.c.bf16 %v2219_v47, %v2218_v34  ;;  %v2209_v49 = vld [vmem:[%s4971_s5 + $0x78] sm:$0xff] }
0x1f6f   :  { %3569 = vmatprep.subr.bf16.mxu0 %v3568_v55  ;;  %v3586_v54 = vpack.c.bf16 %v2209_v49, %v2208_v62  ;;  %v2132_v47 = vld [vmem:[#allocation3 + $0x1a] sm:$0xff] }
0x1f71   :  { %3686 = vrot.lane.b32.xlu0 %v3685_v56, %s3835_s4  ;;  %v2202_v56 = vld [vmem:[%s4971_s5 + $0x40] sm:$0xff] }
0x1f72   :  { %3571 = vmatpush3.bf16.msra.mxu0 %v3570_v41  ;;  %v3574_v42 = vpack.c.bf16 %v2203_v60, %v2202_v56  ;;  %v2141_v60 = vld [vmem:[#allocation3 + $0x16] sm:$0xff] }
0x1f73   :  { %3573 = vmatprep.subr.bf16.mxu0 %v3572_v63 }
0x1f76   :  { %3575 = vmatpush3.bf16.msra.mxu0 %v3574_v42  ;;  %v2143_v42 = vld [vmem:[#allocation3 + $0x26] sm:$0x3] }
0x1f77   :  { %3577 = vmatprep.subr.bf16.mxu0 %v3576_v32 }
0x1f7a   :  { %3579 = vmatpush3.bf16.msra.mxu0 %v3578_v33 }
0x1f7b   :  { %3581 = vmatprep.subr.bf16.mxu0 %v3580_v58 }
0x1f7e   :  { %3583 = vmatpush3.bf16.msra.mxu0 %v3582_v40 }
0x1f7f   :  { %3585 = vmatprep.subr.bf16.mxu0 %v3584_v51 }
0x1f82   :  { %3587 = vmatpush3.bf16.msra.mxu0 %v3586_v54 }
0x1fdf   :  { %v2119_v39 = vpop.permute.xlu0 %2118 }
0x1fe0   :  { %v2121_v55 = vadd.f32 %v4590_v50, %v2119_v39  ;;  %v3690_v50 = vpack.i.bf16 %v2131_v52, %v2141_v60  ;;  %v2135_v39 = vld [vmem:[#allocation3 + $0xc] sm:$0xff] }
0x1fe2   :  { %2122 = vst.msk [vmem:[#allocation3 + $0x1c] sm:$0xc0] %vm821_vm3, %v2121_v55  ;;  %vm2441_vm3 = vcmask 386048  }
0x1fe3   :  { %2123 = vst.msk [vmem:[#allocation3 - $0x2] sm:$0xc0] %vm823_vm4, %v2121_v55  ;;  %v3687_v13 = vpop.permute.xlu0 %3686  ;;  %v2125_v55 = vld [vmem:[#allocation3 + $0x8] sm:$0xff]  ;;  %vm2488_vm4 = vcmask 1040384  }
0x1fe4   :  { %v3688_v44 = vunpack.i.l.bf16 %v3687_v13  ;;  %v3689_v6 = vunpack.i.h.bf16 %v3687_v13  ;;  %v2127_v13 = vld [vmem:[#allocation3 + $0x18] sm:$0xff] }
0x1fe6   :  { %v2190_v62 = vsel %vm348_vm12, %v2135_v39, %v3688_v44 }
0x1fe9   :  { %v2142_v41 = vld [vmem:[#allocation3 + $0x1e] sm:$0xff] }
0x1fea   :  { %v2129_v34 = vld [vmem:[#allocation3 + $0x2] sm:$0xff]  ;;  %v3695_v56 = vpack.i.bf16 %v2132_v47, %v2142_v41 }
0x1feb   :  { %v3680_v63 = vpack.i.bf16 %v2129_v34, %v2139_v43  ;;  %v2133_v46 = vld [vmem:[#allocation3 + $0x22] sm:$0x3]  ;;  %v2134_v58 = vld [vmem:[#allocation3 + $0x4] sm:$0xff]  ;;  %v2185_v43 = vsel %vm348_vm12, %v2125_v55, %v3689_v6  ;;  %v2136_v34 = vld [vmem:[#allocation3 + $0x14] sm:$0xff]  ;;  %v2332_v55 = vadd.s32 24, %v4342_v61 }
0x1fec   :  { %3696 = vrot.lane.b32.xlu0 %v3695_v56, %s3835_s4  ;;  %v3700_v32 = vpack.i.bf16 %v2133_v46, %v2143_v42  ;;  %v2124_v27 = vld [vmem:[#allocation3] sm:$0xff]  ;;  %v2126_v56 = vld [vmem:[#allocation3 + $0x10] sm:$0xff] }
0x1fed   :  { %3681 = vrot.lane.b32.xlu1 %v3680_v63, %s3835_s4 }
0x1ff1   :  { %3691 = vrot.lane.b32.xlu1 %v3690_v50, %s3835_s4  ;;  %v2137_v50 = vld [vmem:[#allocation3 + $0x1c] sm:$0xff] }
0x1ff5   :  { %3701 = vrot.lane.b32.xlu1 %v3700_v32, %s3835_s4  ;;  %v2138_v32 = vld [vmem:[#allocation3 + $0x24] sm:$0x3] }
0x205e   :  { %v3697_v49 = vpop.permute.xlu0 %3696 }
0x205f   :  { %v3682_v45 = vpop.permute.xlu1 %3681  ;;  %v3698_v47 = vunpack.i.l.bf16 %v3697_v49  ;;  %v3699_v60 = vunpack.i.h.bf16 %v3697_v49 }
0x2060   :  { %v3684_v20 = vunpack.i.h.bf16 %v3682_v45  ;;  %v3683_v33 = vunpack.i.l.bf16 %v3682_v45 }
0x2061   :  { %v2192_v42 = vsel %vm348_vm12, %v2137_v50, %v3698_v47  ;;  %v2187_v44 = vsel %vm348_vm12, %v2127_v13, %v3699_v60  ;;  %v3155_v47 = vld [vmem:[%s4972_s6] ss:$0 sm:$0xff]  ;;  %v2381_v50 = vand.u32 1, %v2332_v55 }
0x2062   :  { %v2189_v53 = vsel %vm348_vm12, %v2134_v58, %v3683_v33  ;;  %v2184_v40 = vsel %vm348_vm12, %v2124_v27, %v3684_v20  ;;  %v2128_v33 = vld [vmem:[#allocation3 + $0x20] sm:$0x3] }
0x2063   :  { %2297 = vmatprep.mubr.f32.mxu0 %v2189_v53  ;;  %v3692_v59 = vpop.permute.xlu1 %3691  ;;  %vm2419_vm10 = vcmp.eq.s32.totalorder %v2381_v50, 0  ;;  %vm2456_vm11 = vcmp.eq.s32.totalorder %v2381_v50, 1 }
0x2064   :  { %v3693_v51 = vunpack.i.l.bf16 %v3692_v59  ;;  %2298 = vmatmul.mubr.f32.vlgmr.msra.gmra.mrb[24].mxu0 %v2184_v40  ;;  %v3694_v54 = vunpack.i.h.bf16 %v3692_v59 }
0x2065   :  { %2302 = vmatprep.mubr.f32.mxu0 %v2190_v62 }
0x2066   :  { %v2191_v41 = vsel %vm348_vm12, %v2136_v34, %v3693_v51  ;;  %v2186_v52 = vsel %vm348_vm12, %v2126_v56, %v3694_v54  ;;  %v2331_v51 = vadd.s32 16, %v4342_v61  ;;  %v2360_v54 = vand.u32 1, %v4342_v61 }
0x2067   :  { %v3702_v63 = vpop.permute.xlu1 %3701 }
0x2068   :  { %2303 = vmatmul.mubr.f32.gmra.mrb[26].mxu0 %v2185_v43  ;;  %v3703_v46 = vunpack.i.l.bf16 %v3702_v63  ;;  %v3704_v45 = vunpack.i.h.bf16 %v3702_v63  ;;  %v2330_v43 = vadd.s32 8, %v4342_v61  ;;  %v2333_v63 = vadd.s32 32, %v4342_v61 }
0x2069   :  { %2307 = vmatprep.mubr.f32.mxu0 %v2191_v41  ;;  %v2374_v41 = vand.u32 1, %v2331_v51  ;;  %vm4717_vm5 = vcmp.eq.s32.totalorder %v2360_v54, 0  ;;  %vm4721_vm9 = vcmp.eq.s32.totalorder %v2360_v54, 1 }
0x206a   :  { %v2193_v20 = vsel %vm348_vm12, %v2138_v32, %v3703_v46  ;;  %v2188_v58 = vsel %vm348_vm12, %v2128_v33, %v3704_v45  ;;  %vm2339_vm12 = vcmp.ge.s32.totalorder %v4300_v48, 16 }
0x206b   :  { %vm2418_vm6 = vcmp.eq.s32.totalorder %v2374_v41, 0  ;;  %vm2455_vm7 = vcmp.eq.s32.totalorder %v2374_v41, 1  ;;  %vm2350_vm1 = vmand %vm2339_vm12, %vm2345_vm13 }
0x206c   :  { %2308 = vmatmul.mubr.f32.gmra.mrb[28].mxu0 %v2186_v52 }
0x206d   :  { %2312 = vmatprep.mubr.f32.mxu0 %v2192_v42  ;;  %v2367_v42 = vand.u32 1, %v2330_v43 }
0x206f   :  { %vm4727_vm14 = vcmp.eq.s32.totalorder %v2367_v42, 0  ;;  %vm4731_vm15 = vcmp.eq.s32.totalorder %v2367_v42, 1 }
0x2070   :  { %2313 = vmatmul.mubr.f32.gmra.mrb[30].mxu0 %v2187_v44  ;;  %v2388_v44 = vand.u32 1, %v2333_v63 }
0x2071   :  { %2317 = vmatprep.mubr.f32.mxu0 %v2193_v20 }
0x2072   :  { %vm4735_vm0 = vcmp.eq.s32.totalorder %v2388_v44, 0  ;;  %vm2457_vm2 = vcmp.eq.s32.totalorder %v2388_v44, 1 }
0x2074   :  { %2318 = vmatmul.mubr.f32.gmra.mrb[32].mxu0 %v2188_v58 }
0x2137   :  { %v3196_v27 = vpop.f32.mrb[24].mxu0 }
0x2138   :  { %v3197_v53 = vpop.f32.mrb[25].mxu0 }
0x2139   :  { %v3198_v40 = vadd.f32 %v3197_v53, %v3196_v27 }
0x213b   :  { %v3199_v6 = vpop.f32.mrb[26].mxu0  ;;  %v2300_v45 = vadd.f32 %v3198_v40, %v3155_v47 }
0x213c   :  { %v3200_v59 = vpop.f32.mrb[27].mxu0 }
0x213d   :  { %v3201_v39 = vadd.f32 %v3200_v59, %v3199_v6 }
0x213f   :  { %v3202_v62 = vpop.f32.mrb[28].mxu0  ;;  %v2305_v33 = vadd.f32 %v3201_v39, %v3155_v47 }
0x2140   :  { %v3203_v49 = vpop.f32.mrb[29].mxu0 }
0x2141   :  { %v3204_v34 = vadd.f32 %v3203_v49, %v3202_v62  ;;  %v2323_v62 = vmax.f32 %v2300_v45, 0.0  ;;  %v2324_v54 = vmax.f32 %v2305_v33, 0.0 }
0x2143   :  { %v2310_v56 = vadd.f32 %v3204_v34, %v3155_v47  ;;  %v3205_v60 = vpop.f32.mrb[30].mxu0  ;;  %v2432_v33 = vsel %vm4727_vm14, %v2324_v54, 0.0 }
0x2144   :  { %v3206_v52 = vpop.f32.mrb[31].mxu0 }
0x2145   :  { %v2325_v32 = vmax.f32 %v2310_v56, 0.0  ;;  %v3207_v13 = vadd.f32 %v3206_v52, %v3205_v60 }
0x2147   :  { %v2315_v58 = vadd.f32 %v3207_v13, %v3155_v47  ;;  %v3208_v27 = vpop.f32.mrb[32].mxu0  ;;  %v2433_v6 = vsel %vm2418_vm6, %v2325_v32, 0.0  ;;  %v2470_v40 = vsel %vm2455_vm7, %v2325_v32, 0.0  ;;  %v2468_v13 = vsel %vm4721_vm9, %v2323_v62, 0.0 }
0x2148   :  { %v3209_v53 = vpop.f32.mrb[33].mxu0  ;;  %v2439_v63 = vsel %vm2436_vm8, %v2433_v6, -inf  ;;  %v2475_v56 = vsel %vm2436_vm8, %v2470_v40, -inf  ;;  %v2473_v46 = vsel %vm2436_vm8, %v2468_v13, -inf }
0x2149   :  { %v2326_v59 = vmax.f32 %v2315_v58, 0.0  ;;  %v3210_v51 = vadd.f32 %v3209_v53, %v3208_v27  ;;  %v2469_v58 = vsel %vm4731_vm15, %v2324_v54, 0.0 }
0x214b   :  { %v2434_v43 = vsel %vm2419_vm10, %v2326_v59, 0.0  ;;  %v2471_v34 = vsel %vm2456_vm11, %v2326_v59, 0.0  ;;  %v2320_v41 = vadd.f32 %v3210_v51, %v3155_v47  ;;  %v2431_v47 = vsel %vm4717_vm5, %v2323_v62, 0.0 }
0x214c   :  { %v2440_v60 = vsel %vm2436_vm8, %v2434_v43, -inf  ;;  %v2476_v52 = vsel %vm2436_vm8, %v2471_v34, -inf  ;;  %v2437_v44 = vsel %vm2436_vm8, %v2431_v47, -inf  ;;  %v2438_v59 = vsel %vm2436_vm8, %v2432_v33, -inf }
0x214d   :  { %v2445_v50 = vmax.f32 %v2439_v63, %v2440_v60  ;;  %v2480_v42 = vmax.f32 %v2475_v56, %v2476_v52  ;;  %v2327_v32 = vmax.f32 %v2320_v41, 0.0  ;;  %v2474_v51 = vsel %vm2436_vm8, %v2469_v58, -inf }
0x214e   :  { %v3588_v58 = vpack.c.bf16 %v3949_v8, %v3914_v1 }
0x214f   :  { %v2355_v45 = vsel %vm2350_vm1, 0.0, %v2327_v32 }
0x2150   :  { %v2435_v48 = vsel %vm4735_vm0, %v2355_v45, 0.0  ;;  %v2472_v27 = vsel %vm2457_vm2, %v2355_v45, 0.0 }
0x2151   :  { %v2442_v53 = vsel %vm2441_vm3, %v2435_v48, -inf  ;;  %v2477_v6 = vsel %vm2441_vm3, %v2472_v27, -inf }
0x2152   :  { %v2443_v20 = vmax.f32 %v2437_v44, %v2442_v53  ;;  %v2478_v40 = vmax.f32 %v2473_v46, %v2477_v6 }
0x2154   :  { %v2444_v62 = vmax.f32 %v2443_v20, %v2438_v59  ;;  %v2479_v49 = vmax.f32 %v2478_v40, %v2474_v51 }
0x2156   :  { %v2446_v39 = vmax.f32 %v2444_v62, %v2445_v50  ;;  %v2481_v54 = vmax.f32 %v2479_v49, %v2480_v42  ;;  %v3590_v50 = vpack.c.bf16 %v3944_v7, %v3909_v0  ;;  %v3592_v42 = vpack.c.bf16 %v4019_v22, %v3984_v15 }
0x2158   :  { %v2447_v43 = vrot.slane %v2446_v39, 4  ;;  %v2482_v55 = vrot.slane %v2481_v54, 4 }
0x215a   :  { %v2448_v34 = vmax.f32 %v2446_v39, %v2447_v43  ;;  %v2483_v41 = vmax.f32 %v2481_v54, %v2482_v55 }
0x215c   :  { %v2449_v63 = vrot.slane %v2448_v34, 2  ;;  %v2484_v56 = vrot.slane %v2483_v41, 2 }
0x215e   :  { %v2450_v60 = vmax.f32 %v2448_v34, %v2449_v63  ;;  %v2485_v52 = vmax.f32 %v2483_v41, %v2484_v56 }
0x2160   :  { %v2451_v32 = vrot.slane %v2450_v60, 1  ;;  %v2486_v47 = vrot.slane %v2485_v52, 1 }
0x2162   :  { %v2452_v13 = vmax.f32 %v2450_v60, %v2451_v32  ;;  %v2487_v45 = vmax.f32 %v2485_v52, %v2486_v47 }
0x2164   :  { %v2489_v33 = vsel %vm2488_vm4, %v2452_v13, %v2487_v45 }
0x2165   :  { %3827 = dma.done.wait [#allocation5], 5376 }
0x2166   :  { %3828 = vsyncadd [#allocation5], 4294961920  ;;  %2948 = vmatprep.mubr.f32.mxu0 %v4993_v57  ;;  %3589 = vmatprep.subr.bf16.mxu1 %v3588_v58  ;;  %v3594_v48 = vpack.c.bf16 %v4014_v21, %v3979_v14  ;;  %v3596_v1 = vpack.c.bf16 %v4089_v36, %v4054_v29  ;;  %v3598_v0 = vpack.c.bf16 %v4084_v35, %v4049_v28  ;;  %v5006_v21 = vld [vmem:[#allocation16_spill] sm:$0xff]  ;;  %v5007_v22 = vld [vmem:[#allocation19_spill] sm:$0xff]  ;;  %vm3837_vm5 = vmmov 0   ;;  %s3840_s29 = smov [#allocation6]  }
0x2167   :  { %3591 = vmatpush1.bf16.msra.mxu1 %v3590_v50  ;;  %v3600_v7 = vpack.c.bf16 %v3959_v10, %v3924_v3  ;;  %v3602_v8 = vpack.c.bf16 %v3954_v9, %v3919_v2  ;;  %v3604_v14 = vpack.c.bf16 %v4029_v24, %v3994_v17  ;;  %v3606_v15 = vpack.c.bf16 %v4024_v23, %v3989_v16  ;;  %v5009_v23 = vld [vmem:[#allocation18_spill] sm:$0xff]  ;;  %v5014_v29 = vld [vmem:[#allocation17_spill] sm:$0xff]  ;;  %v2995_v63 = vld [vmem:[%s4976_s10 + $0x90] sm:$0xff]  ;;  %s3094_s30 = sshll.u32 %s3840_s29, 4  ;;  %s3095_s30 = int_to_ptr.vmem [resolvable:$true] %s3094_s30 }
0x2168   :  { %3593 = vmatprep.subr.bf16.mxu1 %v3592_v42  ;;  %v3608_v3 = vpack.c.bf16 %v4099_v38, %v4064_v31  ;;  %v3610_v2 = vpack.c.bf16 %v4094_v37, %v4059_v30  ;;  %v3612_v9 = vpack.c.bf16 %v3969_v12, %v3934_v5  ;;  %v3614_v10 = vpack.c.bf16 %v3964_v11, %v3929_v4  ;;  %v5008_v12 = vld [vmem:[#allocation15_spill] sm:$0xff]  ;;  %v5015_v30 = vld [vmem:[#allocation20_spill] sm:$0xff]  ;;  %v4828_v46 = vld [vmem:[%s4974_s8] sm:$0x7f]  ;;  %s3838_s8 = smov 120   ;;  %s3805_s13 = scalar_lea.vmem %s3095_s30, 32 }
0x2169   :  { %v3616_v16 = vpack.c.bf16 %v4039_v26, %v4004_v19  ;;  %v3618_v17 = vpack.c.bf16 %v4034_v25, %v3999_v18  ;;  %v3620_v5 = vpack.c.bf16 %v5007_v22, %v5006_v21  ;;  %v3622_v4 = vpack.c.bf16 %v5009_v23, %v5008_v12  ;;  %v5010_v11 = vld [vmem:[#allocation11_spill] sm:$0xff]  ;;  %v5011_v19 = vld [vmem:[#allocation12_spill] sm:$0xff]  ;;  %v5012_v18 = vld [vmem:[#allocation13_spill] sm:$0xff]  ;;  %p3806_p0 = scmp.ne.s32.totalorder %s3095_s30, %s3805_s13  ;;  %p3810_p1 = scmp.lt.s32.totalorder %s3095_s30, %s3095_s30 }
0x216a   :  { %v3625_v24 = vpack.c.bf16 %v5011_v19, %v5010_v11  ;;  %v3836_v26 = vmov 0.0|0.0   ;;  %v5013_v25 = vld [vmem:[#allocation14_spill] sm:$0xff]  ;;  %v3631_v31 = vpack.c.bf16 %v5015_v30, %v5014_v29  ;;  %v2564_v44 = vsub.s32 6, %v4342_v61  ;;  %v2996_v56 = vld [vmem:[%s4976_s10 + $0x98] sm:$0xff]  ;;  %v2979_v32 = vld [vmem:[%s4976_s10 + $0x10] sm:$0xff]  ;;  %p3811_p2 = scmp.lt.s32.totalorder %s3805_s13, %s3805_s13 }
0x216b   :  { %3595 = vmatpush1.bf16.msra.mxu1 %v3594_v48  ;;  %v3628_v28 = vpack.c.bf16 %v5013_v25, %v5012_v18  ;;  %v2879_v49 = vld [vmem:[%s4975_s9 + $0x8] sm:$0xff]  ;;  %v2878_v39 = vld [vmem:[%s4975_s9] sm:$0xff]  ;;  %v3637_v52 = vpack.c.bf16 %v2996_v56, %v2995_v63  ;;  %v2980_v47 = vld [vmem:[%s4976_s10 + $0x18] sm:$0xff]  ;;  %s3839_s9 = smov 112   ;;  %vm2874_vm6 = vcmask 1041408   ;;  %vm2876_vm7 = vcmask 1043456  }
0x216c   :  { %3597 = vmatprep.subr.bf16.mxu1 %v3596_v1  ;;  %v2565_v53 = vrot.slane %v4828_v46, %v2564_v44  ;;  %2884 = vmatprep.subr.mxu0 %v2879_v49  ;;  %v2993_v54 = vld [vmem:[%s4976_s10 + $0x80] sm:$0xff]  ;;  %v2994_v43 = vld [vmem:[%s4976_s10 + $0x88] sm:$0xff]  ;;  %v3003_v19 = vld [vmem:[%s4976_s10 + $0xd0] sm:$0xff]  ;;  %vm3086_vm9 = vcmask 58368   ;;  %p3812_p3 = por %p3811_p2, %p3810_p1 }
0x216d   :  { %2885 = vmatpush1.msra.mxu0 %v2878_v39  ;;  %v2977_v55 = vld [vmem:[%s4976_s10] sm:$0xff]  ;;  %v3633_v34 = vpack.c.bf16 %v2994_v43, %v2993_v54  ;;  %v2978_v41 = vld [vmem:[%s4976_s10 + $0x8] sm:$0xff]  ;;  %v2987_v18 = vld [vmem:[%s4976_s10 + $0x50] sm:$0xff]  ;;  %v2548_v39 = vsub.s32 2, %v4342_v61  ;;  %v2552_v54 = vsub.s32 3, %v4342_v61  ;;  %v2556_v43 = vsub.s32 4, %v4342_v61 }
0x216e   :  { %v3635_v60 = vpack.c.bf16 %v2978_v41, %v2977_v55  ;;  %v2997_v13 = vld [vmem:[%s4976_s10 + $0xa0] sm:$0xff]  ;;  %v2998_v45 = vld [vmem:[%s4976_s10 + $0xa8] sm:$0xff]  ;;  %v2988_v25 = vld [vmem:[%s4976_s10 + $0x58] sm:$0xff]  ;;  %v2560_v55 = vsub.s32 5, %v4342_v61  ;;  %p3813_p4 = pnand %p3812_p3, %p3806_p0 }
0x216f   :  { %3599 = vmatpush1.bf16.msra.mxu1 %v3598_v0  ;;  %v3641_v50 = vpack.c.bf16 %v2998_v45, %v2997_v13  ;;  %v2981_v42 = vld [vmem:[%s4976_s10 + $0x20] sm:$0xff]  ;;  %v2982_v48 = vld [vmem:[%s4976_s10 + $0x28] sm:$0xff]  ;;  %v2999_v0 = vld [vmem:[%s4976_s10 + $0xb0] sm:$0xff] }
0x2170   :  { %3601 = vmatprep.subr.bf16.mxu1 %v3600_v7  ;;  %v3000_v7 = vld [vmem:[%s4976_s10 + $0xb8] sm:$0xff]  ;;  %v2985_v21 = vld [vmem:[%s4976_s10 + $0x40] sm:$0xff]  ;;  %v2986_v22 = vld [vmem:[%s4976_s10 + $0x48] sm:$0xff] }
0x2171   :  { %v3005_v29 = vld [vmem:[%s4976_s10 + $0xe0] sm:$0xff]  ;;  %v3006_v30 = vld [vmem:[%s4976_s10 + $0xe8] sm:$0xff] }
0x2172   :  { %3156 = vmatmul.mubr.msk.f32.vlgmr.msra.gmra.mrb[16].mxu1 %vm2436_vm8, %v2489_v33  ;;  %v2989_v44 = vld [vmem:[%s4976_s10 + $0x60] sm:$0xff] }
0x2173   :  { %3603 = vmatpush1.bf16.msra.mxu1 %v3602_v8  ;;  %2711 = vmatprep.mubr.f32.mxu1 %v4993_v57  ;;  %v3643_v8 = vpack.c.bf16 %v2982_v48, %v2981_v42  ;;  %v5016_v41 = vld [vmem:[#allocation21_spill] sm:$0xff]  ;;  %v5017_v56 = vld [vmem:[#allocation22_spill] sm:$0xff] }
0x2174   :  { %3605 = vmatprep.subr.bf16.mxu1 %v3604_v14  ;;  %v3645_v14 = vpack.c.bf16 %v3000_v7, %v2999_v0  ;;  %v2541_v63 = vrot.slane %v4828_v46, %v5016_v41 }
0x2177   :  { %3607 = vmatpush1.bf16.msra.mxu1 %v3606_v15  ;;  %v2983_v15 = vld [vmem:[%s4976_s10 + $0x30] sm:$0xff] }
0x2178   :  { %3609 = vmatprep.subr.bf16.mxu1 %v3608_v3  ;;  %v2984_v3 = vld [vmem:[%s4976_s10 + $0x38] sm:$0xff] }
0x217b   :  { %3611 = vmatpush1.bf16.msra.mxu1 %v3610_v2 }
0x217c   :  { %3613 = vmatprep.subr.bf16.mxu1 %v3612_v9  ;;  %v3001_v9 = vld [vmem:[%s4976_s10 + $0xc0] sm:$0xff] }
0x217e   :  { %3157 = vmatmul.mubr.msk.f32.vlgmr.msra.gmra.mrb[18].mxu1 %vm2436_vm8, %v2489_v33 }
0x217f   :  { %3615 = vmatpush1.bf16.msra.mxu1 %v3614_v10  ;;  %2782 = vmatprep.mubr.f32.mxu1 %v4993_v57  ;;  %v3002_v10 = vld [vmem:[%s4976_s10 + $0xc8] sm:$0xff] }
0x2180   :  { %3617 = vmatprep.subr.bf16.mxu1 %v3616_v16  ;;  %v3647_v16 = vpack.c.bf16 %v2984_v3, %v2983_v15 }
0x2183   :  { %3619 = vmatpush1.bf16.msra.mxu1 %v3618_v17  ;;  %v3649_v17 = vpack.c.bf16 %v3002_v10, %v3001_v9 }
0x2184   :  { %3621 = vmatprep.subr.bf16.mxu1 %v3620_v5  ;;  %v3651_v5 = vpack.c.bf16 %v2986_v22, %v2985_v21 }
0x2187   :  { %3623 = vmatpush1.bf16.msra.mxu1 %v3622_v4 }
0x2188   :  { %3624 = vmatprep.subr.bf16.mxu1 %v3836_v26 }
0x218a   :  { %3158 = vmatmul.mubr.msk.f32.vlgmr.msra.gmra.mrb[20].mxu1 %vm2436_vm8, %v2489_v33 }
0x218b   :  { %3626 = vmatpush3.bf16.msra.mxu1 %v3625_v24  ;;  %3265 = vmatprep.mubr.msk.f32.mxu1 %vm3837_vm5, %v4993_v57  ;;  %v3004_v24 = vld [vmem:[%s4976_s10 + $0xd8] sm:$0xff] }
0x218c   :  { %3627 = vmatprep.subr.bf16.mxu1 %v3836_v26 }
0x218f   :  { %3629 = vmatpush3.bf16.msra.mxu1 %v3628_v28  ;;  %v3655_v28 = vpack.c.bf16 %v2988_v25, %v2987_v18 }
0x2190   :  { %3630 = vmatprep.subr.bf16.mxu1 %v3836_v26  ;;  %v3653_v26 = vpack.c.bf16 %v3004_v24, %v3003_v19 }
0x2193   :  { %3632 = vmatpush3.bf16.msra.mxu1 %v3631_v31  ;;  %v3657_v31 = vpack.c.bf16 %v3006_v30, %v3005_v29 }
0x2194   :  { %3634 = vmatprep.subr.bf16.mxu1 %v3633_v34  ;;  %v2549_v34 = vrot.slane %v4828_v46, %v2548_v39 }
0x2196   :  { %3266 = vmatmul.mubr.msk.f32.vlgmr.msra.gmra.mrb[22].mxu1 %vm2436_vm8, %v2489_v33  ;;  %v3639_v33 = vpack.c.bf16 %v2980_v47, %v2979_v32  ;;  %vm2880_vm8 = vcmask 64512   ;;  %v2557_v32 = vrot.slane %v4828_v46, %v2556_v43  ;;  %v2561_v47 = vrot.slane %v4828_v46, %v2560_v55 }
0x2197   :  { %3636 = vmatpush3.bf16.msra.mxu1 %v3635_v60  ;;  %v2545_v60 = vrot.slane %v4828_v46, %v5017_v56 }
0x2198   :  { %3638 = vmatprep.subr.bf16.mxu1 %v3637_v52  ;;  %v2553_v52 = vrot.slane %v4828_v46, %v2552_v54 }
0x219b   :  { %3640 = vmatpush3.bf16.msra.mxu1 %v3639_v33 }
0x219c   :  { %3642 = vmatprep.subr.bf16.mxu1 %v3641_v50 }
0x219f   :  { %3644 = vmatpush3.bf16.msra.mxu1 %v3643_v8 }
0x21a0   :  { %3646 = vmatprep.subr.bf16.mxu1 %v3645_v14 }
0x21a3   :  { %3648 = vmatpush3.bf16.msra.mxu1 %v3647_v16 }
0x21a4   :  { %3650 = vmatprep.subr.bf16.mxu1 %v3649_v17 }
0x21a7   :  { %3652 = vmatpush3.bf16.msra.mxu1 %v3651_v5 }
0x21a8   :  { %3654 = vmatprep.subr.bf16.mxu1 %v3653_v26 }
0x21ab   :  { %3656 = vmatpush3.bf16.msra.mxu1 %v3655_v28 }
0x21ac   :  { %3658 = vmatprep.subr.bf16.mxu1 %v3657_v31 }
0x2245   :  { %v4812_v35 = vpop.f32.mrb[16].mxu1 }
0x2246   :  { %v4814_v36 = vpop.f32.mrb[17].mxu1  ;;  %v2643_v45 = vadd.f32 %v4812_v35, %v2541_v63 }
0x2247   :  { %v2645_v61 = vadd.f32 %v4814_v36, %v2545_v60 }
0x2251   :  { %v4816_v37 = vpop.f32.mrb[18].mxu1 }
0x2252   :  { %v4818_v38 = vpop.f32.mrb[19].mxu1  ;;  %v2714_v13 = vadd.f32 %v4816_v37, %v2549_v34 }
0x2253   :  { %v2716_v33 = vadd.f32 %v4818_v38, %v2553_v52 }
0x225d   :  { %v4820_v27 = vpop.f32.mrb[20].mxu1 }
0x225e   :  { %v4822_v57 = vpop.f32.mrb[21].mxu1  ;;  %v2785_v50 = vadd.f32 %v4820_v27, %v2557_v32 }
0x225f   :  { %v2787_v7 = vadd.f32 %v4822_v57, %v2561_v47  ;;  %v3162_v57 = vld [vmem:[%s4977_s11] ss:$0 sm:$0xff] }
0x2269   :  { %v2855_v6 = vpop.f32.mrb[22].mxu1 }
0x226a   :  { %v2856_v20 = vadd.f32 %v2855_v6, %v2565_v53  ;;  %v3267_v40 = vpop.f32.mrb[23].mxu1  ;;  %v2990_v53 = vld [vmem:[%s4976_s10 + $0x68] sm:$0xff] }
0x226b   :  { %v3659_v6 = vpack.c.bf16 %v2990_v53, %v2989_v44  ;;  %v3008_v40 = vld [vmem:[%s4976_s10 + $0xf8] sm:$0xff] }
0x226c   :  { %v3160_v59 = vmul.f32 -1.442695, %v2856_v20  ;;  %v3007_v20 = vld [vmem:[%s4976_s10 + $0xf0] sm:$0xff] }
0x226d   :  { %3660 = vmatpush3.bf16.msra.mxu1 %v3659_v6 }
0x226e   :  { %3801 = vpow2.f32 %v3160_v59  ;;  %v3661_v59 = vpack.c.bf16 %v3008_v40, %v3007_v20 }
0x2270   :  { %3662 = vmatprep.subr.bf16.mxu1 %v3661_v59 }
0x2278   :  { %v3802_v51 = vpop.eup %3801 }
0x2279   :  { %v2862_v62 = vadd.f32 1.0, %v3802_v51  ;;  %v2991_v51 = vld [vmem:[%s4976_s10 + $0x70] sm:$0xff] }
0x227b   :  { %3803 = vrcp.f32 %v2862_v62  ;;  %v2992_v62 = vld [vmem:[%s4976_s10 + $0x78] sm:$0xff] }
0x227c   :  { %v3663_v49 = vpack.c.bf16 %v2992_v62, %v2991_v51 }
0x227e   :  { %3664 = vmatpush3.bf16.msra.mxu1 %v3663_v49 }
0x2285   :  { %v3804_v58 = vpop.eup %3803 }
0x2286   :  { %v2866_v1 = vrot.slane %v3804_v58, 6  ;;  %v2870_v2 = vrot.slane %v3804_v58, 4 }
0x2288   :  { %2867 = vrot.lane.b32.xlu0 %v2866_v1, %s3838_s8 }
0x228c   :  { %2871 = vrot.lane.b32.xlu0 %v2870_v2, %s3839_s9 }
0x22fa   :  { %v2868_v12 = vpop.permute.xlu0 %2867 }
0x22fb   :  { %v2875_v23 = vsel %vm2874_vm6, %v3804_v58, %v2868_v12 }
0x22fe   :  { %v2872_v4 = vpop.permute.xlu0 %2871 }
0x22ff   :  { %v2877_v11 = vsel %vm2876_vm7, %v2875_v23, %v2872_v4 }
0x2300   :  { %3161 = vmatmul.mubr.msk.f32.vlgmr.msra.gmra.mrb[34].mxu0 %vm2880_vm8, %v2877_v11 }
0x23d3   :  { %v2950_v58 = vpop.f32.mrb[34].mxu0 }
0x23d4   :  { %v2955_v42 = vmul.f32 %v2950_v58, %v2714_v13  ;;  %v2959_v48 = vrot.slane %v2950_v58, 2  ;;  %v2967_v1 = vrot.slane %v2950_v58, 4  ;;  %v2952_v0 = vpop.f32.mrb[35].mxu0 }
0x23d5   :  { %v2956_v8 = vmul.f32 %v2952_v0, %v2716_v33  ;;  %v2960_v14 = vrot.slane %v2952_v0, 2  ;;  %v2968_v46 = vrot.slane %v2952_v0, 4 }
0x23d6   :  { %v2963_v15 = vmul.f32 %v2959_v48, %v2785_v50  ;;  %v2971_v37 = vmul.f32 %v2967_v1, %v2643_v45 }
0x23d7   :  { %v2964_v3 = vmul.f32 %v2960_v14, %v2787_v7  ;;  %v2972_v35 = vmul.f32 %v2968_v46, %v2645_v61 }
0x23d8   :  { %v2965_v2 = vadd.f32 %v2963_v15, %v2955_v42 }
0x23d9   :  { %v2966_v36 = vadd.f32 %v2964_v3, %v2956_v8 }
0x23da   :  { %v2973_v9 = vadd.f32 %v2971_v37, %v2965_v2 }
0x23db   :  { %v2974_v38 = vadd.f32 %v2972_v35, %v2966_v36 }
0x23dc   :  { %v2975_v16 = vmax.f32 %v2973_v9, 0.0 }
0x23dd   :  { %v2976_v10 = vmax.f32 %v2974_v38, 0.0 }
0x23df   :  { %3080 = vmatprep.mubr.f32.mxu1 %v2976_v10 }
0x23e0   :  { %3081 = vmatmul.mubr.f32.vlgmr.msra.gmra.mrb[24].mxu1 %v2975_v16 }
0x24b3   :  { %v3250_v27 = vpop.f32.mrb[24].mxu1 }
0x24b4   :  { %v3251_v17 = vpop.f32.mrb[25].mxu1 }
0x24b5   :  { %v3252_v21 = vadd.f32 %v3251_v17, %v3250_v27 }
0x24b7   :  { %v3083_v22 = vadd.f32 %v3252_v21, %v3162_v57 }
0x24b9   :  { %3087 = vst.msk [vmem:[#allocation6] sm:$0x3] %vm3086_vm9, %v3083_v22 }
0x24ba   :  { %3816 = shalt.err (!%p3813_p4)
}
0x24bb   :  { %s3817_s16 = scalar_lea.hbm %s4978_s12, 32 }
0x24bc   :  { %p3818_p5 = scmp.ne.s32.totalorder %s4978_s12, %s3817_s16  ;;  %p3821_p6 = scmp.lt.u32.totalorder %s3817_s16, %s4978_s12 }
0x24be   :  { %p3823_p7 = pnand %p3821_p6, %p3818_p5 }
0x24c0   :  { %3826 = shalt.err (!%p3823_p7)
}
0x24c1   :  { %3097 = dma.vmem_to_hbm [thread:$0]  %s3095_s30, 32, %s4978_s12, [#allocation7]  }
0x24c2   :  { %3829 = dma.done.wait [#allocation7], 32  }
0x24c3   :  { %3830 = vsyncadd [#allocation7], 4294967264 }
0x24c4   :  { %3101 = vsyncpa [#allocation7], 1 }
0x24c5   :  { %3102 = vsyncmov [#allocation5] }
0x24c8   :  { %s3103_s6 = vpop.sfrf %3102 }
0x24c9   :  { %p3163_p8 = scmp.ne.s32.totalorder %s3103_s6, 0 }
0x24cb   :  { %3107 = shalt.err (%p3163_p8)  }

</bundles_post_ra>
